<compile_context>
chip_gen: v7x
topology: tpu7x:2x2x1
jax: 0.10.0
libtpu: 0.0.40
codegen_flags: <defaults>
</compile_context>

<pallas_src>
import functools

import jax
import jax.numpy as jnp
import numpy as np
from jax.experimental import pallas as pl
from jax.experimental.pallas import tpu as pltpu

BN_EPS = 1e-5


def _round_up(x, m):
    return (x + m - 1) // m * m


def _pick_batch_tile(n, p_rows):
    """Pick bt | n so M = bt*p_rows >= 256 (fills the 256-wide MXU on v6e/v7x) while
    keeping >= 2 grid steps (v7x has two TensorCores) and a bounded VMEM tile."""
    divisors = [d for d in range(1, n + 1) if n % d == 0]
    if n >= 2:
        divisors = [d for d in divisors if n // d >= 2]
    best = divisors[0]
    for d in divisors:
        if d * p_rows > 2048:          # keep the per-step VMEM tile bounded
            break
        best = d
        if d * p_rows >= 256:          # enough rows for the MXU
            break
    return best


# ---------------------------------------------------------------------------
# Fused Pallas kernel: in-kernel tap-accumulation conv + BN affine + residual + ReLU
# ---------------------------------------------------------------------------
def _conv_bn_kernel(x_ref, w_ref, s_ref, b_ref, *rest, tap_specs, s2, bt, ho, wo,
                    apply_relu, add_residual):
    """One batch-tile per grid step.

    x_ref : (bt*s2, Hph, Wph, Cin)  bf16 stride-phase view of the masked, padded input
    w_ref : (kh*kw, Cin, Coutp)     bf16 shared conv weight, resident across the grid
    s_ref : (1, Coutp)              f32 folded BN scale  (gamma / sqrt(var+eps))
    b_ref : (1, Coutp)              f32 folded bias      (beta + (conv_b - mean) * scale)
    r_ref : (bt, Ho*Wo, Coutp)      bf16 optional residual
    o_ref : (bt, Ho*Wo, Coutp)      bf16 output
    """
    if add_residual:
        r_ref, o_ref = rest
    else:
        (o_ref,) = rest
    p = ho * wo
    cout_p = o_ref.shape[-1]

    acc = jnp.zeros((bt * p, cout_p), jnp.float32)
    for t, (pidx, di, dj) in enumerate(tap_specs):
        parts = [
            x_ref[b * s2 + pidx, di:di + ho, dj:dj + wo, :].reshape(p, -1)
            for b in range(bt)
        ]
        lhs = parts[0] if bt == 1 else jnp.concatenate(parts, axis=0)     # (bt*p, Cin)
        acc = acc + jnp.dot(lhs, w_ref[t], preferred_element_type=jnp.float32)  # MXU

    out = acc * s_ref[...] + b_ref[...]                                    # f32 epilogue
    out = out.reshape(bt, p, cout_p)
    if add_residual:
        out = out + r_ref[...].astype(jnp.float32)
    if apply_relu:
        out = jnp.maximum(out, 0.0)
    o_ref[...] = out.astype(o_ref.dtype)


# ---------------------------------------------------------------------------
# Wrapper: one fused MaskedConv2d + BN(eval) [+ residual] [+ ReLU]
# ---------------------------------------------------------------------------
def masked_conv_bn(x, mask_e, w, conv_b, bn, *, kh, kw, stride, padding,
                   relu, num_estimators, residual=None):
    """x: (N, H, W, Cin_in) NHWC (f32 or bf16).  Cin_in may exceed w's true input
    channels (trailing channels must then be zero).  w: torch layout (Cout, Cin_w, kh, kw).
    mask_e: (E, Cin_w) per-estimator 0/1 channel mask.
    residual: optional (N, Ho, Wo, Coutp) bf16, channel-padded.
    Returns (N, Ho, Wo, Coutp) bf16 with Coutp = round_up(Cout, 128); padded channels are 0.
    """
    n, h, wd, cin_in = x.shape
    e = num_estimators
    assert n % e == 0
    b0 = n // e
    cout, cin_w = w.shape[0], w.shape[1]
    assert cin_in >= cin_w
    s = stride

    ho = (h + 2 * padding - kh) // s + 1
    wo = (wd + 2 * padding - kw) // s + 1
    p_rows = ho * wo
    cout_p = _round_up(cout, 128)

    # Fold the estimator mask into the activations (fuses with pad + bf16 cast).
    mask = jnp.pad(mask_e.astype(jnp.float32), ((0, 0), (0, cin_in - cin_w)))   # (E, Cin_in)
    mask_ns = jnp.repeat(mask, b0, axis=0)                                       # (N, Cin_in)
    xm = x.astype(jnp.float32) * mask_ns[:, None, None, :]

    # Spatial padding, sized so the stride-phase split is exact.
    hph = ho + (kh - 1) // s
    wph = wo + (kw - 1) // s
    xp = jnp.pad(xm, ((0, 0), (padding, padding), (padding, padding), (0, 0)))
    pad_h = max(0, s * hph - xp.shape[1])
    pad_w = max(0, s * wph - xp.shape[2])
    if pad_h or pad_w:
        xp = jnp.pad(xp, ((0, 0), (0, pad_h), (0, pad_w), (0, 0)))
    xp = xp[:, :s * hph, :s * wph, :].astype(jnp.bfloat16)

    # Stride-phase (space-to-depth) decomposition: one HBM pass, no 9x im2col blowup.
    if kh == 1 and kw == 1:
        s2 = 1
        tap_specs = ((0, 0, 0),)
        phases = xp[:, ::s, ::s, :]                       # only phase (0, 0) is used
    else:
        s2 = s * s
        tap_specs = tuple(((i % s) * s + (j % s), i // s, j // s)
                          for i in range(kh) for j in range(kw))
        phases = xp.reshape(n, hph, s, wph, s, cin_in)
        phases = phases.transpose(0, 2, 4, 1, 3, 5).reshape(n, s2, hph, wph, cin_in)
    phases = phases.reshape(n * s2, hph, wph, cin_in)

    # Shared weight: (taps, Cin_in, Coutp) bf16; zero-padded along Cin/Cout.
    wt = jnp.transpose(w, (2, 3, 1, 0)).reshape(kh * kw, cin_w, cout)
    wt = jnp.pad(wt, ((0, 0), (0, cin_in - cin_w), (0, cout_p - cout))).astype(jnp.bfloat16)

    # conv-bias + BatchNorm(eval) folded to scale/bias (f32, zero in the lane pad).
    gamma, beta, mean, var = bn
    scale = gamma / jnp.sqrt(var + BN_EPS)
    bias = beta + (conv_b - mean) * scale
    scale = jnp.pad(scale, (0, cout_p - cout)).reshape(1, cout_p).astype(jnp.float32)
    bias = jnp.pad(bias, (0, cout_p - cout)).reshape(1, cout_p).astype(jnp.float32)

    bt = _pick_batch_tile(n, p_rows)
    grid = (n // bt,)

    inputs = [phases, wt, scale, bias]
    in_specs = [
        pl.BlockSpec((bt * s2, hph, wph, cin_in), lambda i: (i, 0, 0, 0)),
        pl.BlockSpec((kh * kw, cin_in, cout_p), lambda i: (0, 0, 0)),
        pl.BlockSpec((1, cout_p), lambda i: (0, 0)),
        pl.BlockSpec((1, cout_p), lambda i: (0, 0)),
    ]
    if residual is not None:
        r = residual.reshape(n, p_rows, cout_p)           # free reshape; already bf16 + padded
        inputs.append(r)
        in_specs.append(pl.BlockSpec((bt, p_rows, cout_p), lambda i: (i, 0, 0)))

    kernel = functools.partial(
        _conv_bn_kernel, tap_specs=tap_specs, s2=s2, bt=bt, ho=ho, wo=wo,
        apply_relu=relu, add_residual=residual is not None)

    out = pl.pallas_call(
        kernel,
        out_shape=jax.ShapeDtypeStruct((n, p_rows, cout_p), jnp.bfloat16),
        grid=grid,
        in_specs=in_specs,
        out_specs=pl.BlockSpec((bt, p_rows, cout_p), lambda i: (i, 0, 0)),
        compiler_params=pltpu.CompilerParams(
            dimension_semantics=("parallel",),
            vmem_limit_bytes=64 * 1024 * 1024),
    )(*inputs)

    return out.reshape(n, ho, wo, cout_p)


# ---------------------------------------------------------------------------
# _BasicBlock forward
# ---------------------------------------------------------------------------
def basic_block_forward(x_nchw, params, *, stride, num_estimators, groups=1):
    assert groups == 1  # TODO(synk): grouped MaskedConv2d (groups>1 block-diagonal weight) not implemented
    x = jnp.transpose(x_nchw, (0, 2, 3, 1)).astype(jnp.float32)      # NCHW -> NHWC
    n, h, w, cin = x.shape
    planes = params["w1"].shape[0]
    cout_p = _round_up(planes, 128)

    # conv1 (3x3, stride) -> bn1 -> dropout(identity at eval) -> relu
    out = masked_conv_bn(x, params["mask1"], params["w1"], params["b1"], params["bn1"],
                         kh=3, kw=3, stride=stride, padding=1, relu=True,
                         num_estimators=num_estimators)               # (N, Ho, Wo, cout_p) bf16

    # shortcut branch (bf16, channel-padded to cout_p; padded channels are zero)
    if params["shortcut"] is None:
        res = jnp.pad(x, ((0, 0), (0, 0), (0, 0), (0, cout_p - cin))).astype(jnp.bfloat16)
    else:
        sc = params["shortcut"]
        res = masked_conv_bn(x, sc["mask"], sc["w"], sc["b"], sc["bn"],
                             kh=1, kw=1, stride=stride, padding=0, relu=False,
                             num_estimators=num_estimators)

    # conv2 (3x3, stride 1) -> bn2 -> (+shortcut) -> relu   (one fused kernel call)
    out = masked_conv_bn(out, params["mask2"], params["w2"], params["b2"], params["bn2"],
                         kh=3, kw=3, stride=1, padding=1, relu=True,
                         num_estimators=num_estimators, residual=res)

    out = out[..., :planes]                                           # strip lane padding once
    return jnp.transpose(out, (0, 3, 1, 2)).astype(jnp.float32)       # NHWC -> NCHW


# ---------------------------------------------------------------------------
# Pure-JAX reference (correctness check only)
# ---------------------------------------------------------------------------
def _ref_masked_conv_bn(x, mask_ns, w, conv_b, bn, stride, padding, relu, residual=None):
    xm = x * mask_ns[:, None, None, :]
    w_hwio = jnp.transpose(w, (2, 3, 1, 0))
    y = jax.lax.conv_general_dilated(
        xm, w_hwio, (stride, stride), [(padding, padding), (padding, padding)],
        dimension_numbers=("NHWC", "HWIO", "NHWC"),
        precision=jax.lax.Precision.HIGHEST)
    gamma, beta, mean, var = bn
    s = gamma / jnp.sqrt(var + BN_EPS)
    y = (y + conv_b) * s + (beta - mean * s)
    if residual is not None:
        y = y + residual
    if relu:
        y = jnp.maximum(y, 0.0)
    return y


def ref_block_forward(x_nchw, params, *, stride, num_estimators):
    x = jnp.transpose(x_nchw, (0, 2, 3, 1)).astype(jnp.float32)
    b0 = x.shape[0] // num_estimators
    mask1 = jnp.repeat(params["mask1"], b0, axis=0)
    out = _ref_masked_conv_bn(x, mask1, params["w1"], params["b1"], params["bn1"],
                              stride, 1, relu=True)
    if params["shortcut"] is None:
        res = x
    else:
        sc = params["shortcut"]
        mask_s = jnp.repeat(sc["mask"], b0, axis=0)
        res = _ref_masked_conv_bn(x, mask_s, sc["w"], sc["b"], sc["bn"],
                                  stride, 0, relu=False)
    mask2 = jnp.repeat(params["mask2"], b0, axis=0)
    out = _ref_masked_conv_bn(out, mask2, params["w2"], params["b2"], params["bn2"],
                              1, 1, relu=True, residual=res)
    return jnp.transpose(out, (0, 3, 1, 2))


# ---------------------------------------------------------------------------
# Deterministic parameter construction
# ---------------------------------------------------------------------------
def _init_bn(key, c):
    k1, k2, k3, k4 = jax.random.split(key, 4)
    gamma = jax.random.uniform(k1, (c,), jnp.float32, 0.5, 1.5)
    beta = 0.1 * jax.random.normal(k2, (c,), jnp.float32)
    mean = 0.1 * jax.random.normal(k3, (c,), jnp.float32)
    var = jax.random.uniform(k4, (c,), jnp.float32, 0.5, 1.5)
    return gamma, beta, mean, var


def _init_conv_w(key, cout, cin, kh, kw):
    fan_in = cin * kh * kw
    return jax.random.normal(key, (cout, cin, kh, kw), jnp.float32) * jnp.sqrt(2.0 / fan_in)


def _init_mask(key, num_estimators, c, scale):
    # Synthetic deterministic stand-in for the Masksembles mask generator:
    # binary mask per estimator keeping ~1/scale of the channels.
    return (jax.random.uniform(key, (num_estimators, c)) < (1.0 / scale)).astype(jnp.float32)


def make_params(key, in_planes, planes, stride, num_estimators, scale, conv_bias):
    keys = jax.random.split(key, 12)
    params = {
        "mask1": _init_mask(keys[0], num_estimators, in_planes, scale),
        "w1": _init_conv_w(keys[1], planes, in_planes, 3, 3),
        "b1": (0.1 * jax.random.normal(keys[2], (planes,), jnp.float32)
               if conv_bias else jnp.zeros((planes,), jnp.float32)),
        "bn1": _init_bn(keys[3], planes),
        "mask2": _init_mask(keys[4], num_estimators, planes, scale),
        "w2": _init_conv_w(keys[5], planes, planes, 3, 3),
        "b2": (0.1 * jax.random.normal(keys[6], (planes,), jnp.float32)
               if conv_bias else jnp.zeros((planes,), jnp.float32)),
        "bn2": _init_bn(keys[7], planes),
        "shortcut": None,
    }
    if stride != 1 or in_planes != planes:  # expansion = 1
        params["shortcut"] = {
            "mask": _init_mask(keys[8], num_estimators, in_planes, scale),
            "w": _init_conv_w(keys[9], planes, in_planes, 1, 1),
            "b": (0.1 * jax.random.normal(keys[10], (planes,), jnp.float32)
                  if conv_bias else jnp.zeros((planes,), jnp.float32)),
            "bn": _init_bn(keys[11], planes),
        }
    return params


if __name__ == "__main__":
    root = jax.random.PRNGKey(0)
    k_a, k_b, kx_a, kx_b = jax.random.split(root, 4)

    num_estimators = 2
    scale = 2.0

    # Config A: stride=2, in_planes != planes  -> conv shortcut path
    in_a, planes_a, stride_a = 8, 16, 2
    x_a = jax.random.normal(kx_a, (4, in_a, 16, 16), jnp.float32)    # N = num_estimators * 2
    p_a = make_params(k_a, in_a, planes_a, stride_a, num_estimators, scale, conv_bias=False)
    fwd_a = jax.jit(functools.partial(basic_block_forward,
                                      stride=stride_a, num_estimators=num_estimators))
    out_a = jax.block_until_ready(fwd_a(x_a, p_a))
    ref_a = ref_block_forward(x_a, p_a, stride=stride_a, num_estimators=num_estimators)
    # bf16 MXU operands / bf16 intermediate streams vs. an f32 HIGHEST-precision reference.
    np.testing.assert_allclose(np.asarray(out_a), np.asarray(ref_a), rtol=2e-2, atol=5e-2)
    assert out_a.shape == (4, planes_a, 8, 8)

    # Config B: stride=1, in_planes == planes  -> identity shortcut path
    in_b, planes_b, stride_b = 8, 8, 1
    x_b = jax.random.normal(kx_b, (4, in_b, 16, 16), jnp.float32)
    p_b = make_params(k_b, in_b, planes_b, stride_b, num_estimators, scale, conv_bias=True)
    fwd_b = jax.jit(functools.partial(basic_block_forward,
                                      stride=stride_b, num_estimators=num_estimators))
    out_b = jax.block_until_ready(fwd_b(x_b, p_b))
    ref_b = ref_block_forward(x_b, p_b, stride=stride_b, num_estimators=num_estimators)
    np.testing.assert_allclose(np.asarray(out_b), np.asarray(ref_b), rtol=2e-2, atol=5e-2)
    assert out_b.shape == (4, planes_b, 16, 16)

    print("KERNEL_OK")
</pallas_src>

<mosaic_0001>
module attributes {stable_mosaic.version = 11 : i64} {
  func.func @_conv_bn_kernel(%arg0: i32, %arg1: memref<8x9x9x8xbf16, #tpu.memory_space<vmem>>, %arg2: memref<9x8x128xbf16, #tpu.memory_space<vmem>>, %arg3: memref<1x128xf32, #tpu.memory_space<vmem>>, %arg4: memref<1x128xf32, #tpu.memory_space<vmem>>, %arg5: memref<2x64x128xbf16, #tpu.memory_space<vmem>>) attributes {dimension_semantics = [#tpu.dimension_semantics<parallel>], iteration_bounds = array<i64: 2>, scalar_prefetch = 0 : i64, scratch_operands = 0 : i64, tpu.core_type = #tpu.core_type<tc>, window_params = [{transform_indices = @transform_0, window_bounds = array<i64: 8, 9, 9, 8>}, {pipeline_mode = #tpu.pipeline_mode<synchronous>, transform_indices = @transform_1, window_bounds = array<i64: 9, 8, 128>}, {pipeline_mode = #tpu.pipeline_mode<synchronous>, transform_indices = @transform_2, window_bounds = array<i64: 1, 128>}, {pipeline_mode = #tpu.pipeline_mode<synchronous>, transform_indices = @transform_3, window_bounds = array<i64: 1, 128>}, {transform_indices = @transform_4, window_bounds = array<i64: 2, 64, 128>}]} {
    %cst = arith.constant 0.000000e+00 : f32
    %0 = vector.broadcast %cst : f32 to vector<128x128xf32>
    %c0 = arith.constant 0 : index
    %c0_0 = arith.constant 0 : index
    %c0_1 = arith.constant 0 : index
    %c0_2 = arith.constant 0 : index
    %1 = vector.load %arg1[%c0, %c0_0, %c0_1, %c0_2] : memref<8x9x9x8xbf16, #tpu.memory_space<vmem>>, vector<1x8x8x8xbf16>
    %2 = vector.shape_cast %1 : vector<1x8x8x8xbf16> to vector<8x8x8xbf16>
    %3 = vector.shape_cast %2 : vector<8x8x8xbf16> to vector<64x8xbf16>
    %c4 = arith.constant 4 : index
    %c0_3 = arith.constant 0 : index
    %c0_4 = arith.constant 0 : index
    %c0_5 = arith.constant 0 : index
    %4 = vector.load %arg1[%c4, %c0_3, %c0_4, %c0_5] : memref<8x9x9x8xbf16, #tpu.memory_space<vmem>>, vector<1x8x8x8xbf16>
    %5 = vector.shape_cast %4 : vector<1x8x8x8xbf16> to vector<8x8x8xbf16>
    %6 = vector.shape_cast %5 : vector<8x8x8xbf16> to vector<64x8xbf16>
    %7 = tpu.concatenate %3, %6 in 0 : vector<64x8xbf16>, vector<64x8xbf16> -> vector<128x8xbf16>
    %c0_6 = arith.constant 0 : index
    %c0_7 = arith.constant 0 : index
    %c0_8 = arith.constant 0 : index
    %8 = vector.load %arg2[%c0_6, %c0_7, %c0_8] : memref<9x8x128xbf16, #tpu.memory_space<vmem>>, vector<1x8x128xbf16>
    %9 = vector.shape_cast %8 : vector<1x8x128xbf16> to vector<8x128xbf16>
    %cst_9 = arith.constant dense<0.000000e+00> : vector<128x128xf32>
    %10 = tpu.matmul %7, %9, %cst_9 {dimension_numbers = #tpu.dot_dimension_numbers<[1], [0], [0], [1], [0, 0, 1, 1], [], []>} : vector<128x8xbf16>, vector<8x128xbf16>, vector<128x128xf32> -> vector<128x128xf32>
    %11 = arith.addf %0, %10 : vector<128x128xf32>
    %c1 = arith.constant 1 : index
    %c0_10 = arith.constant 0 : index
    %c0_11 = arith.constant 0 : index
    %c0_12 = arith.constant 0 : index
    %12 = vector.load %arg1[%c1, %c0_10, %c0_11, %c0_12] : memref<8x9x9x8xbf16, #tpu.memory_space<vmem>>, vector<1x8x8x8xbf16>
    %13 = vector.shape_cast %12 : vector<1x8x8x8xbf16> to vector<8x8x8xbf16>
    %14 = vector.shape_cast %13 : vector<8x8x8xbf16> to vector<64x8xbf16>
    %c5 = arith.constant 5 : index
    %c0_13 = arith.constant 0 : index
    %c0_14 = arith.constant 0 : index
    %c0_15 = arith.constant 0 : index
    %15 = vector.load %arg1[%c5, %c0_13, %c0_14, %c0_15] : memref<8x9x9x8xbf16, #tpu.memory_space<vmem>>, vector<1x8x8x8xbf16>
    %16 = vector.shape_cast %15 : vector<1x8x8x8xbf16> to vector<8x8x8xbf16>
    %17 = vector.shape_cast %16 : vector<8x8x8xbf16> to vector<64x8xbf16>
    %18 = tpu.concatenate %14, %17 in 0 : vector<64x8xbf16>, vector<64x8xbf16> -> vector<128x8xbf16>
    %c1_16 = arith.constant 1 : index
    %c0_17 = arith.constant 0 : index
    %c0_18 = arith.constant 0 : index
    %19 = vector.load %arg2[%c1_16, %c0_17, %c0_18] : memref<9x8x128xbf16, #tpu.memory_space<vmem>>, vector<1x8x128xbf16>
    %20 = vector.shape_cast %19 : vector<1x8x128xbf16> to vector<8x128xbf16>
    %cst_19 = arith.constant dense<0.000000e+00> : vector<128x128xf32>
    %21 = tpu.matmul %18, %20, %cst_19 {dimension_numbers = #tpu.dot_dimension_numbers<[1], [0], [0], [1], [0, 0, 1, 1], [], []>} : vector<128x8xbf16>, vector<8x128xbf16>, vector<128x128xf32> -> vector<128x128xf32>
    %22 = arith.addf %11, %21 : vector<128x128xf32>
    %c0_20 = arith.constant 0 : index
    %c0_21 = arith.constant 0 : index
    %c1_22 = arith.constant 1 : index
    %c0_23 = arith.constant 0 : index
    %23 = vector.load %arg1[%c0_20, %c0_21, %c1_22, %c0_23] : memref<8x9x9x8xbf16, #tpu.memory_space<vmem>>, vector<1x8x8x8xbf16>
    %24 = vector.shape_cast %23 : vector<1x8x8x8xbf16> to vector<8x8x8xbf16>
    %25 = vector.shape_cast %24 : vector<8x8x8xbf16> to vector<64x8xbf16>
    %c4_24 = arith.constant 4 : index
    %c0_25 = arith.constant 0 : index
    %c1_26 = arith.constant 1 : index
    %c0_27 = arith.constant 0 : index
    %26 = vector.load %arg1[%c4_24, %c0_25, %c1_26, %c0_27] : memref<8x9x9x8xbf16, #tpu.memory_space<vmem>>, vector<1x8x8x8xbf16>
    %27 = vector.shape_cast %26 : vector<1x8x8x8xbf16> to vector<8x8x8xbf16>
    %28 = vector.shape_cast %27 : vector<8x8x8xbf16> to vector<64x8xbf16>
    %29 = tpu.concatenate %25, %28 in 0 : vector<64x8xbf16>, vector<64x8xbf16> -> vector<128x8xbf16>
    %c2 = arith.constant 2 : index
    %c0_28 = arith.constant 0 : index
    %c0_29 = arith.constant 0 : index
    %30 = vector.load %arg2[%c2, %c0_28, %c0_29] : memref<9x8x128xbf16, #tpu.memory_space<vmem>>, vector<1x8x128xbf16>
    %31 = vector.shape_cast %30 : vector<1x8x128xbf16> to vector<8x128xbf16>
    %cst_30 = arith.constant dense<0.000000e+00> : vector<128x128xf32>
    %32 = tpu.matmul %29, %31, %cst_30 {dimension_numbers = #tpu.dot_dimension_numbers<[1], [0], [0], [1], [0, 0, 1, 1], [], []>} : vector<128x8xbf16>, vector<8x128xbf16>, vector<128x128xf32> -> vector<128x128xf32>
    %33 = arith.addf %22, %32 : vector<128x128xf32>
    %c2_31 = arith.constant 2 : index
    %c0_32 = arith.constant 0 : index
    %c0_33 = arith.constant 0 : index
    %c0_34 = arith.constant 0 : index
    %34 = vector.load %arg1[%c2_31, %c0_32, %c0_33, %c0_34] : memref<8x9x9x8xbf16, #tpu.memory_space<vmem>>, vector<1x8x8x8xbf16>
    %35 = vector.shape_cast %34 : vector<1x8x8x8xbf16> to vector<8x8x8xbf16>
    %36 = vector.shape_cast %35 : vector<8x8x8xbf16> to vector<64x8xbf16>
    %c6 = arith.constant 6 : index
    %c0_35 = arith.constant 0 : index
    %c0_36 = arith.constant 0 : index
    %c0_37 = arith.constant 0 : index
    %37 = vector.load %arg1[%c6, %c0_35, %c0_36, %c0_37] : memref<8x9x9x8xbf16, #tpu.memory_space<vmem>>, vector<1x8x8x8xbf16>
    %38 = vector.shape_cast %37 : vector<1x8x8x8xbf16> to vector<8x8x8xbf16>
    %39 = vector.shape_cast %38 : vector<8x8x8xbf16> to vector<64x8xbf16>
    %40 = tpu.concatenate %36, %39 in 0 : vector<64x8xbf16>, vector<64x8xbf16> -> vector<128x8xbf16>
    %c3 = arith.constant 3 : index
    %c0_38 = arith.constant 0 : index
    %c0_39 = arith.constant 0 : index
    %41 = vector.load %arg2[%c3, %c0_38, %c0_39] : memref<9x8x128xbf16, #tpu.memory_space<vmem>>, vector<1x8x128xbf16>
    %42 = vector.shape_cast %41 : vector<1x8x128xbf16> to vector<8x128xbf16>
    %cst_40 = arith.constant dense<0.000000e+00> : vector<128x128xf32>
    %43 = tpu.matmul %40, %42, %cst_40 {dimension_numbers = #tpu.dot_dimension_numbers<[1], [0], [0], [1], [0, 0, 1, 1], [], []>} : vector<128x8xbf16>, vector<8x128xbf16>, vector<128x128xf32> -> vector<128x128xf32>
    %44 = arith.addf %33, %43 : vector<128x128xf32>
    %c3_41 = arith.constant 3 : index
    %c0_42 = arith.constant 0 : index
    %c0_43 = arith.constant 0 : index
    %c0_44 = arith.constant 0 : index
    %45 = vector.load %arg1[%c3_41, %c0_42, %c0_43, %c0_44] : memref<8x9x9x8xbf16, #tpu.memory_space<vmem>>, vector<1x8x8x8xbf16>
    %46 = vector.shape_cast %45 : vector<1x8x8x8xbf16> to vector<8x8x8xbf16>
    %47 = vector.shape_cast %46 : vector<8x8x8xbf16> to vector<64x8xbf16>
    %c7 = arith.constant 7 : index
    %c0_45 = arith.constant 0 : index
    %c0_46 = arith.constant 0 : index
    %c0_47 = arith.constant 0 : index
    %48 = vector.load %arg1[%c7, %c0_45, %c0_46, %c0_47] : memref<8x9x9x8xbf16, #tpu.memory_space<vmem>>, vector<1x8x8x8xbf16>
    %49 = vector.shape_cast %48 : vector<1x8x8x8xbf16> to vector<8x8x8xbf16>
    %50 = vector.shape_cast %49 : vector<8x8x8xbf16> to vector<64x8xbf16>
    %51 = tpu.concatenate %47, %50 in 0 : vector<64x8xbf16>, vector<64x8xbf16> -> vector<128x8xbf16>
    %c4_48 = arith.constant 4 : index
    %c0_49 = arith.constant 0 : index
    %c0_50 = arith.constant 0 : index
    %52 = vector.load %arg2[%c4_48, %c0_49, %c0_50] : memref<9x8x128xbf16, #tpu.memory_space<vmem>>, vector<1x8x128xbf16>
    %53 = vector.shape_cast %52 : vector<1x8x128xbf16> to vector<8x128xbf16>
    %cst_51 = arith.constant dense<0.000000e+00> : vector<128x128xf32>
    %54 = tpu.matmul %51, %53, %cst_51 {dimension_numbers = #tpu.dot_dimension_numbers<[1], [0], [0], [1], [0, 0, 1, 1], [], []>} : vector<128x8xbf16>, vector<8x128xbf16>, vector<128x128xf32> -> vector<128x128xf32>
    %55 = arith.addf %44, %54 : vector<128x128xf32>
    %c2_52 = arith.constant 2 : index
    %c0_53 = arith.constant 0 : index
    %c1_54 = arith.constant 1 : index
    %c0_55 = arith.constant 0 : index
    %56 = vector.load %arg1[%c2_52, %c0_53, %c1_54, %c0_55] : memref<8x9x9x8xbf16, #tpu.memory_space<vmem>>, vector<1x8x8x8xbf16>
    %57 = vector.shape_cast %56 : vector<1x8x8x8xbf16> to vector<8x8x8xbf16>
    %58 = vector.shape_cast %57 : vector<8x8x8xbf16> to vector<64x8xbf16>
    %c6_56 = arith.constant 6 : index
    %c0_57 = arith.constant 0 : index
    %c1_58 = arith.constant 1 : index
    %c0_59 = arith.constant 0 : index
    %59 = vector.load %arg1[%c6_56, %c0_57, %c1_58, %c0_59] : memref<8x9x9x8xbf16, #tpu.memory_space<vmem>>, vector<1x8x8x8xbf16>
    %60 = vector.shape_cast %59 : vector<1x8x8x8xbf16> to vector<8x8x8xbf16>
    %61 = vector.shape_cast %60 : vector<8x8x8xbf16> to vector<64x8xbf16>
    %62 = tpu.concatenate %58, %61 in 0 : vector<64x8xbf16>, vector<64x8xbf16> -> vector<128x8xbf16>
    %c5_60 = arith.constant 5 : index
    %c0_61 = arith.constant 0 : index
    %c0_62 = arith.constant 0 : index
    %63 = vector.load %arg2[%c5_60, %c0_61, %c0_62] : memref<9x8x128xbf16, #tpu.memory_space<vmem>>, vector<1x8x128xbf16>
    %64 = vector.shape_cast %63 : vector<1x8x128xbf16> to vector<8x128xbf16>
    %cst_63 = arith.constant dense<0.000000e+00> : vector<128x128xf32>
    %65 = tpu.matmul %62, %64, %cst_63 {dimension_numbers = #tpu.dot_dimension_numbers<[1], [0], [0], [1], [0, 0, 1, 1], [], []>} : vector<128x8xbf16>, vector<8x128xbf16>, vector<128x128xf32> -> vector<128x128xf32>
    %66 = arith.addf %55, %65 : vector<128x128xf32>
    %c0_64 = arith.constant 0 : index
    %c1_65 = arith.constant 1 : index
    %c0_66 = arith.constant 0 : index
    %c0_67 = arith.constant 0 : index
    %67 = vector.load %arg1[%c0_64, %c1_65, %c0_66, %c0_67] : memref<8x9x9x8xbf16, #tpu.memory_space<vmem>>, vector<1x8x8x8xbf16>
    %68 = vector.shape_cast %67 : vector<1x8x8x8xbf16> to vector<8x8x8xbf16>
    %69 = vector.shape_cast %68 : vector<8x8x8xbf16> to vector<64x8xbf16>
    %c4_68 = arith.constant 4 : index
    %c1_69 = arith.constant 1 : index
    %c0_70 = arith.constant 0 : index
    %c0_71 = arith.constant 0 : index
    %70 = vector.load %arg1[%c4_68, %c1_69, %c0_70, %c0_71] : memref<8x9x9x8xbf16, #tpu.memory_space<vmem>>, vector<1x8x8x8xbf16>
    %71 = vector.shape_cast %70 : vector<1x8x8x8xbf16> to vector<8x8x8xbf16>
    %72 = vector.shape_cast %71 : vector<8x8x8xbf16> to vector<64x8xbf16>
    %73 = tpu.concatenate %69, %72 in 0 : vector<64x8xbf16>, vector<64x8xbf16> -> vector<128x8xbf16>
    %c6_72 = arith.constant 6 : index
    %c0_73 = arith.constant 0 : index
    %c0_74 = arith.constant 0 : index
    %74 = vector.load %arg2[%c6_72, %c0_73, %c0_74] : memref<9x8x128xbf16, #tpu.memory_space<vmem>>, vector<1x8x128xbf16>
    %75 = vector.shape_cast %74 : vector<1x8x128xbf16> to vector<8x128xbf16>
    %cst_75 = arith.constant dense<0.000000e+00> : vector<128x128xf32>
    %76 = tpu.matmul %73, %75, %cst_75 {dimension_numbers = #tpu.dot_dimension_numbers<[1], [0], [0], [1], [0, 0, 1, 1], [], []>} : vector<128x8xbf16>, vector<8x128xbf16>, vector<128x128xf32> -> vector<128x128xf32>
    %77 = arith.addf %66, %76 : vector<128x128xf32>
    %c1_76 = arith.constant 1 : index
    %c1_77 = arith.constant 1 : index
    %c0_78 = arith.constant 0 : index
    %c0_79 = arith.constant 0 : index
    %78 = vector.load %arg1[%c1_76, %c1_77, %c0_78, %c0_79] : memref<8x9x9x8xbf16, #tpu.memory_space<vmem>>, vector<1x8x8x8xbf16>
    %79 = vector.shape_cast %78 : vector<1x8x8x8xbf16> to vector<8x8x8xbf16>
    %80 = vector.shape_cast %79 : vector<8x8x8xbf16> to vector<64x8xbf16>
    %c5_80 = arith.constant 5 : index
    %c1_81 = arith.constant 1 : index
    %c0_82 = arith.constant 0 : index
    %c0_83 = arith.constant 0 : index
    %81 = vector.load %arg1[%c5_80, %c1_81, %c0_82, %c0_83] : memref<8x9x9x8xbf16, #tpu.memory_space<vmem>>, vector<1x8x8x8xbf16>
    %82 = vector.shape_cast %81 : vector<1x8x8x8xbf16> to vector<8x8x8xbf16>
    %83 = vector.shape_cast %82 : vector<8x8x8xbf16> to vector<64x8xbf16>
    %84 = tpu.concatenate %80, %83 in 0 : vector<64x8xbf16>, vector<64x8xbf16> -> vector<128x8xbf16>
    %c7_84 = arith.constant 7 : index
    %c0_85 = arith.constant 0 : index
    %c0_86 = arith.constant 0 : index
    %85 = vector.load %arg2[%c7_84, %c0_85, %c0_86] : memref<9x8x128xbf16, #tpu.memory_space<vmem>>, vector<1x8x128xbf16>
    %86 = vector.shape_cast %85 : vector<1x8x128xbf16> to vector<8x128xbf16>
    %cst_87 = arith.constant dense<0.000000e+00> : vector<128x128xf32>
    %87 = tpu.matmul %84, %86, %cst_87 {dimension_numbers = #tpu.dot_dimension_numbers<[1], [0], [0], [1], [0, 0, 1, 1], [], []>} : vector<128x8xbf16>, vector<8x128xbf16>, vector<128x128xf32> -> vector<128x128xf32>
    %88 = arith.addf %77, %87 : vector<128x128xf32>
    %c0_88 = arith.constant 0 : index
    %c1_89 = arith.constant 1 : index
    %c1_90 = arith.constant 1 : index
    %c0_91 = arith.constant 0 : index
    %89 = vector.load %arg1[%c0_88, %c1_89, %c1_90, %c0_91] : memref<8x9x9x8xbf16, #tpu.memory_space<vmem>>, vector<1x8x8x8xbf16>
    %90 = vector.shape_cast %89 : vector<1x8x8x8xbf16> to vector<8x8x8xbf16>
    %91 = vector.shape_cast %90 : vector<8x8x8xbf16> to vector<64x8xbf16>
    %c4_92 = arith.constant 4 : index
    %c1_93 = arith.constant 1 : index
    %c1_94 = arith.constant 1 : index
    %c0_95 = arith.constant 0 : index
    %92 = vector.load %arg1[%c4_92, %c1_93, %c1_94, %c0_95] : memref<8x9x9x8xbf16, #tpu.memory_space<vmem>>, vector<1x8x8x8xbf16>
    %93 = vector.shape_cast %92 : vector<1x8x8x8xbf16> to vector<8x8x8xbf16>
    %94 = vector.shape_cast %93 : vector<8x8x8xbf16> to vector<64x8xbf16>
    %95 = tpu.concatenate %91, %94 in 0 : vector<64x8xbf16>, vector<64x8xbf16> -> vector<128x8xbf16>
    %c8 = arith.constant 8 : index
    %c0_96 = arith.constant 0 : index
    %c0_97 = arith.constant 0 : index
    %96 = vector.load %arg2[%c8, %c0_96, %c0_97] : memref<9x8x128xbf16, #tpu.memory_space<vmem>>, vector<1x8x128xbf16>
    %97 = vector.shape_cast %96 : vector<1x8x128xbf16> to vector<8x128xbf16>
    %cst_98 = arith.constant dense<0.000000e+00> : vector<128x128xf32>
    %98 = tpu.matmul %95, %97, %cst_98 {dimension_numbers = #tpu.dot_dimension_numbers<[1], [0], [0], [1], [0, 0, 1, 1], [], []>} : vector<128x8xbf16>, vector<8x128xbf16>, vector<128x128xf32> -> vector<128x128xf32>
    %99 = arith.addf %88, %98 : vector<128x128xf32>
    %c0_99 = arith.constant 0 : index
    %c0_100 = arith.constant 0 : index
    %100 = vector.load %arg3[%c0_99, %c0_100] : memref<1x128xf32, #tpu.memory_space<vmem>>, vector<1x128xf32>
    %101 = vector.broadcast %100 : vector<1x128xf32> to vector<128x128xf32>
    %102 = arith.mulf %99, %101 : vector<128x128xf32>
    %c0_101 = arith.constant 0 : index
    %c0_102 = arith.constant 0 : index
    %103 = vector.load %arg4[%c0_101, %c0_102] : memref<1x128xf32, #tpu.memory_space<vmem>>, vector<1x128xf32>
    %104 = vector.broadcast %103 : vector<1x128xf32> to vector<128x128xf32>
    %105 = arith.addf %102, %104 : vector<128x128xf32>
    %106 = vector.shape_cast %105 : vector<128x128xf32> to vector<2x64x128xf32>
    %cst_103 = arith.constant 0.000000e+00 : f32
    %107 = vector.broadcast %cst_103 : f32 to vector<2x64x128xf32>
    %108 = arith.maximumf %106, %107 : vector<2x64x128xf32>
    %109 = arith.truncf %108 : vector<2x64x128xf32> to vector<2x64x128xbf16>
    %c0_104 = arith.constant 0 : index
    %c0_105 = arith.constant 0 : index
    %c0_106 = arith.constant 0 : index
    %110 = vector.load %arg5[%c0_104, %c0_105, %c0_106] : memref<2x64x128xbf16, #tpu.memory_space<vmem>>, vector<2x64x128xbf16>
    tpu.vector_store %arg5[%c0_104, %c0_105, %c0_106], %109 {strides = array<i32>} : memref<2x64x128xbf16, #tpu.memory_space<vmem>>, vector<2x64x128xbf16>,
    return
  }
  func.func @transform_0(%arg0: i32) -> (i32, i32, i32, i32) {
    %c0_i32 = arith.constant 0 : i32
    %c0_i32_0 = arith.constant 0 : i32
    %c0_i32_1 = arith.constant 0 : i32
    %c0_i32_2 = arith.constant 0 : i32
    return %arg0, %c0_i32, %c0_i32_0, %c0_i32_1 : i32, i32, i32, i32
  }
  func.func @transform_1(%arg0: i32) -> (i32, i32, i32) {
    %c0_i32 = arith.constant 0 : i32
    %c0_i32_0 = arith.constant 0 : i32
    %c0_i32_1 = arith.constant 0 : i32
    %c0_i32_2 = arith.constant 0 : i32
    return %c0_i32, %c0_i32_0, %c0_i32_1 : i32, i32, i32
  }
  func.func @transform_2(%arg0: i32) -> (i32, i32) {
    %c0_i32 = arith.constant 0 : i32
    %c0_i32_0 = arith.constant 0 : i32
    %c0_i32_1 = arith.constant 0 : i32
    return %c0_i32, %c0_i32_0 : i32, i32
  }
  func.func @transform_3(%arg0: i32) -> (i32, i32) {
    %c0_i32 = arith.constant 0 : i32
    %c0_i32_0 = arith.constant 0 : i32
    %c0_i32_1 = arith.constant 0 : i32
    return %c0_i32, %c0_i32_0 : i32, i32
  }
  func.func @transform_4(%arg0: i32) -> (i32, i32, i32) {
    %c0_i32 = arith.constant 0 : i32
    %c0_i32_0 = arith.constant 0 : i32
    %c0_i32_1 = arith.constant 0 : i32
    return %arg0, %c0_i32, %c0_i32_0 : i32, i32, i32
  }
}

module attributes {stable_mosaic.version = 11 : i64} {
  func.func @_conv_bn_kernel(%arg0: i32, %arg1: memref<2x8x8x8xbf16, #tpu.memory_space<vmem>>, %arg2: memref<1x8x128xbf16, #tpu.memory_space<vmem>>, %arg3: memref<1x128xf32, #tpu.memory_space<vmem>>, %arg4: memref<1x128xf32, #tpu.memory_space<vmem>>, %arg5: memref<2x64x128xbf16, #tpu.memory_space<vmem>>) attributes {dimension_semantics = [#tpu.dimension_semantics<parallel>], iteration_bounds = array<i64: 2>, scalar_prefetch = 0 : i64, scratch_operands = 0 : i64, tpu.core_type = #tpu.core_type<tc>, window_params = [{transform_indices = @transform_0, window_bounds = array<i64: 2, 8, 8, 8>}, {pipeline_mode = #tpu.pipeline_mode<synchronous>, transform_indices = @transform_1, window_bounds = array<i64: 1, 8, 128>}, {pipeline_mode = #tpu.pipeline_mode<synchronous>, transform_indices = @transform_2, window_bounds = array<i64: 1, 128>}, {pipeline_mode = #tpu.pipeline_mode<synchronous>, transform_indices = @transform_3, window_bounds = array<i64: 1, 128>}, {transform_indices = @transform_4, window_bounds = array<i64: 2, 64, 128>}]} {
    %cst = arith.constant 0.000000e+00 : f32
    %0 = vector.broadcast %cst : f32 to vector<128x128xf32>
    %c0 = arith.constant 0 : index
    %c0_0 = arith.constant 0 : index
    %c0_1 = arith.constant 0 : index
    %c0_2 = arith.constant 0 : index
    %1 = vector.load %arg1[%c0, %c0_0, %c0_1, %c0_2] : memref<2x8x8x8xbf16, #tpu.memory_space<vmem>>, vector<1x8x8x8xbf16>
    %2 = vector.shape_cast %1 : vector<1x8x8x8xbf16> to vector<8x8x8xbf16>
    %3 = vector.shape_cast %2 : vector<8x8x8xbf16> to vector<64x8xbf16>
    %c1 = arith.constant 1 : index
    %c0_3 = arith.constant 0 : index
    %c0_4 = arith.constant 0 : index
    %c0_5 = arith.constant 0 : index
    %4 = vector.load %arg1[%c1, %c0_3, %c0_4, %c0_5] : memref<2x8x8x8xbf16, #tpu.memory_space<vmem>>, vector<1x8x8x8xbf16>
    %5 = vector.shape_cast %4 : vector<1x8x8x8xbf16> to vector<8x8x8xbf16>
    %6 = vector.shape_cast %5 : vector<8x8x8xbf16> to vector<64x8xbf16>
    %7 = tpu.concatenate %3, %6 in 0 : vector<64x8xbf16>, vector<64x8xbf16> -> vector<128x8xbf16>
    %c0_6 = arith.constant 0 : index
    %c0_7 = arith.constant 0 : index
    %c0_8 = arith.constant 0 : index
    %8 = vector.load %arg2[%c0_6, %c0_7, %c0_8] : memref<1x8x128xbf16, #tpu.memory_space<vmem>>, vector<1x8x128xbf16>
    %9 = vector.shape_cast %8 : vector<1x8x128xbf16> to vector<8x128xbf16>
    %cst_9 = arith.constant dense<0.000000e+00> : vector<128x128xf32>
    %10 = tpu.matmul %7, %9, %cst_9 {dimension_numbers = #tpu.dot_dimension_numbers<[1], [0], [0], [1], [0, 0, 1, 1], [], []>} : vector<128x8xbf16>, vector<8x128xbf16>, vector<128x128xf32> -> vector<128x128xf32>
    %11 = arith.addf %0, %10 : vector<128x128xf32>
    %c0_10 = arith.constant 0 : index
    %c0_11 = arith.constant 0 : index
    %12 = vector.load %arg3[%c0_10, %c0_11] : memref<1x128xf32, #tpu.memory_space<vmem>>, vector<1x128xf32>
    %13 = vector.broadcast %12 : vector<1x128xf32> to vector<128x128xf32>
    %14 = arith.mulf %11, %13 : vector<128x128xf32>
    %c0_12 = arith.constant 0 : index
    %c0_13 = arith.constant 0 : index
    %15 = vector.load %arg4[%c0_12, %c0_13] : memref<1x128xf32, #tpu.memory_space<vmem>>, vector<1x128xf32>
    %16 = vector.broadcast %15 : vector<1x128xf32> to vector<128x128xf32>
    %17 = arith.addf %14, %16 : vector<128x128xf32>
    %18 = vector.shape_cast %17 : vector<128x128xf32> to vector<2x64x128xf32>
    %19 = arith.truncf %18 : vector<2x64x128xf32> to vector<2x64x128xbf16>
    %c0_14 = arith.constant 0 : index
    %c0_15 = arith.constant 0 : index
    %c0_16 = arith.constant 0 : index
    %20 = vector.load %arg5[%c0_14, %c0_15, %c0_16] : memref<2x64x128xbf16, #tpu.memory_space<vmem>>, vector<2x64x128xbf16>
    tpu.vector_store %arg5[%c0_14, %c0_15, %c0_16], %19 {strides = array<i32>} : memref<2x64x128xbf16, #tpu.memory_space<vmem>>, vector<2x64x128xbf16>,
    return
  }
  func.func @transform_0(%arg0: i32) -> (i32, i32, i32, i32) {
    %c0_i32 = arith.constant 0 : i32
    %c0_i32_0 = arith.constant 0 : i32
    %c0_i32_1 = arith.constant 0 : i32
    %c0_i32_2 = arith.constant 0 : i32
    return %arg0, %c0_i32, %c0_i32_0, %c0_i32_1 : i32, i32, i32, i32
  }
  func.func @transform_1(%arg0: i32) -> (i32, i32, i32) {
    %c0_i32 = arith.constant 0 : i32
    %c0_i32_0 = arith.constant 0 : i32
    %c0_i32_1 = arith.constant 0 : i32
    %c0_i32_2 = arith.constant 0 : i32
    return %c0_i32, %c0_i32_0, %c0_i32_1 : i32, i32, i32
  }
  func.func @transform_2(%arg0: i32) -> (i32, i32) {
    %c0_i32 = arith.constant 0 : i32
    %c0_i32_0 = arith.constant 0 : i32
    %c0_i32_1 = arith.constant 0 : i32
    return %c0_i32, %c0_i32_0 : i32, i32
  }
  func.func @transform_3(%arg0: i32) -> (i32, i32) {
    %c0_i32 = arith.constant 0 : i32
    %c0_i32_0 = arith.constant 0 : i32
    %c0_i32_1 = arith.constant 0 : i32
    return %c0_i32, %c0_i32_0 : i32, i32
  }
  func.func @transform_4(%arg0: i32) -> (i32, i32, i32) {
    %c0_i32 = arith.constant 0 : i32
    %c0_i32_0 = arith.constant 0 : i32
    %c0_i32_1 = arith.constant 0 : i32
    return %arg0, %c0_i32, %c0_i32_0 : i32, i32, i32
  }
}

module attributes {stable_mosaic.version = 11 : i64} {
  func.func @_conv_bn_kernel(%arg0: i32, %arg1: memref<2x10x10x128xbf16, #tpu.memory_space<vmem>>, %arg2: memref<9x128x128xbf16, #tpu.memory_space<vmem>>, %arg3: memref<1x128xf32, #tpu.memory_space<vmem>>, %arg4: memref<1x128xf32, #tpu.memory_space<vmem>>, %arg5: memref<2x64x128xbf16, #tpu.memory_space<vmem>>, %arg6: memref<2x64x128xbf16, #tpu.memory_space<vmem>>) attributes {dimension_semantics = [#tpu.dimension_semantics<parallel>], iteration_bounds = array<i64: 2>, scalar_prefetch = 0 : i64, scratch_operands = 0 : i64, tpu.core_type = #tpu.core_type<tc>, window_params = [{transform_indices = @transform_0, window_bounds = array<i64: 2, 10, 10, 128>}, {pipeline_mode = #tpu.pipeline_mode<synchronous>, transform_indices = @transform_1, window_bounds = array<i64: 9, 128, 128>}, {pipeline_mode = #tpu.pipeline_mode<synchronous>, transform_indices = @transform_2, window_bounds = array<i64: 1, 128>}, {pipeline_mode = #tpu.pipeline_mode<synchronous>, transform_indices = @transform_3, window_bounds = array<i64: 1, 128>}, {transform_indices = @transform_4, window_bounds = array<i64: 2, 64, 128>}, {transform_indices = @transform_5, window_bounds = array<i64: 2, 64, 128>}]} {
    %cst = arith.constant 0.000000e+00 : f32
    %0 = vector.broadcast %cst : f32 to vector<128x128xf32>
    %c0 = arith.constant 0 : index
    %c0_0 = arith.constant 0 : index
    %c0_1 = arith.constant 0 : index
    %c0_2 = arith.constant 0 : index
    %1 = vector.load %arg1[%c0, %c0_0, %c0_1, %c0_2] : memref<2x10x10x128xbf16, #tpu.memory_space<vmem>>, vector<1x8x8x128xbf16>
    %2 = vector.shape_cast %1 : vector<1x8x8x128xbf16> to vector<8x8x128xbf16>
    %3 = vector.shape_cast %2 : vector<8x8x128xbf16> to vector<64x128xbf16>
    %c1 = arith.constant 1 : index
    %c0_3 = arith.constant 0 : index
    %c0_4 = arith.constant 0 : index
    %c0_5 = arith.constant 0 : index
    %4 = vector.load %arg1[%c1, %c0_3, %c0_4, %c0_5] : memref<2x10x10x128xbf16, #tpu.memory_space<vmem>>, vector<1x8x8x128xbf16>
    %5 = vector.shape_cast %4 : vector<1x8x8x128xbf16> to vector<8x8x128xbf16>
    %6 = vector.shape_cast %5 : vector<8x8x128xbf16> to vector<64x128xbf16>
    %7 = tpu.concatenate %3, %6 in 0 : vector<64x128xbf16>, vector<64x128xbf16> -> vector<128x128xbf16>
    %c0_6 = arith.constant 0 : index
    %c0_7 = arith.constant 0 : index
    %c0_8 = arith.constant 0 : index
    %8 = vector.load %arg2[%c0_6, %c0_7, %c0_8] : memref<9x128x128xbf16, #tpu.memory_space<vmem>>, vector<1x128x128xbf16>
    %9 = vector.shape_cast %8 : vector<1x128x128xbf16> to vector<128x128xbf16>
    %cst_9 = arith.constant dense<0.000000e+00> : vector<128x128xf32>
    %10 = tpu.matmul %7, %9, %cst_9 {dimension_numbers = #tpu.dot_dimension_numbers<[1], [0], [0], [1], [0, 0, 1, 1], [], []>} : vector<128x128xbf16>, vector<128x128xbf16>, vector<128x128xf32> -> vector<128x128xf32>
    %11 = arith.addf %0, %10 : vector<128x128xf32>
    %c0_10 = arith.constant 0 : index
    %c0_11 = arith.constant 0 : index
    %c1_12 = arith.constant 1 : index
    %c0_13 = arith.constant 0 : index
    %12 = vector.load %arg1[%c0_10, %c0_11, %c1_12, %c0_13] : memref<2x10x10x128xbf16, #tpu.memory_space<vmem>>, vector<1x8x8x128xbf16>
    %13 = vector.shape_cast %12 : vector<1x8x8x128xbf16> to vector<8x8x128xbf16>
    %14 = vector.shape_cast %13 : vector<8x8x128xbf16> to vector<64x128xbf16>
    %c1_14 = arith.constant 1 : index
    %c0_15 = arith.constant 0 : index
    %c1_16 = arith.constant 1 : index
    %c0_17 = arith.constant 0 : index
    %15 = vector.load %arg1[%c1_14, %c0_15, %c1_16, %c0_17] : memref<2x10x10x128xbf16, #tpu.memory_space<vmem>>, vector<1x8x8x128xbf16>
    %16 = vector.shape_cast %15 : vector<1x8x8x128xbf16> to vector<8x8x128xbf16>
    %17 = vector.shape_cast %16 : vector<8x8x128xbf16> to vector<64x128xbf16>
    %18 = tpu.concatenate %14, %17 in 0 : vector<64x128xbf16>, vector<64x128xbf16> -> vector<128x128xbf16>
    %c1_18 = arith.constant 1 : index
    %c0_19 = arith.constant 0 : index
    %c0_20 = arith.constant 0 : index
    %19 = vector.load %arg2[%c1_18, %c0_19, %c0_20] : memref<9x128x128xbf16, #tpu.memory_space<vmem>>, vector<1x128x128xbf16>
    %20 = vector.shape_cast %19 : vector<1x128x128xbf16> to vector<128x128xbf16>
    %cst_21 = arith.constant dense<0.000000e+00> : vector<128x128xf32>
    %21 = tpu.matmul %18, %20, %cst_21 {dimension_numbers = #tpu.dot_dimension_numbers<[1], [0], [0], [1], [0, 0, 1, 1], [], []>} : vector<128x128xbf16>, vector<128x128xbf16>, vector<128x128xf32> -> vector<128x128xf32>
    %22 = arith.addf %11, %21 : vector<128x128xf32>
    %c0_22 = arith.constant 0 : index
    %c0_23 = arith.constant 0 : index
    %c2 = arith.constant 2 : index
    %c0_24 = arith.constant 0 : index
    %23 = vector.load %arg1[%c0_22, %c0_23, %c2, %c0_24] : memref<2x10x10x128xbf16, #tpu.memory_space<vmem>>, vector<1x8x8x128xbf16>
    %24 = vector.shape_cast %23 : vector<1x8x8x128xbf16> to vector<8x8x128xbf16>
    %25 = vector.shape_cast %24 : vector<8x8x128xbf16> to vector<64x128xbf16>
    %c1_25 = arith.constant 1 : index
    %c0_26 = arith.constant 0 : index
    %c2_27 = arith.constant 2 : index
    %c0_28 = arith.constant 0 : index
    %26 = vector.load %arg1[%c1_25, %c0_26, %c2_27, %c0_28] : memref<2x10x10x128xbf16, #tpu.memory_space<vmem>>, vector<1x8x8x128xbf16>
    %27 = vector.shape_cast %26 : vector<1x8x8x128xbf16> to vector<8x8x128xbf16>
    %28 = vector.shape_cast %27 : vector<8x8x128xbf16> to vector<64x128xbf16>
    %29 = tpu.concatenate %25, %28 in 0 : vector<64x128xbf16>, vector<64x128xbf16> -> vector<128x128xbf16>
    %c2_29 = arith.constant 2 : index
    %c0_30 = arith.constant 0 : index
    %c0_31 = arith.constant 0 : index
    %30 = vector.load %arg2[%c2_29, %c0_30, %c0_31] : memref<9x128x128xbf16, #tpu.memory_space<vmem>>, vector<1x128x128xbf16>
    %31 = vector.shape_cast %30 : vector<1x128x128xbf16> to vector<128x128xbf16>
    %cst_32 = arith.constant dense<0.000000e+00> : vector<128x128xf32>
    %32 = tpu.matmul %29, %31, %cst_32 {dimension_numbers = #tpu.dot_dimension_numbers<[1], [0], [0], [1], [0, 0, 1, 1], [], []>} : vector<128x128xbf16>, vector<128x128xbf16>, vector<128x128xf32> -> vector<128x128xf32>
    %33 = arith.addf %22, %32 : vector<128x128xf32>
    %c0_33 = arith.constant 0 : index
    %c1_34 = arith.constant 1 : index
    %c0_35 = arith.constant 0 : index
    %c0_36 = arith.constant 0 : index
    %34 = vector.load %arg1[%c0_33, %c1_34, %c0_35, %c0_36] : memref<2x10x10x128xbf16, #tpu.memory_space<vmem>>, vector<1x8x8x128xbf16>
    %35 = vector.shape_cast %34 : vector<1x8x8x128xbf16> to vector<8x8x128xbf16>
    %36 = vector.shape_cast %35 : vector<8x8x128xbf16> to vector<64x128xbf16>
    %c1_37 = arith.constant 1 : index
    %c1_38 = arith.constant 1 : index
    %c0_39 = arith.constant 0 : index
    %c0_40 = arith.constant 0 : index
    %37 = vector.load %arg1[%c1_37, %c1_38, %c0_39, %c0_40] : memref<2x10x10x128xbf16, #tpu.memory_space<vmem>>, vector<1x8x8x128xbf16>
    %38 = vector.shape_cast %37 : vector<1x8x8x128xbf16> to vector<8x8x128xbf16>
    %39 = vector.shape_cast %38 : vector<8x8x128xbf16> to vector<64x128xbf16>
    %40 = tpu.concatenate %36, %39 in 0 : vector<64x128xbf16>, vector<64x128xbf16> -> vector<128x128xbf16>
    %c3 = arith.constant 3 : index
    %c0_41 = arith.constant 0 : index
    %c0_42 = arith.constant 0 : index
    %41 = vector.load %arg2[%c3, %c0_41, %c0_42] : memref<9x128x128xbf16, #tpu.memory_space<vmem>>, vector<1x128x128xbf16>
    %42 = vector.shape_cast %41 : vector<1x128x128xbf16> to vector<128x128xbf16>
    %cst_43 = arith.constant dense<0.000000e+00> : vector<128x128xf32>
    %43 = tpu.matmul %40, %42, %cst_43 {dimension_numbers = #tpu.dot_dimension_numbers<[1], [0], [0], [1], [0, 0, 1, 1], [], []>} : vector<128x128xbf16>, vector<128x128xbf16>, vector<128x128xf32> -> vector<128x128xf32>
    %44 = arith.addf %33, %43 : vector<128x128xf32>
    %c0_44 = arith.constant 0 : index
    %c1_45 = arith.constant 1 : index
    %c1_46 = arith.constant 1 : index
    %c0_47 = arith.constant 0 : index
    %45 = vector.load %arg1[%c0_44, %c1_45, %c1_46, %c0_47] : memref<2x10x10x128xbf16, #tpu.memory_space<vmem>>, vector<1x8x8x128xbf16>
    %46 = vector.shape_cast %45 : vector<1x8x8x128xbf16> to vector<8x8x128xbf16>
    %47 = vector.shape_cast %46 : vector<8x8x128xbf16> to vector<64x128xbf16>
    %c1_48 = arith.constant 1 : index
    %c1_49 = arith.constant 1 : index
    %c1_50 = arith.constant 1 : index
    %c0_51 = arith.constant 0 : index
    %48 = vector.load %arg1[%c1_48, %c1_49, %c1_50, %c0_51] : memref<2x10x10x128xbf16, #tpu.memory_space<vmem>>, vector<1x8x8x128xbf16>
    %49 = vector.shape_cast %48 : vector<1x8x8x128xbf16> to vector<8x8x128xbf16>
    %50 = vector.shape_cast %49 : vector<8x8x128xbf16> to vector<64x128xbf16>
    %51 = tpu.concatenate %47, %50 in 0 : vector<64x128xbf16>, vector<64x128xbf16> -> vector<128x128xbf16>
    %c4 = arith.constant 4 : index
    %c0_52 = arith.constant 0 : index
    %c0_53 = arith.constant 0 : index
    %52 = vector.load %arg2[%c4, %c0_52, %c0_53] : memref<9x128x128xbf16, #tpu.memory_space<vmem>>, vector<1x128x128xbf16>
    %53 = vector.shape_cast %52 : vector<1x128x128xbf16> to vector<128x128xbf16>
    %cst_54 = arith.constant dense<0.000000e+00> : vector<128x128xf32>
    %54 = tpu.matmul %51, %53, %cst_54 {dimension_numbers = #tpu.dot_dimension_numbers<[1], [0], [0], [1], [0, 0, 1, 1], [], []>} : vector<128x128xbf16>, vector<128x128xbf16>, vector<128x128xf32> -> vector<128x128xf32>
    %55 = arith.addf %44, %54 : vector<128x128xf32>
    %c0_55 = arith.constant 0 : index
    %c1_56 = arith.constant 1 : index
    %c2_57 = arith.constant 2 : index
    %c0_58 = arith.constant 0 : index
    %56 = vector.load %arg1[%c0_55, %c1_56, %c2_57, %c0_58] : memref<2x10x10x128xbf16, #tpu.memory_space<vmem>>, vector<1x8x8x128xbf16>
    %57 = vector.shape_cast %56 : vector<1x8x8x128xbf16> to vector<8x8x128xbf16>
    %58 = vector.shape_cast %57 : vector<8x8x128xbf16> to vector<64x128xbf16>
    %c1_59 = arith.constant 1 : index
    %c1_60 = arith.constant 1 : index
    %c2_61 = arith.constant 2 : index
    %c0_62 = arith.constant 0 : index
    %59 = vector.load %arg1[%c1_59, %c1_60, %c2_61, %c0_62] : memref<2x10x10x128xbf16, #tpu.memory_space<vmem>>, vector<1x8x8x128xbf16>
    %60 = vector.shape_cast %59 : vector<1x8x8x128xbf16> to vector<8x8x128xbf16>
    %61 = vector.shape_cast %60 : vector<8x8x128xbf16> to vector<64x128xbf16>
    %62 = tpu.concatenate %58, %61 in 0 : vector<64x128xbf16>, vector<64x128xbf16> -> vector<128x128xbf16>
    %c5 = arith.constant 5 : index
    %c0_63 = arith.constant 0 : index
    %c0_64 = arith.constant 0 : index
    %63 = vector.load %arg2[%c5, %c0_63, %c0_64] : memref<9x128x128xbf16, #tpu.memory_space<vmem>>, vector<1x128x128xbf16>
    %64 = vector.shape_cast %63 : vector<1x128x128xbf16> to vector<128x128xbf16>
    %cst_65 = arith.constant dense<0.000000e+00> : vector<128x128xf32>
    %65 = tpu.matmul %62, %64, %cst_65 {dimension_numbers = #tpu.dot_dimension_numbers<[1], [0], [0], [1], [0, 0, 1, 1], [], []>} : vector<128x128xbf16>, vector<128x128xbf16>, vector<128x128xf32> -> vector<128x128xf32>
    %66 = arith.addf %55, %65 : vector<128x128xf32>
    %c0_66 = arith.constant 0 : index
    %c2_67 = arith.constant 2 : index
    %c0_68 = arith.constant 0 : index
    %c0_69 = arith.constant 0 : index
    %67 = vector.load %arg1[%c0_66, %c2_67, %c0_68, %c0_69] : memref<2x10x10x128xbf16, #tpu.memory_space<vmem>>, vector<1x8x8x128xbf16>
    %68 = vector.shape_cast %67 : vector<1x8x8x128xbf16> to vector<8x8x128xbf16>
    %69 = vector.shape_cast %68 : vector<8x8x128xbf16> to vector<64x128xbf16>
    %c1_70 = arith.constant 1 : index
    %c2_71 = arith.constant 2 : index
    %c0_72 = arith.constant 0 : index
    %c0_73 = arith.constant 0 : index
    %70 = vector.load %arg1[%c1_70, %c2_71, %c0_72, %c0_73] : memref<2x10x10x128xbf16, #tpu.memory_space<vmem>>, vector<1x8x8x128xbf16>
    %71 = vector.shape_cast %70 : vector<1x8x8x128xbf16> to vector<8x8x128xbf16>
    %72 = vector.shape_cast %71 : vector<8x8x128xbf16> to vector<64x128xbf16>
    %73 = tpu.concatenate %69, %72 in 0 : vector<64x128xbf16>, vector<64x128xbf16> -> vector<128x128xbf16>
    %c6 = arith.constant 6 : index
    %c0_74 = arith.constant 0 : index
    %c0_75 = arith.constant 0 : index
    %74 = vector.load %arg2[%c6, %c0_74, %c0_75] : memref<9x128x128xbf16, #tpu.memory_space<vmem>>, vector<1x128x128xbf16>
    %75 = vector.shape_cast %74 : vector<1x128x128xbf16> to vector<128x128xbf16>
    %cst_76 = arith.constant dense<0.000000e+00> : vector<128x128xf32>
    %76 = tpu.matmul %73, %75, %cst_76 {dimension_numbers = #tpu.dot_dimension_numbers<[1], [0], [0], [1], [0, 0, 1, 1], [], []>} : vector<128x128xbf16>, vector<128x128xbf16>, vector<128x128xf32> -> vector<128x128xf32>
    %77 = arith.addf %66, %76 : vector<128x128xf32>
    %c0_77 = arith.constant 0 : index
    %c2_78 = arith.constant 2 : index
    %c1_79 = arith.constant 1 : index
    %c0_80 = arith.constant 0 : index
    %78 = vector.load %arg1[%c0_77, %c2_78, %c1_79, %c0_80] : memref<2x10x10x128xbf16, #tpu.memory_space<vmem>>, vector<1x8x8x128xbf16>
    %79 = vector.shape_cast %78 : vector<1x8x8x128xbf16> to vector<8x8x128xbf16>
    %80 = vector.shape_cast %79 : vector<8x8x128xbf16> to vector<64x128xbf16>
    %c1_81 = arith.constant 1 : index
    %c2_82 = arith.constant 2 : index
    %c1_83 = arith.constant 1 : index
    %c0_84 = arith.constant 0 : index
    %81 = vector.load %arg1[%c1_81, %c2_82, %c1_83, %c0_84] : memref<2x10x10x128xbf16, #tpu.memory_space<vmem>>, vector<1x8x8x128xbf16>
    %82 = vector.shape_cast %81 : vector<1x8x8x128xbf16> to vector<8x8x128xbf16>
    %83 = vector.shape_cast %82 : vector<8x8x128xbf16> to vector<64x128xbf16>
    %84 = tpu.concatenate %80, %83 in 0 : vector<64x128xbf16>, vector<64x128xbf16> -> vector<128x128xbf16>
    %c7 = arith.constant 7 : index
    %c0_85 = arith.constant 0 : index
    %c0_86 = arith.constant 0 : index
    %85 = vector.load %arg2[%c7, %c0_85, %c0_86] : memref<9x128x128xbf16, #tpu.memory_space<vmem>>, vector<1x128x128xbf16>
    %86 = vector.shape_cast %85 : vector<1x128x128xbf16> to vector<128x128xbf16>
    %cst_87 = arith.constant dense<0.000000e+00> : vector<128x128xf32>
    %87 = tpu.matmul %84, %86, %cst_87 {dimension_numbers = #tpu.dot_dimension_numbers<[1], [0], [0], [1], [0, 0, 1, 1], [], []>} : vector<128x128xbf16>, vector<128x128xbf16>, vector<128x128xf32> -> vector<128x128xf32>
    %88 = arith.addf %77, %87 : vector<128x128xf32>
    %c0_88 = arith.constant 0 : index
    %c2_89 = arith.constant 2 : index
    %c2_90 = arith.constant 2 : index
    %c0_91 = arith.constant 0 : index
    %89 = vector.load %arg1[%c0_88, %c2_89, %c2_90, %c0_91] : memref<2x10x10x128xbf16, #tpu.memory_space<vmem>>, vector<1x8x8x128xbf16>
    %90 = vector.shape_cast %89 : vector<1x8x8x128xbf16> to vector<8x8x128xbf16>
    %91 = vector.shape_cast %90 : vector<8x8x128xbf16> to vector<64x128xbf16>
    %c1_92 = arith.constant 1 : index
    %c2_93 = arith.constant 2 : index
    %c2_94 = arith.constant 2 : index
    %c0_95 = arith.constant 0 : index
    %92 = vector.load %arg1[%c1_92, %c2_93, %c2_94, %c0_95] : memref<2x10x10x128xbf16, #tpu.memory_space<vmem>>, vector<1x8x8x128xbf16>
    %93 = vector.shape_cast %92 : vector<1x8x8x128xbf16> to vector<8x8x128xbf16>
    %94 = vector.shape_cast %93 : vector<8x8x128xbf16> to vector<64x128xbf16>
    %95 = tpu.concatenate %91, %94 in 0 : vector<64x128xbf16>, vector<64x128xbf16> -> vector<128x128xbf16>
    %c8 = arith.constant 8 : index
    %c0_96 = arith.constant 0 : index
    %c0_97 = arith.constant 0 : index
    %96 = vector.load %arg2[%c8, %c0_96, %c0_97] : memref<9x128x128xbf16, #tpu.memory_space<vmem>>, vector<1x128x128xbf16>
    %97 = vector.shape_cast %96 : vector<1x128x128xbf16> to vector<128x128xbf16>
    %cst_98 = arith.constant dense<0.000000e+00> : vector<128x128xf32>
    %98 = tpu.matmul %95, %97, %cst_98 {dimension_numbers = #tpu.dot_dimension_numbers<[1], [0], [0], [1], [0, 0, 1, 1], [], []>} : vector<128x128xbf16>, vector<128x128xbf16>, vector<128x128xf32> -> vector<128x128xf32>
    %99 = arith.addf %88, %98 : vector<128x128xf32>
    %c0_99 = arith.constant 0 : index
    %c0_100 = arith.constant 0 : index
    %100 = vector.load %arg3[%c0_99, %c0_100] : memref<1x128xf32, #tpu.memory_space<vmem>>, vector<1x128xf32>
    %101 = vector.broadcast %100 : vector<1x128xf32> to vector<128x128xf32>
    %102 = arith.mulf %99, %101 : vector<128x128xf32>
    %c0_101 = arith.constant 0 : index
    %c0_102 = arith.constant 0 : index
    %103 = vector.load %arg4[%c0_101, %c0_102] : memref<1x128xf32, #tpu.memory_space<vmem>>, vector<1x128xf32>
    %104 = vector.broadcast %103 : vector<1x128xf32> to vector<128x128xf32>
    %105 = arith.addf %102, %104 : vector<128x128xf32>
    %106 = vector.shape_cast %105 : vector<128x128xf32> to vector<2x64x128xf32>
    %c0_103 = arith.constant 0 : index
    %c0_104 = arith.constant 0 : index
    %c0_105 = arith.constant 0 : index
    %107 = vector.load %arg5[%c0_103, %c0_104, %c0_105] : memref<2x64x128xbf16, #tpu.memory_space<vmem>>, vector<2x64x128xbf16>
    %108 = arith.extf %107 : vector<2x64x128xbf16> to vector<2x64x128xf32>
    %109 = arith.addf %106, %108 : vector<2x64x128xf32>
    %cst_106 = arith.constant 0.000000e+00 : f32
    %110 = vector.broadcast %cst_106 : f32 to vector<2x64x128xf32>
    %111 = arith.maximumf %109, %110 : vector<2x64x128xf32>
    %112 = arith.truncf %111 : vector<2x64x128xf32> to vector<2x64x128xbf16>
    %c0_107 = arith.constant 0 : index
    %c0_108 = arith.constant 0 : index
    %c0_109 = arith.constant 0 : index
    %113 = vector.load %arg6[%c0_107, %c0_108, %c0_109] : memref<2x64x128xbf16, #tpu.memory_space<vmem>>, vector<2x64x128xbf16>
    tpu.vector_store %arg6[%c0_107, %c0_108, %c0_109], %112 {strides = array<i32>} : memref<2x64x128xbf16, #tpu.memory_space<vmem>>, vector<2x64x128xbf16>,
    return
  }
  func.func @transform_0(%arg0: i32) -> (i32, i32, i32, i32) {
    %c0_i32 = arith.constant 0 : i32
    %c0_i32_0 = arith.constant 0 : i32
    %c0_i32_1 = arith.constant 0 : i32
    %c0_i32_2 = arith.constant 0 : i32
    return %arg0, %c0_i32, %c0_i32_0, %c0_i32_1 : i32, i32, i32, i32
  }
  func.func @transform_1(%arg0: i32) -> (i32, i32, i32) {
    %c0_i32 = arith.constant 0 : i32
    %c0_i32_0 = arith.constant 0 : i32
    %c0_i32_1 = arith.constant 0 : i32
    %c0_i32_2 = arith.constant 0 : i32
    return %c0_i32, %c0_i32_0, %c0_i32_1 : i32, i32, i32
  }
  func.func @transform_2(%arg0: i32) -> (i32, i32) {
    %c0_i32 = arith.constant 0 : i32
    %c0_i32_0 = arith.constant 0 : i32
    %c0_i32_1 = arith.constant 0 : i32
    return %c0_i32, %c0_i32_0 : i32, i32
  }
  func.func @transform_3(%arg0: i32) -> (i32, i32) {
    %c0_i32 = arith.constant 0 : i32
    %c0_i32_0 = arith.constant 0 : i32
    %c0_i32_1 = arith.constant 0 : i32
    return %c0_i32, %c0_i32_0 : i32, i32
  }
  func.func @transform_4(%arg0: i32) -> (i32, i32, i32) {
    %c0_i32 = arith.constant 0 : i32
    %c0_i32_0 = arith.constant 0 : i32
    %c0_i32_1 = arith.constant 0 : i32
    return %arg0, %c0_i32, %c0_i32_0 : i32, i32, i32
  }
  func.func @transform_5(%arg0: i32) -> (i32, i32, i32) {
    %c0_i32 = arith.constant 0 : i32
    %c0_i32_0 = arith.constant 0 : i32
    %c0_i32_1 = arith.constant 0 : i32
    return %arg0, %c0_i32, %c0_i32_0 : i32, i32, i32
  }
}

</mosaic_0001>

<bundles_post_ra>
// kernel: basic_block_forward.4
= control target key start
LH: loop header
LB: loop body
LE: loop exit
PB: predicated region body
PF: predicated region fallthrough
CT: control target
= control target key end

     0   :  { %9 = vsyncpa [#allocation3], 0  ;;  %s1441_s0 = inlined_call_operand.hbm [shape: bf16[4,8,8,8], index: 0, kind: input, shape index: {}]   ;;  %s1442_s1 = inlined_call_operand.hbm [shape: bf16[1,8,128], index: 1, kind: input, shape index: {}]   ;;  %s1443_s2 = inlined_call_operand.hbm [shape: f32[1,128], index: 2, kind: input, shape index: {}]   ;;  %s1444_s3 = inlined_call_operand.hbm [shape: f32[1,128], index: 3, kind: input, shape index: {}]   ;;  %s1445_s4 = inlined_call_operand.hbm [shape: bf16[4,64,128], index: 4, kind: output, shape index: {}]  }
   0x1   :  { %11 = vsyncpa [#allocation3 + $0x1], 0 }
   0x2   :  { %12 = vsyncpa [#allocation6], 0 }
   0x3   :  { %13 = vsyncpa [#allocation9], 0 }
   0x4   :  { %14 = vsyncpa [#allocation4], 0 }
   0x5   :  { %16 = vsyncpa [#allocation4 + $0x1], 0  ;;  %s1160_s15 = smov 0   ;;  %s1162_s16 = smov 0  }
   0x6   :  { %s1164_s17 = smov 0   ;;  %s1166_s18 = smov 0  }
   0x7 LB: > { %s1181_s19 = sadd.s32 4294967295, %s1124_s18   ;;  %s685_s20 = sadd.s32 4294967294, %s1124_s18   ;;  %s1124_s18 = sphi %s1166_s18, %s1468_s18   ;;  %s1120_s17 = sphi %s1164_s17, %s1467_s17   ;;  %s1116_s16 = sphi %s1162_s16, %s1466_s16   ;;  %s1112_s15 = sphi %s1160_s15, %s1465_s15  }
   0x8   : > { %p42_p0 = scmp.ne.s32.totalorder %s1116_s16, %s1112_s15  ;;  %p1446_p1 = scmp.eq.s32.totalorder %s1181_s19, 0 }
   0x9   : > { %p135_p3 = scmp.eq.s32.totalorder %s685_s20, 1  ;;  %p686_p5 = scmp.ge.s32.totalorder %s1124_s18, 1 }
   0xa   : > { %p1190_p4 = por %p1446_p1, %p42_p0  ;;  %p142_p7 = scmp.lt.s32.totalorder %s1124_s18, 3 }
   0xb   : > { %p1195_p6 = por %p135_p3, %p42_p0  ;;  %s1126_s24 = smov [#allocation5]  }
   0xc   : > { %s1449_s21 = scalar_select %p1190_p4, 1, 0 }
   0xd   : > { %s1450_s22 = scalar_select %p1195_p6, 1, 0 }
   0xe   : > { %p1200_p8 = pnand %p686_p5, %p142_p7  ;;  %s155_s25 = sshll.u32 %s1126_s24, 4  ;;  %s156_s25 = int_to_ptr.vmem [resolvable:$true] %s155_s25 }
   0xf   : > { %s1127_s26 = smov [#allocation7]   ;;  %s1128_s29 = smov [#allocation8]  }
  0x10   : > { %s1451_s23 = scalar_select %p1200_p8, 1, 0 }
  0x11   : > { %p863_p10 = pneg %p1200_p8  ;;  %s166_s27 = sshll.u32 %s1127_s26, 4  ;;  %s1213_s27 = int_to_ptr.vmem [resolvable:$true] %s166_s27 }
  0x12   : > { %s177_s30 = sshll.u32 %s1128_s29, 4  ;;  %s936_s7 = scalar_lea.hbm %s1442_s1, 64  ;;  %s1215_s30 = int_to_ptr.vmem [resolvable:$true] %s177_s30 }
  0x13   : > { %p1209_p11 = pnand %p863_p10, %p1446_p1  ;;  %p937_p12 = scmp.ne.s32.totalorder %s1442_s1, %s936_s7 }
  0x14   : > { %p943_p5 = scmp.lt.u32.totalorder %s936_s7, %s1442_s1 }
  0x15   : > { %p1225_p13 = pneg %p1209_p11 }
  0x17   : > { %p939_p0 = pnand %p1225_p13, %p937_p12 }
  0x19   : > { %p940_p3 = pneg %p939_p0 }
  0x1b   : > { %p945_p7 = pnand %p943_p5, %p940_p3 }
  0x1d   : > { %948 = shalt.err (!%p945_p7)
}
  0x1e   : > { %s949_s13 = scalar_lea.vmem %s156_s25, 64  ;;  %p957_p2 = scmp.lt.s32.totalorder %s156_s25, %s156_s25 }
  0x1f   : > { %p950_p10 = scmp.ne.s32.totalorder %s156_s25, %s949_s13  ;;  %p958_p6 = scmp.lt.s32.totalorder %s949_s13, %s949_s13 }
  0x21   : > { %p952_p9 = pnand %p950_p10, %p1225_p13  ;;  %p959_p4 = por %p958_p6, %p957_p2 }
  0x23   : > { %p953_p1 = pneg %p952_p9 }
  0x25   : > { %p960_p8 = pnand %p959_p4, %p953_p1 }
  0x27   : > { %963 = shalt.err (!%p960_p8)
}
  0x28   : > { %866 = dma.hbm_to_vmem [thread:$0]  (!%p1209_p11), %s1442_s1, 64, %s156_s25, [#allocation6]  }
  0x29   : > { %s964_s29 = scalar_lea.hbm %s1443_s2, 16 }
  0x2a   : > { %p965_p9 = scmp.ne.s32.totalorder %s1443_s2, %s964_s29  ;;  %p971_p1 = scmp.lt.u32.totalorder %s964_s29, %s1443_s2 }
  0x2c   : > { %p967_p12 = pnand %p965_p9, %p1225_p13 }
  0x2e   : > { %p968_p2 = pneg %p967_p12 }
  0x30   : > { %p973_p4 = pnand %p971_p1, %p968_p2 }
  0x32   : > { %976 = shalt.err (!%p973_p4)
}
  0x33   : > { %s977_s25 = scalar_lea.vmem %s1213_s27, 16  ;;  %s984_s9 = scalar_lea.vmem %s1213_s27, 32 }
  0x34   : > { %p978_p6 = scmp.ne.s32.totalorder %s1213_s27, %s977_s25  ;;  %p985_p3 = scmp.lt.s32.totalorder %s1213_s27, %s1213_s27 }
  0x35   : > { %p986_p5 = scmp.lt.s32.totalorder %s984_s9, %s977_s25 }
  0x36   : > { %p980_p8 = pnand %p978_p6, %p1225_p13 }
  0x37   : > { %p987_p7 = por %p986_p5, %p985_p3 }
  0x38   : > { %p981_p0 = pneg %p980_p8 }
  0x3a   : > { %p988_p10 = pnand %p987_p7, %p981_p0 }
  0x3c   : > { %991 = shalt.err (!%p988_p10)
}
  0x3d   : > { %869 = dma.hbm_to_vmem [thread:$0]  (!%p1209_p11), %s1443_s2, 16, %s1213_s27, [#allocation6]  }
  0x3e   : > { %s992_s20 = scalar_lea.hbm %s1444_s3, 16 }
  0x3f   : > { %p993_p9 = scmp.ne.s32.totalorder %s1444_s3, %s992_s20  ;;  %p999_p1 = scmp.lt.u32.totalorder %s992_s20, %s1444_s3 }
  0x41   : > { %p995_p12 = pnand %p993_p9, %p1225_p13 }
  0x43   : > { %p996_p2 = pneg %p995_p12 }
  0x45   : > { %p1001_p4 = pnand %p999_p1, %p996_p2 }
  0x47   : > { %1004 = shalt.err (!%p1001_p4)
}
  0x48   : > { %s1005_s27 = scalar_lea.vmem %s1215_s30, 16  ;;  %s1012_s6 = scalar_lea.vmem %s1215_s30, 32 }
  0x49   : > { %p1006_p6 = scmp.ne.s32.totalorder %s1215_s30, %s1005_s27  ;;  %p1013_p3 = scmp.lt.s32.totalorder %s1215_s30, %s1215_s30 }
  0x4a   : > { %p1014_p5 = scmp.lt.s32.totalorder %s1012_s6, %s1005_s27 }
  0x4b   : > { %p1008_p8 = pnand %p1006_p6, %p1225_p13 }
  0x4c   : > { %p1015_p7 = por %p1014_p5, %p1013_p3 }
  0x4d   : > { %p1009_p0 = pneg %p1008_p8 }
  0x4f   : > { %p1016_p10 = pnand %p1015_p7, %p1009_p0 }
  0x51   : > { %1019 = shalt.err (!%p1016_p10)
}
  0x52   : > { %872 = dma.hbm_to_vmem [thread:$0]  (!%p1209_p11), %s1444_s3, 16, %s1215_s30, [#allocation9]  }
  0x53   : > { %s1290_s10 = sadd.s32 1, %s1124_s18   ;;  %s29_s25 = sadd.s32 1, %s1120_s17 }
  0x54   : > { %s26_s28 = ssub.s32 %s1124_s18, %s1290_s10  ;;  %p36_p9 = scmp.ne.s32.totalorder %s1120_s17, %s1116_s16 }
  0x55   : > { %p27_p13 = scmp.eq.s32.totalorder %s26_s28, 0  ;;  %p37_p12 = scmp.eq.s32.totalorder %s1124_s18, 0 }
  0x56   : > { %p884_p2 = scmp.lt.s32.totalorder %s1124_s18, 2  ;;  %p1454_p4 = scmp.eq.s32.totalorder %s1181_s19, 1 }
  0x57   : > { %s1300_s9 = scalar_select %p27_p13, %s1120_s17, %s29_s25  }
  0x58   : > { %p38_p1 = por %p37_p12, %p36_p9  ;;  %p1304_p6 = por %p1454_p4, %p36_p9 }
  0x59   : > { %s188_s12 = sand.u32 1, %s1120_s17   ;;  %s750_s13 = sshll.u32 %s1124_s18, 10 }
  0x5a   : > { %s691_s30 = sshll.u32 %s188_s12, 6  ;;  %s1313_s24 = scalar_lea.hbm %s1441_s0, %s750_s13 }
  0x5b   : > { %s192_s26 = scalar_lea.vmem [#allocation2], %s691_s30  ;;  %p1315_p11 = pnand %p884_p2, %p38_p1 }
  0x5c   : > { %s200_s29 = sshll.u32 %s192_s26, 4  ;;  %s1321_s27 = scalar_lea.sflag [#allocation3], %s188_s12  ;;  %s1319_s29 = int_to_ptr.vmem [resolvable:$true] %s200_s29 }
  0x5d   : > { %s1020_s6 = scalar_lea.hbm %s1313_s24, 1024  ;;  %p1022_p0 = pneg %p1315_p11 }
  0x5e   : > { %p1021_p8 = scmp.ne.s32.totalorder %s1313_s24, %s1020_s6  ;;  %s1025_s28 = scalar_lea.hbm %s1441_s0, 2048 }
  0x5f   : > { %p1026_p7 = scmp.lt.u32.totalorder %s1313_s24, %s1441_s0  ;;  %p1027_p10 = scmp.lt.u32.totalorder %s1025_s28, %s1020_s6 }
  0x60   : > { %p1023_p3 = pnand %p1022_p0, %p1021_p8  ;;  %p1029_p9 = scmp.lt.u32.totalorder %s1020_s6, %s1313_s24 }
  0x61   : > { %p1028_p13 = por %p1027_p10, %p1026_p7 }
  0x62   : > { %p1024_p5 = pneg %p1023_p3 }
  0x63   : > { %p1030_p12 = por %p1029_p9, %p1028_p13 }
  0x65   : > { %p1031_p2 = pnand %p1030_p12, %p1024_p5 }
  0x67   : > { %1034 = shalt.err (!%p1031_p2)
}
  0x68   : > { %s1035_s12 = scalar_lea.vmem %s1319_s29, 1024  ;;  %s1129_s30 = smov [#allocation2]  }
  0x69   : > { %p1036_p1 = scmp.ne.s32.totalorder %s1319_s29, %s1035_s12  ;;  %s1040_s14 = sshll.u32 %s1129_s30, 4  ;;  %s1041_s14 = int_to_ptr.vmem [resolvable:$false] %s1040_s14 }
  0x6a   : > { %s1042_s20 = scalar_lea.vmem %s1041_s14, 2048  ;;  %p1043_p3 = scmp.lt.s32.totalorder %s1319_s29, %s1041_s14 }
  0x6b   : > { %p1038_p4 = pnand %p1036_p1, %p1022_p0  ;;  %p1044_p7 = scmp.lt.s32.totalorder %s1042_s20, %s1035_s12 }
  0x6d   : > { %p1039_p8 = pneg %p1038_p4  ;;  %p1045_p10 = por %p1044_p7, %p1043_p3 }
  0x6f   : > { %p1046_p13 = pnand %p1045_p10, %p1039_p8 }
  0x71   : > { %1049 = shalt.err (!%p1046_p13)
}
  0x72   : > { %s1130_s26 = smov 64   ;;  %s1131_s6 = smov 4  }
  0x73   : > { %876 = dma.hbm_to_vmem [thread:$0]  (!%p1315_p11), %s1313_s24, 1024, %s1319_s29, %s1321_s27, %s1130_s26, %s1130_s26, %s1131_s6  }
  0x74   : > { %p1457_p0 = scmp.ne.s32.totalorder %s1451_s23, 0 }
  0x75   : > { %s1352_s7 = sand.u32 (!%p1457_p0), 1, %s1116_s16   ;;  %p1458_p5 = scmp.ne.s32.totalorder (!%p1457_p0), %s1449_s21, 0 }
  0x76   : > { %212 = sbr.rel (%p1457_p0) target bundleno = 382 (0x17e), region = 36  ;;  %s696_s8 = sshll.u32 (!%p1457_p0), %s1352_s7, 6 }
  0x77   : > { %s215_s28 = scalar_lea.sflag (!%p1457_p0), [#allocation3], %s1352_s7  ;;  %s218_s25 = scalar_lea.vmem (!%p1457_p0), [#allocation2], %s696_s8 }
  0x7d   : > { %1095 = dma.done.wait (%p1458_p5), %s215_s28, 1024  }
  0x7e   : > { %1097 = vsyncadd (%p1458_p5), %s215_s28, 4294966272  ;;  %p1459_p11 = scmp.eq.s32.totalorder %s1181_s19, 0 }
  0x80   : > { %1099 = dma.done.wait (%p1459_p11), [#allocation6], 80   ;;  %p1460_p9 = pmov %p1459_p11 }
  0x82   : > { %1101 = vsyncadd (%p1460_p9), [#allocation6], 4294967216  ;;  %p1461_p12 = pmov %p1460_p9 }
  0x83   : > { %p1462_p2 = pmov %p1460_p9 }
  0x84   : > { %1103 = dma.done.wait (%p1461_p12), [#allocation9], 16  }
  0x85   : > { %1105 = vsyncadd (%p1462_p2), [#allocation9], 4294967280  ;;  %vm341_vm0 = vcmask 1043456   ;;  %vm316_vm1 = vcmask 64512   ;;  %v315_v0 = vld [vmem:[#allocation5] sm:$0xf] }
  0x86   : > { %845 = vmatprep.subr.msk.bf16.mxu0 %vm341_vm0, %v315_v0  ;;  %846 = vmatprep.subr.msk.bf16.mxu1 %vm341_vm0, %v315_v0  ;;  %v343_v1 = vsel %vm341_vm0, %v315_v0, 0  ;;  %v928_v2 = vld [vmem:[%s218_s25] sm:$0xff]   ;;  %v930_v4 = vld [vmem:[%s218_s25 + $0x8] sm:$0xff]   ;;  %v932_v6 = vld [vmem:[%s218_s25 + $0x10] sm:$0xff]   ;;  %s1380_s21 = scalar_lea.vmem [#allocation10], %s696_s8  ;;  %s768_s23 = sshll.u32 %s1181_s19, 10 }
  0x87   : > { %826 = vmatpush3.bf16.msra.mxu0 %v343_v1  ;;  %844 = vmatpush3.bf16.msra.mxu1 %v343_v1  ;;  %v929_v3 = vld [vmem:[%s218_s25 + $0x20] sm:$0xff]   ;;  %v931_v5 = vld [vmem:[%s218_s25 + $0x28] sm:$0xff]   ;;  %v933_v7 = vld [vmem:[%s218_s25 + $0x30] sm:$0xff]   ;;  %s583_s24 = sshll.u32 %s1380_s21, 4  ;;  %s1391_s27 = scalar_lea.hbm %s1445_s4, %s768_s23  ;;  %s1393_s24 = int_to_ptr.vmem [resolvable:$true] %s583_s24 }
  0x88   : > { %827 = vmatprep.mubr.msk.bf16.mxu0 %vm316_vm1, %v928_v2  ;;  %835 = vmatprep.mubr.msk.bf16.mxu1 %vm316_vm1, %v929_v3  ;;  %v934_v8 = vld [vmem:[%s218_s25 + $0x18] sm:$0xff]   ;;  %v725_v10 = vld [vmem:[#allocation7] ss:$0 sm:$0xff]  ;;  %v726_v15 = vld [vmem:[#allocation8] ss:$0 sm:$0xff]  ;;  %s569_s19 = scalar_lea.sflag [#allocation4], %s1352_s7 }
  0x89   : > { %v935_v9 = vld [vmem:[%s218_s25 + $0x38] sm:$0xff]   ;;  %s1050_s13 = scalar_lea.vmem %s1393_s24, 1024  ;;  %s1132_s12 = smov [#allocation10]  }
  0x8a   : > { %828 = vmatmul.mubr.msk.bf16.vlgmr.msra.gmra.mrb[0].mxu0 %vm316_vm1, %v930_v4  ;;  %836 = vmatmul.mubr.msk.bf16.vlgmr.msra.gmra.mrb[0].mxu1 %vm316_vm1, %v931_v5  ;;  %p1051_p1 = scmp.ne.s32.totalorder %s1393_s24, %s1050_s13  ;;  %s1054_s30 = sshll.u32 %s1132_s12, 4  ;;  %s1055_s30 = int_to_ptr.vmem [resolvable:$false] %s1054_s30 }
  0x8b   : > { %831 = vmatprep.mubr.msk.bf16.mxu0 %vm316_vm1, %v932_v6  ;;  %839 = vmatprep.mubr.msk.bf16.mxu1 %vm316_vm1, %v933_v7  ;;  %s1056_s14 = scalar_lea.vmem %s1055_s30, 2048  ;;  %p1057_p3 = scmp.lt.s32.totalorder %s1393_s24, %s1055_s30 }
  0x8c   : > { %p1052_p4 = pnand %p1051_p1, %p1304_p6  ;;  %p1058_p7 = scmp.lt.s32.totalorder %s1056_s14, %s1050_s13 }
  0x8e   : > { %p1053_p8 = pneg %p1052_p4  ;;  %p1059_p10 = por %p1058_p7, %p1057_p3 }
  0x90   : > { %p1060_p13 = pnand %p1059_p10, %p1053_p8 }
  0x92   : > { %832 = vmatmul.mubr.msk.bf16.gmra.mrb[4].mxu0 %vm316_vm1, %v934_v8  ;;  %840 = vmatmul.mubr.msk.bf16.gmra.mrb[4].mxu1 %vm316_vm1, %v935_v9 }
 0x15d   : > { %v829_v11 = vpop.f32.mrb[0].mxu0  ;;  %v837_v13 = vpop.f32.mrb[0].mxu1 }
 0x15e   : > { %v451_v12 = vmul.f32 %v829_v11, %v725_v10  ;;  %v379_v14 = vpop.f32.mrb[1].mxu0  ;;  %v459_v16 = vmul.f32 %v837_v13, %v725_v10  ;;  %v411_v18 = vpop.f32.mrb[1].mxu1 }
 0x15f   : > { %v449_v17 = vmul.f32 %v725_v10, %v379_v14  ;;  %v830_v19 = vpop.f32.mrb[2].mxu0  ;;  %v457_v20 = vmul.f32 %v725_v10, %v411_v18  ;;  %v838_v22 = vpop.f32.mrb[2].mxu1 }
 0x160   : > { %v452_v21 = vmul.f32 %v830_v19, %v725_v10  ;;  %v382_v23 = vpop.f32.mrb[3].mxu0  ;;  %v460_v24 = vmul.f32 %v838_v22, %v725_v10  ;;  %v414_v26 = vpop.f32.mrb[3].mxu1  ;;  %v474_v27 = vadd.f32 %v726_v15, %v451_v12  ;;  %v482_v30 = vadd.f32 %v726_v15, %v459_v16 }
 0x161   : > { %v450_v25 = vmul.f32 %v725_v10, %v382_v23  ;;  %v458_v29 = vmul.f32 %v725_v10, %v414_v26  ;;  %v472_v31 = vadd.f32 %v726_v15, %v449_v17  ;;  %v480_v34 = vadd.f32 %v726_v15, %v457_v20 }
 0x162   : > { %v475_v28 = vadd.f32 %v726_v15, %v452_v21  ;;  %v483_v32 = vadd.f32 %v726_v15, %v460_v24 }
 0x163   : > { %v473_v33 = vadd.f32 %v726_v15, %v450_v25  ;;  %v481_v36 = vadd.f32 %v726_v15, %v458_v29 }
 0x164   : > { %v777_v35 = vpack.c.bf16 %v475_v28, %v474_v27  ;;  %v797_v37 = vpack.c.bf16 %v483_v32, %v482_v30 }
 0x165   : > { %v772_v38 = vpack.c.bf16 %v473_v33, %v472_v31  ;;  %v833_v39 = vpop.f32.mrb[4].mxu0  ;;  %v792_v40 = vpack.c.bf16 %v481_v36, %v480_v34  ;;  %v841_v42 = vpop.f32.mrb[4].mxu1 }
 0x166   : > { %809 = vst [vmem:[%s1380_s21 + $0x8] sm:$0xff] %v777_v35   ;;  %v455_v41 = vmul.f32 %v833_v39, %v725_v10  ;;  %v395_v43 = vpop.f32.mrb[5].mxu0  ;;  %813 = vst [vmem:[%s1380_s21 + $0x28] sm:$0xff] %v797_v37   ;;  %v463_v44 = vmul.f32 %v841_v42, %v725_v10  ;;  %v427_v46 = vpop.f32.mrb[5].mxu1 }
 0x167   : > { %773 = vst [vmem:[%s1380_s21] sm:$0xff] %v772_v38   ;;  %v453_v45 = vmul.f32 %v725_v10, %v395_v43  ;;  %v834_v47 = vpop.f32.mrb[6].mxu0  ;;  %812 = vst [vmem:[%s1380_s21 + $0x20] sm:$0xff] %v792_v40   ;;  %v461_v48 = vmul.f32 %v725_v10, %v427_v46  ;;  %v842_v50 = vpop.f32.mrb[6].mxu1 }
 0x168   : > { %v456_v49 = vmul.f32 %v834_v47, %v725_v10  ;;  %v398_v51 = vpop.f32.mrb[7].mxu0  ;;  %v464_v52 = vmul.f32 %v842_v50, %v725_v10  ;;  %v430_v54 = vpop.f32.mrb[7].mxu1  ;;  %v478_v55 = vadd.f32 %v726_v15, %v455_v41  ;;  %v486_v58 = vadd.f32 %v726_v15, %v463_v44 }
 0x169   : > { %v454_v53 = vmul.f32 %v725_v10, %v398_v51  ;;  %v462_v57 = vmul.f32 %v725_v10, %v430_v54  ;;  %v476_v59 = vadd.f32 %v726_v15, %v453_v45  ;;  %v484_v62 = vadd.f32 %v726_v15, %v461_v48 }
 0x16a   : > { %v479_v56 = vadd.f32 %v726_v15, %v456_v49  ;;  %v487_v60 = vadd.f32 %v726_v15, %v464_v52 }
 0x16b   : > { %v477_v61 = vadd.f32 %v726_v15, %v454_v53  ;;  %v485_v0 = vadd.f32 %v726_v15, %v462_v57 }
 0x16c   : > { %v787_v63 = vpack.c.bf16 %v479_v56, %v478_v55  ;;  %v807_v1 = vpack.c.bf16 %v487_v60, %v486_v58 }
 0x16d   : > { %v782_v2 = vpack.c.bf16 %v477_v61, %v476_v59  ;;  %v802_v3 = vpack.c.bf16 %v485_v0, %v484_v62 }
 0x16e   : > { %811 = vst [vmem:[%s1380_s21 + $0x18] sm:$0xff] %v787_v63   ;;  %815 = vst [vmem:[%s1380_s21 + $0x38] sm:$0xff] %v807_v1  }
 0x16f   : > { %810 = vst [vmem:[%s1380_s21 + $0x10] sm:$0xff] %v782_v2   ;;  %814 = vst [vmem:[%s1380_s21 + $0x30] sm:$0xff] %v802_v3  }
 0x170   : > { %1063 = shalt.err (!%p1060_p13)
}
 0x171   : > { %s1064_s20 = scalar_lea.hbm %s1391_s27, 1024  ;;  %s1068_s8 = scalar_lea.hbm %s1445_s4, 2048 }
 0x172   : > { %p1065_p0 = scmp.ne.s32.totalorder %s1391_s27, %s1064_s20  ;;  %p1069_p9 = scmp.lt.u32.totalorder %s1391_s27, %s1445_s4 }
 0x173   : > { %p1070_p12 = scmp.lt.u32.totalorder %s1068_s8, %s1064_s20  ;;  %p1072_p1 = scmp.lt.u32.totalorder %s1064_s20, %s1391_s27 }
 0x174   : > { %p1066_p5 = pnand %p1065_p0, %p1304_p6 }
 0x175   : > { %p1071_p2 = por %p1070_p12, %p1069_p9 }
 0x176   : > { %p1067_p11 = pneg %p1066_p5 }
 0x177   : > { %p1073_p4 = por %p1072_p1, %p1071_p2 }
 0x179   : > { %p1074_p8 = pnand %p1073_p4, %p1067_p11 }
 0x17b   : > { %1077 = shalt.err (!%p1074_p8)
}
 0x17c   : > { %s1133_s21 = smov 64   ;;  %s1134_s23 = smov 4  }
 0x17d   : > { %861 = dma.vmem_to_hbm [thread:$0]  (%p1304_p6), %s1393_s24, 1024, %s1391_s27, %s569_s19, %s1133_s21, %s1133_s21, %s1134_s23  }
 0x17e PF: > { %s598_s29 = sand.u32 1, %s1112_s15   ;;  %p1463_p3 = scmp.ne.s32.totalorder %s1450_s22, 0 }
 0x17f   : > { %p1464_p7 = scmp.ge.s32.totalorder %s1124_s18, 2  ;;  %s599_s5 = scalar_lea.sflag [#allocation4], %s598_s29 }
 0x181   : > { %p878_p10 = pnand %p1464_p7, %p1463_p3 }
 0x183   : > { %1107 = dma.done.wait (!%p878_p10), %s599_s5, 1024  }
 0x184   : > { %1109 = vsyncadd (!%p878_p10), %s599_s5, 4294966272  ;;  %p19_p13 = scmp.ge.s32.totalorder %s1290_s10, 4   ;;  %s1465_s15 = smov %s1116_s16 }
 0x185   : > { %s1466_s16 = smov %s1120_s17  ;;  %s1467_s17 = smov %s1300_s9 }
 0x186   : > { %s1468_s18 = smov %s1290_s10  ;;  %21 = sbr.rel (!%p19_p13) target bundleno = 7 (0x7), region = 94 }
 0x18d   :  { %604 = vsyncpa [#allocation3], 1 }
 0x18e   :  { %606 = vsyncpa [#allocation3 + $0x1], 1 }
 0x18f   :  { %607 = vsyncpa [#allocation6], 1 }
 0x190   :  { %608 = vsyncpa [#allocation9], 1 }
 0x191   :  { %609 = vsyncpa [#allocation4], 1 }
 0x192   :  { %611 = vsyncpa [#allocation4 + $0x1], 1 }

// kernel: basic_block_forward.3
= control target key start
LH: loop header
LB: loop body
LE: loop exit
PB: predicated region body
PF: predicated region fallthrough
CT: control target
= control target key end

     0   :  { %9 = vsyncpa [#allocation3], 0  ;;  %s4771_s0 = inlined_call_operand.hbm [shape: bf16[16,9,9,8], index: 0, kind: input, shape index: {}]   ;;  %s4772_s1 = inlined_call_operand.hbm [shape: bf16[9,8,128], index: 1, kind: input, shape index: {}]   ;;  %s4773_s2 = inlined_call_operand.hbm [shape: f32[1,128], index: 2, kind: input, shape index: {}]   ;;  %s4774_s3 = inlined_call_operand.hbm [shape: f32[1,128], index: 3, kind: input, shape index: {}]   ;;  %s4775_s4 = inlined_call_operand.hbm [shape: bf16[4,64,128], index: 4, kind: output, shape index: {}]  }
   0x1   :  { %11 = vsyncpa [#allocation3 + $0x1], 0 }
   0x2   :  { %12 = vsyncpa [#allocation6], 0 }
   0x3   :  { %13 = vsyncpa [#allocation9], 0 }
   0x4   :  { %14 = vsyncpa [#allocation4], 0 }
   0x5   :  { %16 = vsyncpa [#allocation4 + $0x1], 0  ;;  %s4110_s15 = smov 0   ;;  %s4112_s16 = smov 0  }
   0x6   :  { %s4114_s17 = smov 0   ;;  %s4116_s18 = smov 0  }
   0x7 LB: > { %s4131_s19 = sadd.s32 4294967295, %s4074_s18   ;;  %s2956_s20 = sadd.s32 4294967294, %s4074_s18   ;;  %s4074_s18 = sphi %s4116_s18, %s4800_s18   ;;  %s4070_s17 = sphi %s4114_s17, %s4799_s17   ;;  %s4066_s16 = sphi %s4112_s16, %s4798_s16   ;;  %s4062_s15 = sphi %s4110_s15, %s4797_s15  }
   0x8   : > { %p42_p0 = scmp.ne.s32.totalorder %s4066_s16, %s4062_s15  ;;  %p4776_p1 = scmp.eq.s32.totalorder %s4131_s19, 0 }
   0x9   : > { %p135_p3 = scmp.eq.s32.totalorder %s2956_s20, 1  ;;  %p2957_p5 = scmp.ge.s32.totalorder %s4074_s18, 1 }
   0xa   : > { %p4140_p4 = por %p4776_p1, %p42_p0  ;;  %p142_p7 = scmp.lt.s32.totalorder %s4074_s18, 3 }
   0xb   : > { %p4145_p6 = por %p135_p3, %p42_p0  ;;  %s4076_s24 = smov [#allocation5]  }
   0xc   : > { %s4779_s21 = scalar_select %p4140_p4, 1, 0 }
   0xd   : > { %s4780_s22 = scalar_select %p4145_p6, 1, 0 }
   0xe   : > { %p4150_p8 = pnand %p2957_p5, %p142_p7  ;;  %s154_s25 = sshll.u32 %s4076_s24, 4  ;;  %s4154_s25 = int_to_ptr.vmem [resolvable:$true] %s154_s25 }
   0xf   : > { %s4077_s27 = smov [#allocation7]   ;;  %s4078_s29 = smov [#allocation8]  }
  0x10   : > { %s4781_s23 = scalar_select %p4150_p8, 1, 0 }
  0x11   : > { %p3773_p9 = pneg %p4150_p8  ;;  %s168_s28 = sshll.u32 %s4077_s27, 4  ;;  %s4165_s28 = int_to_ptr.vmem [resolvable:$true] %s168_s28 }
  0x12   : > { %s4167_s30 = sshll.u32 %s4078_s29, 4  ;;  %s3886_s7 = scalar_lea.hbm %s4772_s1, 576  ;;  %s180_s30 = int_to_ptr.vmem [resolvable:$true] %s4167_s30 }
  0x13   : > { %p4161_p11 = pnand %p3773_p9, %p4776_p1  ;;  %p3887_p12 = scmp.ne.s32.totalorder %s4772_s1, %s3886_s7 }
  0x14   : > { %p3893_p5 = scmp.lt.u32.totalorder %s3886_s7, %s4772_s1 }
  0x15   : > { %p4177_p13 = pneg %p4161_p11 }
  0x17   : > { %p3889_p0 = pnand %p4177_p13, %p3887_p12 }
  0x19   : > { %p3890_p3 = pneg %p3889_p0 }
  0x1b   : > { %p3895_p7 = pnand %p3893_p5, %p3890_p3 }
  0x1d   : > { %3898 = shalt.err (!%p3895_p7)
}
  0x1e   : > { %s3899_s13 = scalar_lea.vmem %s4154_s25, 576  ;;  %p3907_p2 = scmp.lt.s32.totalorder %s4154_s25, %s4154_s25 }
  0x1f   : > { %p3900_p9 = scmp.ne.s32.totalorder %s4154_s25, %s3899_s13  ;;  %p3908_p6 = scmp.lt.s32.totalorder %s3899_s13, %s3899_s13 }
  0x21   : > { %p3902_p10 = pnand %p3900_p9, %p4177_p13  ;;  %p3909_p12 = por %p3908_p6, %p3907_p2 }
  0x23   : > { %p3903_p1 = pneg %p3902_p10 }
  0x25   : > { %p3910_p0 = pnand %p3909_p12, %p3903_p1 }
  0x27   : > { %3913 = shalt.err (!%p3910_p0)
}
  0x28   : > { %s4079_s14 = smov 64   ;;  %s4080_s20 = smov 4  }
  0x29   : > { %3776 = dma.hbm_to_vmem [thread:$0]  (!%p4161_p11), %s4772_s1, 576, %s4154_s25, [#allocation6], %s4079_s14, %s4079_s14, %s4080_s20  }
  0x2a   : > { %s3914_s6 = scalar_lea.hbm %s4773_s2, 16 }
  0x2b   : > { %p3915_p1 = scmp.ne.s32.totalorder %s4773_s2, %s3914_s6  ;;  %p3921_p10 = scmp.lt.u32.totalorder %s3914_s6, %s4773_s2 }
  0x2d   : > { %p3917_p2 = pnand %p3915_p1, %p4177_p13 }
  0x2f   : > { %p3918_p6 = pneg %p3917_p2 }
  0x31   : > { %p3923_p3 = pnand %p3921_p10, %p3918_p6 }
  0x33   : > { %3926 = shalt.err (!%p3923_p3)
}
  0x34   : > { %s3927_s25 = scalar_lea.vmem %s4165_s28, 16  ;;  %s3934_s12 = scalar_lea.vmem %s4165_s28, 32 }
  0x35   : > { %p3928_p5 = scmp.ne.s32.totalorder %s4165_s28, %s3927_s25  ;;  %p3935_p12 = scmp.lt.s32.totalorder %s4165_s28, %s4165_s28 }
  0x36   : > { %p3936_p0 = scmp.lt.s32.totalorder %s3934_s12, %s3927_s25 }
  0x37   : > { %p3930_p7 = pnand %p3928_p5, %p4177_p13 }
  0x38   : > { %p3937_p1 = por %p3936_p0, %p3935_p12 }
  0x39   : > { %p3931_p9 = pneg %p3930_p7 }
  0x3b   : > { %p3938_p2 = pnand %p3937_p1, %p3931_p9 }
  0x3d   : > { %3941 = shalt.err (!%p3938_p2)
}
  0x3e   : > { %3779 = dma.hbm_to_vmem [thread:$0]  (!%p4161_p11), %s4773_s2, 16, %s4165_s28, [#allocation6]  }
  0x3f   : > { %s3942_s5 = scalar_lea.hbm %s4774_s3, 16 }
  0x40   : > { %p3943_p6 = scmp.ne.s32.totalorder %s4774_s3, %s3942_s5  ;;  %p3949_p5 = scmp.lt.u32.totalorder %s3942_s5, %s4774_s3 }
  0x42   : > { %p3945_p10 = pnand %p3943_p6, %p4177_p13 }
  0x44   : > { %p3946_p3 = pneg %p3945_p10 }
  0x46   : > { %p3951_p7 = pnand %p3949_p5, %p3946_p3 }
  0x48   : > { %3954 = shalt.err (!%p3951_p7)
}
  0x49   : > { %s3955_s11 = scalar_lea.vmem %s180_s30, 16  ;;  %s3962_s28 = scalar_lea.vmem %s180_s30, 32 }
  0x4a   : > { %p3956_p9 = scmp.ne.s32.totalorder %s180_s30, %s3955_s11  ;;  %p3963_p1 = scmp.lt.s32.totalorder %s180_s30, %s180_s30 }
  0x4b   : > { %p3964_p2 = scmp.lt.s32.totalorder %s3962_s28, %s3955_s11 }
  0x4c   : > { %p3958_p12 = pnand %p3956_p9, %p4177_p13 }
  0x4d   : > { %p3965_p4 = por %p3964_p2, %p3963_p1 }
  0x4e   : > { %p3959_p0 = pneg %p3958_p12 }
  0x50   : > { %p3966_p8 = pnand %p3965_p4, %p3959_p0 }
  0x52   : > { %3969 = shalt.err (!%p3966_p8)
}
  0x53   : > { %3782 = dma.hbm_to_vmem [thread:$0]  (!%p4161_p11), %s4774_s3, 16, %s180_s30, [#allocation9]  }
  0x54   : > { %s4245_s10 = sadd.s32 1, %s4074_s18   ;;  %s29_s26 = sadd.s32 1, %s4070_s17 }
  0x55   : > { %s26_s13 = ssub.s32 %s4074_s18, %s4245_s10  ;;  %p36_p8 = scmp.ne.s32.totalorder %s4070_s17, %s4066_s16 }
  0x56   : > { %p27_p4 = scmp.eq.s32.totalorder %s26_s13, 0  ;;  %p37_p13 = scmp.eq.s32.totalorder %s4074_s18, 0 }
  0x57   : > { %p3794_p6 = scmp.lt.s32.totalorder %s4074_s18, 2  ;;  %p4784_p3 = scmp.eq.s32.totalorder %s4131_s19, 1 }
  0x58   : > { %s4255_s24 = scalar_select %p27_p4, %s4070_s17, %s29_s26  }
  0x59   : > { %p38_p10 = por %p37_p13, %p36_p8  ;;  %p4259_p5 = por %p4784_p3, %p36_p8 }
  0x5a   : > { %s190_s29 = sand.u32 1, %s4070_s17   ;;  %s3755_s5 = smul.u32 9216, %s4074_s18 }
  0x5b   : > { %s3754_s30 = smul.u32 576, %s190_s29  ;;  %p4265_p11 = pnand %p3794_p6, %p38_p10 }
  0x5c   : > { %s4272_s9 = scalar_lea.hbm %s4771_s0, %s3755_s5  ;;  %s4276_s25 = scalar_lea.sflag [#allocation3], %s190_s29 }
  0x5d   : > { %s194_s11 = scalar_lea.vmem [#allocation2], %s3754_s30  ;;  %s3970_s12 = scalar_lea.hbm %s4272_s9, 9216 }
  0x5e   : > { %s202_s28 = sshll.u32 %s194_s11, 4  ;;  %p3971_p7 = scmp.ne.s32.totalorder %s4272_s9, %s3970_s12  ;;  %s4274_s28 = int_to_ptr.vmem [resolvable:$true] %s202_s28 }
  0x5f   : > { %p3972_p9 = pneg %p4265_p11  ;;  %s3975_s5 = scalar_lea.hbm %s4771_s0, 18432 }
  0x60   : > { %p3976_p1 = scmp.lt.u32.totalorder %s4272_s9, %s4771_s0  ;;  %p3977_p2 = scmp.lt.u32.totalorder %s3975_s5, %s3970_s12 }
  0x61   : > { %p3973_p12 = pnand %p3972_p9, %p3971_p7  ;;  %p3979_p8 = scmp.lt.u32.totalorder %s3970_s12, %s4272_s9 }
  0x62   : > { %p3978_p4 = por %p3977_p2, %p3976_p1 }
  0x63   : > { %p3974_p0 = pneg %p3973_p12 }
  0x64   : > { %p3980_p13 = por %p3979_p8, %p3978_p4 }
  0x66   : > { %p3981_p6 = pnand %p3980_p13, %p3974_p0 }
  0x68   : > { %3984 = shalt.err (!%p3981_p6)
}
  0x69   : > { %s3985_s29 = scalar_lea.vmem %s4274_s28, 9216  ;;  %s4081_s30 = smov [#allocation2]  }
  0x6a   : > { %p3986_p10 = scmp.ne.s32.totalorder %s4274_s28, %s3985_s29  ;;  %s3990_s11 = sshll.u32 %s4081_s30, 4  ;;  %s3991_s11 = int_to_ptr.vmem [resolvable:$false] %s3990_s11 }
  0x6b   : > { %s3992_s13 = scalar_lea.vmem %s3991_s11, 18432  ;;  %p3993_p12 = scmp.lt.s32.totalorder %s4274_s28, %s3991_s11 }
  0x6c   : > { %p3988_p3 = pnand %p3986_p10, %p3972_p9  ;;  %p3994_p1 = scmp.lt.s32.totalorder %s3992_s13, %s3985_s29 }
  0x6e   : > { %p3989_p7 = pneg %p3988_p3  ;;  %p3995_p2 = por %p3994_p1, %p3993_p12 }
  0x70   : > { %p3996_p4 = pnand %p3995_p2, %p3989_p7 }
  0x72   : > { %3999 = shalt.err (!%p3996_p4)
}
  0x73   : > { %3786 = dma.hbm_to_vmem [thread:$0]  (!%p4265_p11), %s4272_s9, 9216, %s4274_s28, %s4276_s25, %s4079_s14, %s4079_s14, %s4080_s20  }
  0x74   : > { %p4787_p9 = scmp.ne.s32.totalorder %s4781_s23, 0 }
  0x75   : > { %s4310_s12 = sand.u32 (!%p4787_p9), 1, %s4066_s16   ;;  %p4788_p0 = scmp.ne.s32.totalorder (!%p4787_p9), %s4779_s21, 0 }
  0x76   : > { %214 = sbr.rel (%p4787_p9) target bundleno = 522 (0x20a), region = 36  ;;  %s217_s5 = scalar_lea.sflag (!%p4787_p9), [#allocation3], %s4310_s12 }
  0x77   : > { %s3756_s26 = smul.u32 (!%p4787_p9), 576, %s4310_s12 }
  0x79   : > { %s4314_s7 = scalar_lea.vmem (!%p4787_p9), [#allocation2], %s3756_s26 }
  0x7d   : > { %4045 = dma.done.wait (%p4788_p0), %s217_s5, 9216  }
  0x7e   : > { %4047 = vsyncadd (%p4788_p0), %s217_s5, 4294958080  ;;  %p4789_p11 = scmp.eq.s32.totalorder %s4131_s19, 0 }
  0x80   : > { %4049 = dma.done.wait (%p4789_p11), [#allocation6], 592   ;;  %p4790_p8 = pmov %p4789_p11 }
  0x82   : > { %4051 = vsyncadd (%p4790_p8), [#allocation6], 4294966704  ;;  %p4791_p13 = pmov %p4790_p8 }
  0x83   : > { %p4792_p6 = pmov %p4790_p8 }
  0x84   : > { %4053 = dma.done.wait (%p4791_p13), [#allocation9], 16  }
  0x85   : > { %4055 = vsyncadd (%p4792_p6), [#allocation9], 4294967280  ;;  %vm403_vm0 = vcmask 1043456   ;;  %vm378_vm1 = vcmask 64512   ;;  %v377_v0 = vld [vmem:[#allocation5 + $0x4] sm:$0xf] }
  0x86   : > { %v4328_v1 = vld [vmem:[#allocation5 + $0x10] sm:$0xf]  ;;  %3744 = vmatprep.subr.msk.bf16.mxu1 %vm403_vm0, %v377_v0  ;;  %v405_v2 = vsel %vm403_vm0, %v377_v0, 0  ;;  %v3839_v5 = vld [vmem:[%s4314_s7 + $0xd8] ss:$8 sps:$4 sm:$0xff]   ;;  %s2969_s21 = sshll.u32 %s4310_s12, 6 }
  0x87   : > { %3748 = vmatprep.subr.msk.bf16.mxu0 %vm403_vm0, %v4328_v1  ;;  %v4336_v3 = vsel %vm403_vm0, %v4328_v1, 0  ;;  %v3838_v4 = vld [vmem:[%s4314_s7 + $0x48] ss:$8 sps:$4 sm:$0xff]   ;;  %3453 = vmatpush3.bf16.msra.mxu1 %v405_v2  ;;  %v3840_v6 = vld [vmem:[%s4314_s7 + $0x58] ss:$8 sps:$4 sm:$0xff]   ;;  %s4688_s23 = scalar_lea.vmem [#allocation10], %s2969_s21 }
  0x88   : > { %3525 = vmatpush3.bf16.msra.mxu0 %v4336_v3  ;;  %3454 = vmatprep.mubr.msk.bf16.mxu1 %vm378_vm1, %v3838_v4  ;;  %v317_v7 = vld [vmem:[#allocation5] sm:$0xf]  ;;  %v3841_v8 = vld [vmem:[%s4314_s7 + $0xe8] ss:$8 sps:$4 sm:$0xff]   ;;  %v1734_v9 = vld [vmem:[#allocation5 + $0x14] sm:$0xf] }
  0x89   : > { %3526 = vmatprep.mubr.msk.bf16.mxu0 %vm378_vm1, %v3839_v5  ;;  %3745 = vmatprep.subr.msk.bf16.mxu1 %vm403_vm0, %v317_v7  ;;  %v529_v10 = vsel %vm403_vm0, %v317_v7, 0  ;;  %v1760_v11 = vsel %vm403_vm0, %v1734_v9, 0  ;;  %vm644_vm2 = vsmask.f32 3328  ;;  %v3842_v12 = vld [vmem:[%s4314_s7 + $0x68] ss:$8 sps:$4 sm:$0xff]  }
  0x8a   : > { %3455 = vmatmul.mubr.msk.bf16.vlgmr.msra.gmra.mrb[0].mxu1 %vm378_vm1, %v3840_v6  ;;  %3750 = vmatprep.subr.msk.bf16.mxu0 %vm403_vm0, %v1734_v9  ;;  %v3843_v13 = vld [vmem:[%s4314_s7 + $0xf8] ss:$8 sps:$4 sm:$0xff]   ;;  %v3845_v15 = vld [vmem:[%s4314_s7 + $0x108] ss:$8 sps:$4 sm:$0xff]   ;;  %v3123_v18 = vld [vmem:[%s4314_s7 + $0x94] sm:$0x1] }
  0x8b   : > { %3471 = vmatpush3.bf16.msra.mxu1 %v529_v10  ;;  %3527 = vmatmul.mubr.msk.bf16.vlgmr.msra.gmra.mrb[0].mxu0 %vm378_vm1, %v3841_v8  ;;  %v3844_v14 = vld [vmem:[%s4314_s7 + $0x78] ss:$8 sps:$4 sm:$0xff]   ;;  %v3846_v16 = vld [vmem:[%s4314_s7 + $0x168] ss:$8 sps:$4 sm:$0xff]   ;;  %v3125_v20 = vld [vmem:[%s4314_s7 + $0x9c] sm:$0x1] }
  0x8c   : > { %3543 = vmatpush3.bf16.msra.mxu0 %v1760_v11  ;;  %3458 = vmatprep.mubr.msk.bf16.mxu1 %vm378_vm1, %v3842_v12  ;;  %v3122_v17 = vld [vmem:[%s4314_s7 + $0x90] sm:$0xf]  ;;  %v3124_v19 = vld [vmem:[%s4314_s7 + $0x98] sm:$0xf]  ;;  %v1479_v23 = vshll.u32 %v3123_v18, 16  ;;  %v1493_v26 = vshll.u32 %v3125_v20, 16 }
  0x8d   : > { %3530 = vmatprep.mubr.msk.bf16.mxu0 %vm378_vm1, %v3843_v13  ;;  %v1470_v21 = vshrl.u32 %v3122_v17, 16  ;;  %v1473_v22 = vshll.u32 %v3122_v17, 16  ;;  %v1484_v24 = vshrl.u32 %v3124_v19, 16  ;;  %v1487_v25 = vshll.u32 %v3124_v19, 16  ;;  %v3847_v33 = vld [vmem:[%s4314_s7 + $0x178] ss:$8 sps:$4 sm:$0xff]  }
  0x8e   : > { %vm645_vm3 = vsmask.f32 7440  ;;  %v1481_v29 = vrot.slane %v1479_v23, 5  ;;  %v1495_v32 = vrot.slane %v1493_v26, 5  ;;  %v3126_v34 = vld [vmem:[%s4314_s7 + $0xa0] sm:$0xf] }
  0x8f   : > { %v1472_v27 = vrot.slane %v1470_v21, 4  ;;  %v1475_v28 = vrot.slane %v1473_v22, 5  ;;  %v1486_v30 = vrot.slane %v1484_v24, 4  ;;  %v1489_v31 = vrot.slane %v1487_v25, 5  ;;  %v3127_v36 = vld [vmem:[%s4314_s7 + $0xa4] sm:$0x1]  ;;  %vm4371_vm4 = vmor %vm644_vm2, %vm645_vm3 }
  0x90   : > { %v3128_v37 = vld [vmem:[%s4314_s7 + $0xa8] sm:$0xf]  ;;  %v3129_v38 = vld [vmem:[%s4314_s7 + $0xac] sm:$0x1]  ;;  %v1498_v41 = vshrl.u32 %v3126_v34, 16  ;;  %v1501_v42 = vshll.u32 %v3126_v34, 16 }
  0x91   : > { %v1476_v35 = vor.u32 %v1475_v28, %v1472_v27  ;;  %v1490_v40 = vor.u32 %v1489_v31, %v1486_v30  ;;  %v1507_v43 = vshll.u32 %v3127_v36, 16  ;;  %v1934_v44 = vld [vmem:[#allocation5 + $0x18] sm:$0xf]  ;;  %v1512_v46 = vshrl.u32 %v3128_v37, 16  ;;  %v3848_v55 = vld [vmem:[%s4314_s7 + $0x188] ss:$8 sps:$4 sm:$0xff]  }
  0x92   : > { %3459 = vmatmul.mubr.msk.bf16.gmra.mrb[4].mxu1 %vm378_vm1, %v3844_v14  ;;  %v1515_v47 = vshll.u32 %v3128_v37, 16  ;;  %v1521_v48 = vshll.u32 %v3129_v38, 16  ;;  %3751 = vmatprep.subr.msk.bf16.mxu0 %vm403_vm0, %v1934_v44  ;;  %v1500_v50 = vrot.slane %v1498_v41, 4  ;;  %v1503_v51 = vrot.slane %v1501_v42, 5  ;;  %v3130_v60 = vld [vmem:[%s4314_s7 + $0xb0] sm:$0xf] }
  0x93   : > { %3462 = vmatprep.mubr.msk.bf16.mxu1 %vm378_vm1, %v3846_v16  ;;  %3531 = vmatmul.mubr.msk.bf16.gmra.mrb[4].mxu0 %vm378_vm1, %v3845_v15  ;;  %v1477_v45 = vrot.slane %v1476_v35, 4  ;;  %v1491_v49 = vrot.slane %v1490_v40, 4  ;;  %v1514_v53 = vrot.slane %v1512_v46, 4  ;;  %v1509_v58 = vrot.slane %v1507_v43, 5  ;;  %v3131_v61 = vld [vmem:[%s4314_s7 + $0xb4] sm:$0x1] }
  0x94   : > { %v1517_v54 = vrot.slane %v1515_v47, 5  ;;  %v1504_v57 = vor.u32 %v1503_v51, %v1500_v50  ;;  %v1523_v59 = vrot.slane %v1521_v48, 5  ;;  %v3132_v0 = vld [vmem:[%s4314_s7 + $0xb8] sm:$0xf]  ;;  %v3133_v2 = vld [vmem:[%s4314_s7 + $0xbc] sm:$0x1] }
  0x95   : > { %v1482_v52 = vsel %vm4371_vm4, %v1477_v45, %v1481_v29  ;;  %v1496_v56 = vsel %vm4371_vm4, %v1491_v49, %v1495_v32  ;;  %v1526_v4 = vshrl.u32 %v3130_v60, 16  ;;  %v1529_v5 = vshll.u32 %v3130_v60, 16  ;;  %v3849_v18 = vld [vmem:[%s4314_s7 + $0x198] ss:$8 sps:$4 sm:$0xff]   ;;  %v3135_v24 = vld [vmem:[%s4314_s7 + $0xc4] sm:$0x1] }
  0x96   : > { %v3154_v62 = vcombine.low %v1482_v52, %v1496_v56  ;;  %v1518_v63 = vor.u32 %v1517_v54, %v1514_v53  ;;  %v1505_v6 = vrot.slane %v1504_v57, 4  ;;  %v1535_v7 = vshll.u32 %v3131_v61, 16  ;;  %v3134_v23 = vld [vmem:[%s4314_s7 + $0xc0] sm:$0xf]  ;;  %v3136_v27 = vld [vmem:[%s4314_s7 + $0xc8] sm:$0xf] }
  0x97   : > { %v1540_v8 = vshrl.u32 %v3132_v0, 16  ;;  %v1543_v9 = vshll.u32 %v3132_v0, 16  ;;  %v1528_v11 = vrot.slane %v1526_v4, 4  ;;  %v1531_v12 = vrot.slane %v1529_v5, 5  ;;  %v3137_v28 = vld [vmem:[%s4314_s7 + $0xcc] sm:$0x1] }
  0x98   : > { %3544 = vmatprep.mubr.msk.bf16.mxu0 %vm378_vm1, %v3154_v62  ;;  %v1519_v10 = vrot.slane %v1518_v63, 4  ;;  %v1549_v13 = vshll.u32 %v3133_v2, 16  ;;  %v1510_v14 = vsel %vm4371_vm4, %v1505_v6, %v1509_v58  ;;  %v1960_v15 = vsel %vm403_vm0, %v1934_v44, 0  ;;  %v3850_v43 = vld [vmem:[%s4314_s7] ss:$8 sps:$4 sm:$0xff]   ;;  %s3323_s14 = sshll.u32 %s4131_s19, 10 }
  0x99   : > { %v1542_v16 = vrot.slane %v1540_v8, 4  ;;  %v1545_v17 = vrot.slane %v1543_v9, 5  ;;  %v1532_v20 = vor.u32 %v1531_v12, %v1528_v11  ;;  %v1537_v21 = vrot.slane %v1535_v7, 5  ;;  %v3138_v48 = vld [vmem:[%s4314_s7 + $0x1b0] sm:$0xf]  ;;  %s2854_s20 = sshll.u32 %s4688_s23, 4  ;;  %s4723_s28 = scalar_lea.hbm %s4775_s4, %s3323_s14  ;;  %s4725_s20 = int_to_ptr.vmem [resolvable:$true] %s2854_s20 }
  0x9a   : > { %3463 = vmatmul.mubr.msk.bf16.gmra.mrb[8].mxu1 %vm378_vm1, %v3847_v33  ;;  %v1524_v19 = vsel %vm4371_vm4, %v1519_v10, %v1523_v59  ;;  %v1551_v22 = vrot.slane %v1549_v13, 5  ;;  %v1554_v29 = vshrl.u32 %v3134_v23, 16  ;;  %v1557_v30 = vshll.u32 %v3134_v23, 16  ;;  %v3139_v49 = vld [vmem:[%s4314_s7 + $0x1b4] sm:$0x1]  ;;  %s2840_s19 = scalar_lea.sflag [#allocation4], %s4310_s12 }
  0x9b   : > { %3466 = vmatprep.mubr.msk.bf16.mxu1 %vm378_vm1, %v3848_v55  ;;  %v3155_v25 = vcombine.low %v1510_v14, %v1524_v19  ;;  %v1546_v26 = vor.u32 %v1545_v17, %v1542_v16  ;;  %v1533_v31 = vrot.slane %v1532_v20, 4  ;;  %v1563_v32 = vshll.u32 %v3135_v24, 16  ;;  %v3140_v52 = vld [vmem:[%s4314_s7 + $0x1b8] sm:$0xf]  ;;  %v3141_v53 = vld [vmem:[%s4314_s7 + $0x1bc] sm:$0x1] }
  0x9c   : > { %v1568_v33 = vshrl.u32 %v3136_v27, 16  ;;  %v1571_v34 = vshll.u32 %v3136_v27, 16  ;;  %v1556_v36 = vrot.slane %v1554_v29, 4  ;;  %v1559_v37 = vrot.slane %v1557_v30, 5  ;;  %v3851_v5 = vld [vmem:[%s4314_s7 + $0x10] ss:$8 sps:$4 sm:$0xff]  }
  0x9d   : > { %3545 = vmatmul.mubr.msk.bf16.vlgmr.msra.gmra.mrb[0].mxu0 %vm378_vm1, %v3155_v25  ;;  %v1547_v35 = vrot.slane %v1546_v26, 4  ;;  %v1577_v38 = vshll.u32 %v3137_v28, 16  ;;  %v1538_v40 = vsel %vm4371_vm4, %v1533_v31, %v1537_v21  ;;  %v1565_v46 = vrot.slane %v1563_v32, 5  ;;  %v912_v10 = vld [vmem:[#allocation5 + $0x8] sm:$0xf]  ;;  %s4000_s25 = scalar_lea.vmem %s4725_s20, 1024 }
  0x9e   : > { %3561 = vmatpush3.bf16.msra.mxu0 %v1960_v15  ;;  %v1570_v41 = vrot.slane %v1568_v33, 4  ;;  %v1573_v42 = vrot.slane %v1571_v34, 5  ;;  %v1560_v45 = vor.u32 %v1559_v37, %v1556_v36  ;;  %v1598_v54 = vshrl.u32 %v3138_v48, 16  ;;  %v3142_v11 = vld [vmem:[%s4314_s7 + $0x1c0] sm:$0xf]  ;;  %3746 = vmatprep.subr.msk.bf16.mxu1 %vm403_vm0, %v912_v10  ;;  %p4001_p10 = scmp.ne.s32.totalorder %s4725_s20, %s4000_s25  ;;  %s4082_s8 = smov [#allocation10]  }
  0x9f   : > { %v1552_v44 = vsel %vm4371_vm4, %v1547_v35, %v1551_v22  ;;  %v1579_v47 = vrot.slane %v1577_v38, 5  ;;  %v1601_v55 = vshll.u32 %v3138_v48, 16  ;;  %v1607_v57 = vshll.u32 %v3139_v49, 16  ;;  %v3143_v14 = vld [vmem:[%s4314_s7 + $0x1c4] sm:$0x1]  ;;  %s4004_s29 = sshll.u32 %s4082_s8, 4  ;;  %s4005_s29 = int_to_ptr.vmem [resolvable:$false] %s4004_s29 }
  0xa0   : > { %v3156_v50 = vcombine.low %v1538_v40, %v1552_v44  ;;  %v1574_v51 = vor.u32 %v1573_v42, %v1570_v41  ;;  %v1561_v56 = vrot.slane %v1560_v45, 4  ;;  %v1612_v58 = vshrl.u32 %v3140_v52, 16  ;;  %v3144_v15 = vld [vmem:[%s4314_s7 + $0x1c8] sm:$0xf]  ;;  %v3145_v16 = vld [vmem:[%s4314_s7 + $0x1cc] sm:$0x1]  ;;  %p4002_p3 = pnand %p4001_p10, %p4259_p5  ;;  %p4007_p12 = scmp.lt.s32.totalorder %s4725_s20, %s4005_s29 }
  0xa1   : > { %v1615_v59 = vshll.u32 %v3140_v52, 16  ;;  %v1600_v61 = vrot.slane %v1598_v54, 4  ;;  %v1603_v62 = vrot.slane %v1601_v55, 5  ;;  %v1621_v63 = vshll.u32 %v3141_v53, 16  ;;  %v3852_v29 = vld [vmem:[%s4314_s7 + $0x20] ss:$8 sps:$4 sm:$0xff]  }
  0xa2   : > { %3467 = vmatmul.mubr.msk.bf16.gmra.mrb[12].mxu1 %vm378_vm1, %v3849_v18  ;;  %3548 = vmatprep.mubr.msk.bf16.mxu0 %vm378_vm1, %v3156_v50  ;;  %v1575_v60 = vrot.slane %v1574_v51, 4  ;;  %v1566_v0 = vsel %vm4371_vm4, %v1561_v56, %v1565_v46  ;;  %v1614_v2 = vrot.slane %v1612_v58, 4  ;;  %v1609_v8 = vrot.slane %v1607_v57, 5  ;;  %v3146_v34 = vld [vmem:[%s4314_s7 + $0x1d0] sm:$0xf]  ;;  %p4003_p7 = pneg %p4002_p3  ;;  %s4006_s30 = scalar_lea.vmem %s4005_s29, 2048 }
  0xa3   : > { %3472 = vmatprep.mubr.msk.bf16.mxu1 %vm378_vm1, %v3850_v43  ;;  %v1617_v4 = vrot.slane %v1615_v59, 5  ;;  %v1604_v7 = vor.u32 %v1603_v62, %v1600_v61  ;;  %v1623_v9 = vrot.slane %v1621_v63, 5  ;;  %v1626_v18 = vshrl.u32 %v3142_v11, 16  ;;  %v3147_v38 = vld [vmem:[%s4314_s7 + $0x1d4] sm:$0x1]  ;;  %p4008_p1 = scmp.lt.s32.totalorder %s4006_s30, %s4000_s25 }
  0xa4   : > { %v1580_v6 = vsel %vm4371_vm4, %v1575_v60, %v1579_v47  ;;  %v1629_v19 = vshll.u32 %v3142_v11, 16  ;;  %v1635_v20 = vshll.u32 %v3143_v14, 16  ;;  %v1640_v22 = vshrl.u32 %v3144_v15, 16  ;;  %v3148_v40 = vld [vmem:[%s4314_s7 + $0x1d8] sm:$0xf] }
  0xa5   : > { %v3157_v12 = vcombine.low %v1566_v0, %v1580_v6  ;;  %v1618_v13 = vor.u32 %v1617_v4, %v1614_v2  ;;  %v1605_v17 = vrot.slane %v1604_v7, 4  ;;  %v1643_v23 = vshll.u32 %v3144_v15, 16  ;;  %v3149_v43 = vld [vmem:[%s4314_s7 + $0x1dc] sm:$0x1]  ;;  %v3853_v58 = vld [vmem:[%s4314_s7 + $0x30] ss:$8 sps:$4 sm:$0xff]   ;;  %p4009_p2 = por %p4008_p1, %p4007_p12 }
  0xa6   : > { %v1649_v24 = vshll.u32 %v3145_v16, 16  ;;  %v1628_v26 = vrot.slane %v1626_v18, 4  ;;  %v1631_v27 = vrot.slane %v1629_v19, 5  ;;  %v1637_v28 = vrot.slane %v1635_v20, 5  ;;  %v3150_v59 = vld [vmem:[%s4314_s7 + $0x1e0] sm:$0xf] }
  0xa7   : > { %3549 = vmatmul.mubr.msk.bf16.gmra.mrb[4].mxu0 %vm378_vm1, %v3157_v12  ;;  %v1619_v21 = vrot.slane %v1618_v13, 4  ;;  %v1610_v25 = vsel %vm4371_vm4, %v1605_v17, %v1609_v8  ;;  %v1642_v31 = vrot.slane %v1640_v22, 4  ;;  %v1645_v32 = vrot.slane %v1643_v23, 5  ;;  %v3151_v62 = vld [vmem:[%s4314_s7 + $0x1e4] sm:$0x1]  ;;  %p4010_p4 = pnand %p4009_p2, %p4003_p7 }
  0xa8   : > { %v1651_v33 = vrot.slane %v1649_v24, 5  ;;  %v1632_v36 = vor.u32 %v1631_v27, %v1628_v26  ;;  %v938_v37 = vsel %vm403_vm0, %v912_v10, 0  ;;  %v1654_v41 = vshrl.u32 %v3146_v34, 16  ;;  %v3152_v63 = vld [vmem:[%s4314_s7 + $0x1e8] sm:$0xf] }
  0xa9   : > { %v1624_v30 = vsel %vm4371_vm4, %v1619_v21, %v1623_v9  ;;  %v1646_v42 = vor.u32 %v1645_v32, %v1642_v31  ;;  %v1657_v44 = vshll.u32 %v3146_v34, 16  ;;  %v1663_v45 = vshll.u32 %v3147_v38, 16  ;;  %v3153_v0 = vld [vmem:[%s4314_s7 + $0x1ec] sm:$0x1]  ;;  %v3854_v11 = vld [vmem:[%s4314_s7 + $0x120] ss:$8 sps:$4 sm:$0xff]  }
  0xaa   : > { %3473 = vmatmul.mubr.msk.bf16.vlgmr.msra.gmra.mrb[0].mxu1 %vm378_vm1, %v3851_v5  ;;  %v3158_v35 = vcombine.low %v1610_v25, %v1624_v30  ;;  %v1668_v46 = vshrl.u32 %v3148_v40, 16  ;;  %v1633_v47 = vrot.slane %v1632_v36, 4  ;;  %v1656_v48 = vrot.slane %v1654_v41, 4  ;;  %v3856_v25 = vld [vmem:[%s4314_s7 + $0x130] ss:$8 sps:$4 sm:$0xff]  }
  0xab   : > { %3476 = vmatprep.mubr.msk.bf16.mxu1 %vm378_vm1, %v3852_v29  ;;  %3489 = vmatpush3.bf16.msra.mxu1 %v938_v37  ;;  %v1671_v49 = vshll.u32 %v3148_v40, 16  ;;  %v1677_v50 = vshll.u32 %v3149_v43, 16  ;;  %v1647_v51 = vrot.slane %v1646_v42, 4  ;;  %v1659_v52 = vrot.slane %v1657_v44, 5  ;;  %v3858_v30 = vld [vmem:[%s4314_s7 + $0x140] ss:$8 sps:$4 sm:$0xff]  }
  0xac   : > { %3552 = vmatprep.mubr.msk.bf16.mxu0 %vm378_vm1, %v3158_v35  ;;  %v1665_v53 = vrot.slane %v1663_v45, 5  ;;  %v1670_v54 = vrot.slane %v1668_v46, 4  ;;  %v1638_v55 = vsel %vm4371_vm4, %v1633_v47, %v1637_v28  ;;  %v1682_v5 = vshrl.u32 %v3150_v59, 16  ;;  %v2134_v28 = vld [vmem:[#allocation5 + $0x1c] sm:$0xf] }
  0xad   : > { %v1673_v56 = vrot.slane %v1671_v49, 5  ;;  %v1679_v57 = vrot.slane %v1677_v50, 5  ;;  %v1652_v60 = vsel %vm4371_vm4, %v1647_v51, %v1651_v33  ;;  %v1660_v61 = vor.u32 %v1659_v52, %v1656_v48  ;;  %3752 = vmatprep.subr.msk.bf16.mxu0 %vm403_vm0, %v2134_v28  ;;  %v3855_v32 = vld [vmem:[%s4314_s7 + $0x8] ss:$8 sps:$4 sm:$0xff]   ;;  %v628_v36 = vld [vmem:[%s4314_s7] sm:$0xf] }
  0xae   : > { %v3159_v2 = vcombine.low %v1638_v55, %v1652_v60  ;;  %v1685_v6 = vshll.u32 %v3150_v59, 16  ;;  %v1691_v8 = vshll.u32 %v3151_v62, 16  ;;  %v1696_v9 = vshrl.u32 %v3152_v63, 16  ;;  %v3860_v35 = vld [vmem:[%s4314_s7 + $0x150] ss:$8 sps:$4 sm:$0xff]  }
  0xaf   : > { %v1674_v4 = vor.u32 %v1673_v56, %v1670_v54  ;;  %v1661_v7 = vrot.slane %v1660_v61, 4  ;;  %v1699_v10 = vshll.u32 %v3152_v63, 16  ;;  %v1684_v13 = vrot.slane %v1682_v5, 4  ;;  %v629_v37 = vld [vmem:[%s4314_s7 + $0x4] sm:$0x1] }
  0xb0   : > { %3553 = vmatmul.mubr.msk.bf16.gmra.mrb[8].mxu0 %vm378_vm1, %v3159_v2  ;;  %v1687_v14 = vrot.slane %v1685_v6, 5  ;;  %v1705_v15 = vshll.u32 %v3153_v0, 16  ;;  %v1698_v17 = vrot.slane %v1696_v9, 4  ;;  %v1693_v21 = vrot.slane %v1691_v8, 5  ;;  %v630_v38 = vld [vmem:[%s4314_s7 + $0x8] sm:$0xf] }
  0xb1   : > { %v1675_v12 = vrot.slane %v1674_v4, 4  ;;  %v1666_v16 = vsel %vm4371_vm4, %v1661_v7, %v1665_v53  ;;  %v1701_v18 = vrot.slane %v1699_v10, 5  ;;  %v2160_v34 = vsel %vm403_vm0, %v2134_v28, 0  ;;  %v631_v40 = vld [vmem:[%s4314_s7 + $0xc] sm:$0x1] }
  0xb2   : > { %3477 = vmatmul.mubr.msk.bf16.gmra.mrb[4].mxu1 %vm378_vm1, %v3853_v58  ;;  %v1688_v20 = vor.u32 %v1687_v14, %v1684_v13  ;;  %v1707_v22 = vrot.slane %v1705_v15, 5  ;;  %v648_v41 = vshrl.u32 %v628_v36, 16  ;;  %v651_v42 = vshll.u32 %v628_v36, 16  ;;  %v3857_v45 = vld [vmem:[%s4314_s7 + $0x18] ss:$8 sps:$4 sm:$0xff]  }
  0xb3   : > { %3480 = vmatprep.mubr.msk.bf16.mxu1 %vm378_vm1, %v3854_v11  ;;  %v1680_v19 = vsel %vm4371_vm4, %v1675_v12, %v1679_v57  ;;  %v1702_v24 = vor.u32 %v1701_v18, %v1698_v17  ;;  %v657_v43 = vshll.u32 %v629_v37, 16  ;;  %v662_v44 = vshrl.u32 %v630_v38, 16  ;;  %v3859_v48 = vld [vmem:[%s4314_s7 + $0x28] ss:$8 sps:$4 sm:$0xff]   ;;  %v633_v56 = vld [vmem:[%s4314_s7 + $0x14] sm:$0x1] }
  0xb4   : > { %v3160_v23 = vcombine.low %v1666_v16, %v1680_v19  ;;  %v1689_v26 = vrot.slane %v1688_v20, 4  ;;  %v665_v46 = vshll.u32 %v630_v38, 16  ;;  %v671_v47 = vshll.u32 %v631_v40, 16  ;;  %v632_v55 = vld [vmem:[%s4314_s7 + $0x10] sm:$0xf] }
  0xb5   : > { %v1703_v27 = vrot.slane %v1702_v24, 4  ;;  %v650_v49 = vrot.slane %v648_v41, 4  ;;  %v653_v50 = vrot.slane %v651_v42, 5  ;;  %v659_v51 = vrot.slane %v657_v43, 5  ;;  %v634_v58 = vld [vmem:[%s4314_s7 + $0x18] sm:$0xf] }
  0xb6   : > { %3556 = vmatprep.mubr.msk.bf16.mxu0 %vm378_vm1, %v3160_v23  ;;  %v1694_v29 = vsel %vm4371_vm4, %v1689_v26, %v1693_v21  ;;  %v664_v52 = vrot.slane %v662_v44, 4  ;;  %v667_v53 = vrot.slane %v665_v46, 5  ;;  %v673_v54 = vrot.slane %v671_v47, 5  ;;  %v635_v59 = vld [vmem:[%s4314_s7 + $0x1c] sm:$0x1] }
  0xb7   : > { %v1708_v31 = vsel %vm4371_vm4, %v1703_v27, %v1707_v22  ;;  %v654_v57 = vor.u32 %v653_v50, %v650_v49  ;;  %v676_v60 = vshrl.u32 %v632_v55, 16  ;;  %v679_v61 = vshll.u32 %v632_v55, 16  ;;  %v1112_v4 = vld [vmem:[#allocation5 + $0xc] sm:$0xf]  ;;  %v636_v17 = vld [vmem:[%s4314_s7 + $0x20] sm:$0xf] }
  0xb8   : > { %v3161_v33 = vcombine.low %v1694_v29, %v1708_v31  ;;  %v668_v62 = vor.u32 %v667_v53, %v664_v52  ;;  %v685_v63 = vshll.u32 %v633_v56, 16  ;;  %v690_v0 = vshrl.u32 %v634_v58, 16  ;;  %3747 = vmatprep.subr.msk.bf16.mxu1 %vm403_vm0, %v1112_v4  ;;  %v3861_v18 = vld [vmem:[%s4314_s7 + $0x38] ss:$8 sps:$4 sm:$0xff]   ;;  %v637_v21 = vld [vmem:[%s4314_s7 + $0x24] sm:$0x1] }
  0xb9   : > { %v693_v2 = vshll.u32 %v634_v58, 16  ;;  %v655_v5 = vrot.slane %v654_v57, 4  ;;  %v678_v6 = vrot.slane %v676_v60, 4  ;;  %v681_v7 = vrot.slane %v679_v61, 5  ;;  %v638_v22 = vld [vmem:[%s4314_s7 + $0x28] sm:$0xf] }
  0xba   : > { %3481 = vmatmul.mubr.msk.bf16.gmra.mrb[8].mxu1 %vm378_vm1, %v3856_v25  ;;  %3557 = vmatmul.mubr.msk.bf16.gmra.mrb[12].mxu0 %vm378_vm1, %v3161_v33  ;;  %v699_v8 = vshll.u32 %v635_v59, 16  ;;  %v669_v9 = vrot.slane %v668_v62, 4  ;;  %v687_v10 = vrot.slane %v685_v63, 5  ;;  %v692_v11 = vrot.slane %v690_v0, 4  ;;  %v639_v23 = vld [vmem:[%s4314_s7 + $0x2c] sm:$0x1] }
  0xbb   : > { %3484 = vmatprep.mubr.msk.bf16.mxu1 %vm378_vm1, %v3858_v30  ;;  %3562 = vmatprep.mubr.msk.bf16.mxu0 %vm378_vm1, %v3855_v32  ;;  %v695_v12 = vrot.slane %v693_v2, 5  ;;  %v660_v13 = vsel %vm4371_vm4, %v655_v5, %v659_v51  ;;  %v682_v14 = vor.u32 %v681_v7, %v678_v6  ;;  %v1138_v16 = vsel %vm403_vm0, %v1112_v4, 0  ;;  %v3862_v32 = vld [vmem:[%s4314_s7 + $0x128] ss:$8 sps:$4 sm:$0xff]   ;;  %v641_v46 = vld [vmem:[%s4314_s7 + $0x34] sm:$0x1] }
  0xbc   : > { %v701_v15 = vrot.slane %v699_v8, 5  ;;  %v674_v19 = vsel %vm4371_vm4, %v669_v9, %v673_v54  ;;  %v704_v26 = vshrl.u32 %v636_v17, 16  ;;  %v707_v27 = vshll.u32 %v636_v17, 16  ;;  %v640_v42 = vld [vmem:[%s4314_s7 + $0x30] sm:$0xf] }
  0xbd   : > { %v696_v20 = vor.u32 %v695_v12, %v692_v11  ;;  %v3042_v24 = vcombine.low %v660_v13, %v674_v19  ;;  %v683_v25 = vrot.slane %v682_v14, 4  ;;  %v713_v29 = vshll.u32 %v637_v21, 16  ;;  %v642_v47 = vld [vmem:[%s4314_s7 + $0x38] sm:$0xf]  ;;  %v643_v50 = vld [vmem:[%s4314_s7 + $0x3c] sm:$0x1] }
  0xbe   : > { %v718_v30 = vshrl.u32 %v638_v22, 16  ;;  %v721_v31 = vshll.u32 %v638_v22, 16  ;;  %v727_v36 = vshll.u32 %v639_v23, 16  ;;  %v735_v51 = vshll.u32 %v640_v42, 16  ;;  %v3863_v58 = vld [vmem:[%s4314_s7 + $0x138] ss:$8 sps:$4 sm:$0xff]  }
  0xbf   : > { %v697_v28 = vrot.slane %v696_v20, 4  ;;  %v688_v33 = vsel %vm4371_vm4, %v683_v25, %v687_v10  ;;  %v715_v38 = vrot.slane %v713_v29, 5  ;;  %v741_v52 = vshll.u32 %v641_v46, 16  ;;  %v3864_v63 = vld [vmem:[%s4314_s7 + $0x148] ss:$8 sps:$4 sm:$0xff]  }
  0xc0   : > { %v720_v40 = vrot.slane %v718_v30, 4  ;;  %v723_v41 = vrot.slane %v721_v31, 5  ;;  %v746_v53 = vshrl.u32 %v642_v47, 16  ;;  %v749_v56 = vshll.u32 %v642_v47, 16  ;;  %v3026_v5 = vld [vmem:[%s4314_s7 + $0x120] sm:$0xf] }
  0xc1   : > { %v702_v37 = vsel %vm4371_vm4, %v697_v28, %v701_v15  ;;  %v755_v57 = vshll.u32 %v643_v50, 16  ;;  %v737_v60 = vrot.slane %v735_v51, 5  ;;  %v743_v0 = vrot.slane %v741_v52, 5  ;;  %v3027_v8 = vld [vmem:[%s4314_s7 + $0x124] sm:$0x1] }
  0xc2   : > { %3485 = vmatmul.mubr.msk.bf16.gmra.mrb[12].mxu1 %vm378_vm1, %v3860_v35  ;;  %3563 = vmatmul.mubr.msk.bf16.vlgmr.msra.gmra.mrb[0].mxu0 %vm378_vm1, %v3857_v45  ;;  %v709_v35 = vrot.slane %v707_v27, 5  ;;  %v3043_v43 = vcombine.low %v688_v33, %v702_v37  ;;  %v729_v45 = vrot.slane %v727_v36, 5  ;;  %v724_v49 = vor.u32 %v723_v41, %v720_v40  ;;  %v3028_v9 = vld [vmem:[%s4314_s7 + $0x128] sm:$0xf]  ;;  %v3029_v10 = vld [vmem:[%s4314_s7 + $0x12c] sm:$0x1] }
  0xc3   : > { %3579 = vmatpush3.bf16.msra.mxu0 %v2160_v34  ;;  %3566 = vmatprep.mubr.msk.bf16.mxu0 %vm378_vm1, %v3859_v48  ;;  %v706_v34 = vrot.slane %v704_v26, 4  ;;  %v732_v48 = vshrl.u32 %v640_v42, 16  ;;  %v748_v61 = vrot.slane %v746_v53, 4  ;;  %v751_v2 = vrot.slane %v749_v56, 5  ;;  %v3030_v22 = vld [vmem:[%s4314_s7 + $0x130] sm:$0xf] }
  0xc4   : > { %3490 = vmatprep.mubr.msk.bf16.mxu1 %vm378_vm1, %v3042_v24  ;;  %v725_v59 = vrot.slane %v724_v49, 4  ;;  %v757_v4 = vrot.slane %v755_v57, 5  ;;  %v776_v13 = vshrl.u32 %v3026_v5, 16  ;;  %v779_v14 = vshll.u32 %v3026_v5, 16  ;;  %v3031_v27 = vld [vmem:[%s4314_s7 + $0x134] sm:$0x1] }
  0xc5   : > { %v710_v44 = vor.u32 %v709_v35, %v706_v34  ;;  %v734_v55 = vrot.slane %v732_v48, 4  ;;  %v752_v12 = vor.u32 %v751_v2, %v748_v61  ;;  %v790_v17 = vshrl.u32 %v3028_v9, 16  ;;  %v3032_v31 = vld [vmem:[%s4314_s7 + $0x138] sm:$0xf]  ;;  %v2556_v48 = vld [vmem:[#allocation5 + $0x20] sm:$0xf] }
  0xc6   : > { %v730_v6 = vsel %vm4371_vm4, %v725_v59, %v729_v45  ;;  %v778_v19 = vrot.slane %v776_v13, 4  ;;  %v781_v20 = vrot.slane %v779_v14, 5  ;;  %v799_v21 = vshll.u32 %v3029_v10, 16  ;;  %v3865_v35 = vld [vmem:[%s4314_s7 + $0x158] ss:$8 sps:$4 sm:$0xff]   ;;  %3753 = vmatprep.subr.msk.bf16.mxu0 %vm403_vm0, %v2556_v48 }
  0xc7   : > { %v711_v54 = vrot.slane %v710_v44, 4  ;;  %v738_v7 = vor.u32 %v737_v60, %v734_v55  ;;  %v792_v25 = vrot.slane %v790_v17, 4  ;;  %v804_v33 = vshrl.u32 %v3030_v22, 16  ;;  %v3866_v41 = vld [vmem:[%s4314_s7 + $0x50] ss:$8 sps:$4 sm:$0xff]  }
  0xc8   : > { %v782_v29 = vor.u32 %v781_v20, %v778_v19  ;;  %v801_v30 = vrot.slane %v799_v21, 5  ;;  %v807_v37 = vshll.u32 %v3030_v22, 16  ;;  %v821_v44 = vshll.u32 %v3032_v31, 16  ;;  %v3034_v53 = vld [vmem:[%s4314_s7 + $0x140] sm:$0xf] }
  0xc9   : > { %v716_v62 = vsel %vm4371_vm4, %v711_v54, %v715_v38  ;;  %v739_v15 = vrot.slane %v738_v7, 4  ;;  %v813_v38 = vshll.u32 %v3031_v27, 16  ;;  %v806_v42 = vrot.slane %v804_v33, 4  ;;  %v3035_v57 = vld [vmem:[%s4314_s7 + $0x144] sm:$0x1] }
  0xca   : > { %3567 = vmatmul.mubr.msk.bf16.gmra.mrb[4].mxu0 %vm378_vm1, %v3861_v18  ;;  %3491 = vmatmul.mubr.msk.bf16.vlgmr.msra.gmra.mrb[0].mxu1 %vm378_vm1, %v3043_v43  ;;  %v3044_v11 = vcombine.low %v716_v62, %v730_v6  ;;  %v793_v18 = vshll.u32 %v3028_v9, 16  ;;  %v783_v40 = vrot.slane %v782_v29, 4  ;;  %v818_v43 = vshrl.u32 %v3032_v31, 16  ;;  %v3037_v62 = vld [vmem:[%s4314_s7 + $0x14c] sm:$0x1] }
  0xcb   : > { %3570 = vmatprep.mubr.msk.bf16.mxu0 %vm378_vm1, %v3862_v32  ;;  %3507 = vmatpush3.bf16.msra.mxu1 %v1138_v16  ;;  %v785_v16 = vshll.u32 %v3027_v8, 16  ;;  %v744_v23 = vsel %vm4371_vm4, %v739_v15, %v743_v0  ;;  %v3033_v32 = vld [vmem:[%s4314_s7 + $0x13c] sm:$0x1]  ;;  %v809_v46 = vrot.slane %v807_v37, 5  ;;  %v815_v50 = vrot.slane %v813_v38, 5 }
  0xcc   : > { %3749 = vmatprep.subr.msk.bf16.mxu1 %vm403_vm0, %v4328_v1  ;;  %3494 = vmatprep.mubr.msk.bf16.mxu1 %vm378_vm1, %v3044_v11  ;;  %v753_v1 = vrot.slane %v752_v12, 4  ;;  %v795_v26 = vrot.slane %v793_v18, 5  ;;  %v827_v47 = vshll.u32 %v3033_v32, 16  ;;  %v820_v51 = vrot.slane %v818_v43, 4  ;;  %v3867_v12 = vld [vmem:[%s4314_s7 + $0x60] ss:$8 sps:$4 sm:$0xff]  }
  0xcd   : > { %v787_v24 = vrot.slane %v785_v16, 5  ;;  %v823_v52 = vrot.slane %v821_v44, 5  ;;  %v810_v55 = vor.u32 %v809_v46, %v806_v42  ;;  %v832_v59 = vshrl.u32 %v3034_v53, 16  ;;  %v3038_v15 = vld [vmem:[%s4314_s7 + $0x150] sm:$0xf] }
  0xce   : > { %v758_v28 = vsel %vm4371_vm4, %v753_v1, %v757_v4  ;;  %v796_v36 = vor.u32 %v795_v26, %v792_v25  ;;  %v829_v56 = vrot.slane %v827_v47, 5  ;;  %v841_v0 = vshll.u32 %v3035_v57, 16  ;;  %v3039_v16 = vld [vmem:[%s4314_s7 + $0x154] sm:$0x1]  ;;  %v3040_v19 = vld [vmem:[%s4314_s7 + $0x158] sm:$0xf] }
  0xcf   : > { %v3045_v34 = vcombine.low %v744_v23, %v758_v28  ;;  %v788_v49 = vsel %vm4371_vm4, %v783_v40, %v787_v24  ;;  %v824_v61 = vor.u32 %v823_v52, %v820_v51  ;;  %v811_v2 = vrot.slane %v810_v55, 4  ;;  %v3041_v20 = vld [vmem:[%s4314_s7 + $0x15c] sm:$0x1]  ;;  %v3868_v27 = vld [vmem:[%s4314_s7 + $0x70] ss:$8 sps:$4 sm:$0xff]  }
  0xd0   : > { %v797_v45 = vrot.slane %v796_v36, 4  ;;  %v834_v4 = vrot.slane %v832_v59, 4  ;;  %v843_v9 = vrot.slane %v841_v0, 5  ;;  %v855_v10 = vshll.u32 %v3037_v62, 16  ;;  %v3869_v47 = vld [vmem:[%s4314_s7 + $0x80] ss:$8 sps:$4 sm:$0xff]  }
  0xd1   : > { %v825_v7 = vrot.slane %v824_v61, 4  ;;  %v816_v11 = vsel %vm4371_vm4, %v811_v2, %v815_v50  ;;  %v860_v21 = vshrl.u32 %v3038_v15, 16  ;;  %v863_v24 = vshll.u32 %v3038_v15, 16  ;;  %v3871_v51 = vld [vmem:[%s4314_s7 + $0x170] ss:$8 sps:$4 sm:$0xff]  }
  0xd2   : > { %3571 = vmatmul.mubr.msk.bf16.gmra.mrb[8].mxu0 %vm378_vm1, %v3863_v58  ;;  %3495 = vmatmul.mubr.msk.bf16.gmra.mrb[4].mxu1 %vm378_vm1, %v3045_v34  ;;  %v802_v54 = vsel %vm4371_vm4, %v797_v45, %v801_v30  ;;  %v3036_v58 = vld [vmem:[%s4314_s7 + $0x148] sm:$0xf]  ;;  %v857_v1 = vrot.slane %v855_v10, 5  ;;  %v869_v25 = vshll.u32 %v3039_v16, 16  ;;  %v874_v29 = vshrl.u32 %v3040_v19, 16 }
  0xd3   : > { %3574 = vmatprep.mubr.msk.bf16.mxu0 %vm378_vm1, %v3864_v63  ;;  %v3046_v60 = vcombine.low %v788_v49, %v802_v54  ;;  %v835_v63 = vshll.u32 %v3034_v53, 16  ;;  %v846_v5 = vshrl.u32 %v3036_v58, 16  ;;  %v849_v6 = vshll.u32 %v3036_v58, 16  ;;  %v3870_v49 = vld [vmem:[%s4314_s7 + $0x90] ss:$8 sps:$4 sm:$0xff]  }
  0xd4   : > { %v830_v17 = vsel %vm4371_vm4, %v825_v7, %v829_v56  ;;  %v862_v28 = vrot.slane %v860_v21, 4  ;;  %v877_v30 = vshll.u32 %v3040_v19, 16  ;;  %v2582_v31 = vsel %vm403_vm0, %v2556_v48, 0  ;;  %v3234_v53 = vld [vmem:[%s4314_s7 + $0x8] sm:$0xf] }
  0xd5   : > { %3498 = vmatprep.mubr.msk.bf16.mxu1 %vm378_vm1, %v3046_v60  ;;  %v837_v8 = vrot.slane %v835_v63, 5  ;;  %v848_v13 = vrot.slane %v846_v5, 4  ;;  %v851_v14 = vrot.slane %v849_v6, 5  ;;  %v3047_v22 = vcombine.low %v816_v11, %v830_v17  ;;  %v3235_v54 = vld [vmem:[%s4314_s7 + $0xc] sm:$0x1] }
  0xd6   : > { %v865_v33 = vrot.slane %v863_v24, 5  ;;  %v883_v34 = vshll.u32 %v3041_v20, 16  ;;  %v876_v36 = vrot.slane %v874_v29, 4  ;;  %v879_v37 = vrot.slane %v877_v30, 5  ;;  %v3236_v55 = vld [vmem:[%s4314_s7 + $0x10] sm:$0xf] }
  0xd7   : > { %v838_v18 = vor.u32 %v837_v8, %v834_v4  ;;  %v852_v23 = vor.u32 %v851_v14, %v848_v13  ;;  %v3872_v56 = vld [vmem:[%s4314_s7 + $0xa0] ss:$8 sps:$4 sm:$0xff]   ;;  %v3237_v58 = vld [vmem:[%s4314_s7 + $0x14] sm:$0x1]  ;;  %v2292_v59 = vshrl.u32 %v3234_v53, 16  ;;  %v2295_v60 = vshll.u32 %v3234_v53, 16 }
  0xd8   : > { %v866_v40 = vor.u32 %v865_v33, %v862_v28  ;;  %v880_v43 = vor.u32 %v879_v37, %v876_v36  ;;  %v885_v44 = vrot.slane %v883_v34, 5  ;;  %v3873_v57 = vld [vmem:[%s4314_s7 + $0x180] ss:$8 sps:$4 sm:$0xff]   ;;  %v2301_v61 = vshll.u32 %v3235_v54, 16  ;;  %v3874_v63 = vld [vmem:[%s4314_s7 + $0xb0] ss:$8 sps:$4 sm:$0xff]  }
  0xd9   : > { %v839_v26 = vrot.slane %v838_v18, 4  ;;  %v853_v32 = vrot.slane %v852_v23, 4  ;;  %v2306_v62 = vshrl.u32 %v3236_v55, 16  ;;  %v2309_v0 = vshll.u32 %v3236_v55, 16  ;;  %v3875_v4 = vld [vmem:[%s4314_s7 + $0x190] ss:$8 sps:$4 sm:$0xff]  }
  0xda   : > { %3575 = vmatmul.mubr.msk.bf16.gmra.mrb[12].mxu0 %vm378_vm1, %v3865_v35  ;;  %3499 = vmatmul.mubr.msk.bf16.gmra.mrb[8].mxu1 %vm378_vm1, %v3047_v22  ;;  %v867_v45 = vrot.slane %v866_v40, 4  ;;  %v881_v46 = vrot.slane %v880_v43, 4  ;;  %v2315_v2 = vshll.u32 %v3237_v58, 16  ;;  %v2294_v5 = vrot.slane %v2292_v59, 4  ;;  %v3238_v11 = vld [vmem:[%s4314_s7 + $0x18] sm:$0xf] }
  0xdb   : > { %3580 = vmatprep.mubr.msk.bf16.mxu0 %vm378_vm1, %v3866_v41  ;;  %v844_v35 = vsel %vm4371_vm4, %v839_v26, %v843_v9  ;;  %v858_v38 = vsel %vm4371_vm4, %v853_v32, %v857_v1  ;;  %v871_v41 = vrot.slane %v869_v25, 5  ;;  %v2297_v6 = vrot.slane %v2295_v60, 5  ;;  %v3240_v14 = vld [vmem:[%s4314_s7 + $0x20] sm:$0xf]  ;;  %v3241_v15 = vld [vmem:[%s4314_s7 + $0x24] sm:$0x1] }
  0xdc   : > { %v3048_v42 = vcombine.low %v844_v35, %v858_v38  ;;  %v886_v50 = vsel %vm4371_vm4, %v881_v46, %v885_v44  ;;  %v2303_v7 = vrot.slane %v2301_v61, 5  ;;  %v2308_v8 = vrot.slane %v2306_v62, 4  ;;  %v3876_v28 = vld [vmem:[%s4314_s7 + $0xc0] ss:$8 sps:$4 sm:$0xff]   ;;  %v3243_v35 = vld [vmem:[%s4314_s7 + $0x2c] sm:$0x1] }
  0xdd   : > { %v872_v48 = vsel %vm4371_vm4, %v867_v45, %v871_v41  ;;  %v2311_v9 = vrot.slane %v2309_v0, 5  ;;  %v2317_v10 = vrot.slane %v2315_v2, 5  ;;  %v2298_v13 = vor.u32 %v2297_v6, %v2294_v5  ;;  %v3877_v29 = vld [vmem:[%s4314_s7 + $0x1a0] ss:$8 sps:$4 sm:$0xff]   ;;  %v3244_v38 = vld [vmem:[%s4314_s7 + $0x30] sm:$0xf] }
  0xde   : > { %3502 = vmatprep.mubr.msk.bf16.mxu1 %vm378_vm1, %v3048_v42  ;;  %v3049_v52 = vcombine.low %v872_v48, %v886_v50  ;;  %v2320_v16 = vshrl.u32 %v3238_v11, 16  ;;  %v2323_v17 = vshll.u32 %v3238_v11, 16  ;;  %v2334_v19 = vshrl.u32 %v3240_v14, 16  ;;  %v3242_v34 = vld [vmem:[%s4314_s7 + $0x28] sm:$0xf] }
  0xdf   : > { %v2312_v18 = vor.u32 %v2311_v9, %v2308_v8  ;;  %v2337_v20 = vshll.u32 %v3240_v14, 16  ;;  %v2299_v21 = vrot.slane %v2298_v13, 4  ;;  %v2343_v24 = vshll.u32 %v3241_v15, 16  ;;  %v3245_v40 = vld [vmem:[%s4314_s7 + $0x34] sm:$0x1] }
  0xe0   : > { %v2322_v22 = vrot.slane %v2320_v16, 4  ;;  %v2325_v23 = vrot.slane %v2323_v17, 5  ;;  %v2336_v26 = vrot.slane %v2334_v19, 4  ;;  %v2348_v41 = vshrl.u32 %v3242_v34, 16  ;;  %v3248_v61 = vld [vmem:[%s4314_s7 + $0x40] sm:$0xf] }
  0xe1   : > { %v2313_v25 = vrot.slane %v2312_v18, 4  ;;  %v2304_v30 = vsel %vm4371_vm4, %v2299_v21, %v2303_v7  ;;  %v2345_v33 = vrot.slane %v2343_v24, 5  ;;  %v2351_v42 = vshll.u32 %v3242_v34, 16  ;;  %v3249_v62 = vld [vmem:[%s4314_s7 + $0x44] sm:$0x1] }
  0xe2   : > { %3581 = vmatmul.mubr.msk.bf16.vlgmr.msra.gmra.mrb[0].mxu0 %vm378_vm1, %v3867_v12  ;;  %3503 = vmatmul.mubr.msk.bf16.gmra.mrb[12].mxu1 %vm378_vm1, %v3049_v52  ;;  %v3239_v12 = vld [vmem:[%s4314_s7 + $0x1c] sm:$0x1]  ;;  %v2357_v45 = vshll.u32 %v3243_v35, 16  ;;  %v2362_v46 = vshrl.u32 %v3244_v38, 16  ;;  %v2350_v48 = vrot.slane %v2348_v41, 4  ;;  %v2365_v50 = vshll.u32 %v3244_v38, 16 }
  0xe3   : > { %3597 = vmatpush3.bf16.msra.mxu0 %v2582_v31  ;;  %3584 = vmatprep.mubr.msk.bf16.mxu0 %vm378_vm1, %v3868_v27  ;;  %v2329_v1 = vshll.u32 %v3239_v12, 16  ;;  %v2339_v27 = vrot.slane %v2337_v20, 5  ;;  %v2326_v31 = vor.u32 %v2325_v23, %v2322_v22  ;;  %v2318_v36 = vsel %vm4371_vm4, %v2313_v25, %v2317_v10  ;;  %v3879_v10 = vld [vmem:[%s4314_s7 + $0x1c0] ss:$8 sps:$4 sm:$0xff]   ;;  %v3880_v12 = vld [vmem:[%s4314_s7 + $0x1d0] ss:$8 sps:$4 sm:$0xff]  }
  0xe4   : > { %3508 = vmatprep.mubr.msk.bf16.mxu1 %vm378_vm1, %v3870_v49  ;;  %v3266_v43 = vcombine.low %v2304_v30, %v2318_v36  ;;  %v2353_v49 = vrot.slane %v2351_v42, 5  ;;  %v2371_v52 = vshll.u32 %v3245_v40, 16  ;;  %v2359_v54 = vrot.slane %v2357_v45, 5  ;;  %v3250_v19 = vld [vmem:[%s4314_s7 + $0x128] sm:$0xf] }
  0xe5   : > { %v2331_v32 = vrot.slane %v2329_v1, 5  ;;  %v2340_v37 = vor.u32 %v2339_v27, %v2336_v26  ;;  %v2327_v44 = vrot.slane %v2326_v31, 4  ;;  %v2367_v55 = vrot.slane %v2365_v50, 5  ;;  %v3251_v22 = vld [vmem:[%s4314_s7 + $0x12c] sm:$0x1] }
  0xe6   : > { %v2354_v53 = vor.u32 %v2353_v49, %v2350_v48  ;;  %v2373_v60 = vrot.slane %v2371_v52, 5  ;;  %v2390_v7 = vshrl.u32 %v3248_v61, 16  ;;  %v2393_v8 = vshll.u32 %v3248_v61, 16  ;;  %v3252_v23 = vld [vmem:[%s4314_s7 + $0x130] sm:$0xf] }
  0xe7   : > { %v2332_v58 = vsel %vm4371_vm4, %v2327_v44, %v2331_v32  ;;  %v2399_v9 = vshll.u32 %v3249_v62, 16  ;;  %v3253_v24 = vld [vmem:[%s4314_s7 + $0x134] sm:$0x1]  ;;  %v2420_v27 = vshrl.u32 %v3250_v19, 16  ;;  %v2429_v30 = vshll.u32 %v3251_v22, 16 }
  0xe8   : > { %v2355_v0 = vrot.slane %v2354_v53, 4  ;;  %v2392_v17 = vrot.slane %v2390_v7, 4  ;;  %v2395_v18 = vrot.slane %v2393_v8, 5  ;;  %v2434_v31 = vshrl.u32 %v3252_v23, 16  ;;  %v3254_v36 = vld [vmem:[%s4314_s7 + $0x138] sm:$0xf] }
  0xe9   : > { %v2401_v1 = vrot.slane %v2399_v9, 5  ;;  %v2437_v32 = vshll.u32 %v3252_v23, 16  ;;  %v2422_v34 = vrot.slane %v2420_v27, 4  ;;  %v2431_v38 = vrot.slane %v2429_v30, 5  ;;  %v3255_v42 = vld [vmem:[%s4314_s7 + $0x13c] sm:$0x1] }
  0xea   : > { %3585 = vmatmul.mubr.msk.bf16.gmra.mrb[4].mxu0 %vm378_vm1, %v3869_v47  ;;  %3509 = vmatmul.mubr.msk.bf16.vlgmr.msra.gmra.mrb[0].mxu1 %vm378_vm1, %v3872_v56  ;;  %v2341_v47 = vrot.slane %v2340_v37, 4  ;;  %v3246_v56 = vld [vmem:[%s4314_s7 + $0x38] sm:$0xf]  ;;  %v2360_v13 = vsel %vm4371_vm4, %v2355_v0, %v2359_v54  ;;  %v2396_v26 = vor.u32 %v2395_v18, %v2392_v17  ;;  %v2436_v40 = vrot.slane %v2434_v31, 4  ;;  %v3257_v48 = vld [vmem:[%s4314_s7 + $0x144] sm:$0x1] }
  0xeb   : > { %3588 = vmatprep.mubr.msk.bf16.mxu0 %vm378_vm1, %v3871_v51  ;;  %3615 = vmatpush3.bf16.msra.mxu1 %v4336_v3  ;;  %v3878_v3 = vld [vmem:[%s4314_s7 + $0x1b0] ss:$8 sps:$4 sm:$0xff]   ;;  %v2364_v51 = vrot.slane %v2362_v46, 4  ;;  %v2439_v41 = vrot.slane %v2437_v32, 5  ;;  %v2448_v49 = vshrl.u32 %v3254_v36, 16  ;;  %v2451_v52 = vshll.u32 %v3254_v36, 16 }
  0xec   : > { %3512 = vmatprep.mubr.msk.bf16.mxu1 %vm378_vm1, %v3874_v63  ;;  %v2346_v59 = vsel %vm4371_vm4, %v2341_v47, %v2345_v33  ;;  %v2376_v63 = vshrl.u32 %v3246_v56, 16  ;;  %v2397_v33 = vrot.slane %v2396_v26, 4  ;;  %v3256_v47 = vld [vmem:[%s4314_s7 + $0x140] sm:$0xf]  ;;  %v2457_v53 = vshll.u32 %v3255_v42, 16 }
  0xed   : > { %v2368_v2 = vor.u32 %v2367_v55, %v2364_v51  ;;  %v3267_v11 = vcombine.low %v2332_v58, %v2346_v59  ;;  %v2440_v51 = vor.u32 %v2439_v41, %v2436_v40  ;;  %v3882_v54 = vld [vmem:[%s4314_s7 + $0x1f8] ss:$8 sps:$4 sm:$0xff]   ;;  %v2465_v58 = vshll.u32 %v3256_v47, 16  ;;  %v3263_v23 = vld [vmem:[%s4314_s7 + $0x15c] sm:$0x1] }
  0xee   : > { %v2378_v6 = vrot.slane %v2376_v63, 4  ;;  %v2402_v44 = vsel %vm4371_vm4, %v2397_v33, %v2401_v1  ;;  %v2459_v61 = vrot.slane %v2457_v53, 5  ;;  %v2471_v62 = vshll.u32 %v3257_v48, 16  ;;  %v3258_v63 = vld [vmem:[%s4314_s7 + $0x148] sm:$0xf] }
  0xef   : > { %v2369_v14 = vrot.slane %v2368_v2, 4  ;;  %v2441_v59 = vrot.slane %v2440_v51, 4  ;;  %v3265_v33 = vld [vmem:[%s4314_s7 + $0x164] sm:$0x1] }
  0xf0   : > { %v2473_v9 = vrot.slane %v2471_v62, 5 }
  0xf1   : > { %v2374_v20 = vsel %vm4371_vm4, %v2369_v14, %v2373_v60  ;;  %v2453_v60 = vrot.slane %v2451_v52, 5  ;;  %v2479_v14 = vshll.u32 %v3258_v63, 16 }
  0xf2   : > { %3589 = vmatmul.mubr.msk.bf16.gmra.mrb[8].mxu0 %vm378_vm1, %v3873_v57  ;;  %v3247_v57 = vld [vmem:[%s4314_s7 + $0x3c] sm:$0x1]  ;;  %3513 = vmatmul.mubr.msk.bf16.gmra.mrb[4].mxu1 %vm378_vm1, %v3876_v28  ;;  %v3268_v25 = vcombine.low %v2360_v13, %v2374_v20  ;;  %v2423_v28 = vshll.u32 %v3250_v19, 16  ;;  %v3262_v19 = vld [vmem:[%s4314_s7 + $0x158] sm:$0xf] }
  0xf3   : > { %3592 = vmatprep.mubr.msk.bf16.mxu0 %vm378_vm1, %v3875_v4  ;;  %3516 = vmatprep.mubr.msk.bf16.mxu1 %vm378_vm1, %v3878_v3  ;;  %v2379_v4 = vshll.u32 %v3246_v56, 16  ;;  %v2385_v5 = vshll.u32 %v3247_v57, 16  ;;  %v2443_v3 = vshll.u32 %v3253_v24, 16  ;;  %v2450_v56 = vrot.slane %v2448_v49, 4 }
  0xf4   : > { %v2425_v35 = vrot.slane %v2423_v28, 5  ;;  %v2462_v57 = vshrl.u32 %v3256_v47, 16  ;;  %v3264_v28 = vld [vmem:[%s4314_s7 + $0x160] sm:$0xf] }
  0xf5   : > { %v2381_v15 = vrot.slane %v2379_v4, 5  ;;  %v2387_v16 = vrot.slane %v2385_v5, 5  ;;  %v2445_v46 = vrot.slane %v2443_v3, 5  ;;  %v2467_v4 = vrot.slane %v2465_v58, 5  ;;  %v3259_v5 = vld [vmem:[%s4314_s7 + $0x14c] sm:$0x1] }
  0xf6   : > { %v2426_v45 = vor.u32 %v2425_v35, %v2422_v34  ;;  %v2464_v2 = vrot.slane %v2462_v57, 4  ;;  %v2454_v8 = vor.u32 %v2453_v60, %v2450_v56  ;;  %v2504_v34 = vshrl.u32 %v3262_v19, 16  ;;  %v3884_v3 = vld [vmem:[%s4314_s7 + $0x218] ss:$8 sps:$4 sm:$0xff]   ;;  %v3885_v57 = vld [vmem:[%s4314_s7 + $0x228] ss:$8 sps:$4 sm:$0xff]  }
  0xf7   : > { %v2382_v21 = vor.u32 %v2381_v15, %v2378_v6  ;;  %v3260_v6 = vld [vmem:[%s4314_s7 + $0x150] sm:$0xf]  ;;  %v2446_v7 = vsel %vm4371_vm4, %v2441_v59, %v2445_v46  ;;  %v2485_v15 = vshll.u32 %v3259_v5, 16  ;;  %v2518_v42 = vshrl.u32 %v3264_v28, 16 }
  0xf8   : > { %v2427_v55 = vrot.slane %v2426_v45, 4  ;;  %v2468_v13 = vor.u32 %v2467_v4, %v2464_v2  ;;  %v2490_v18 = vshrl.u32 %v3260_v6, 16  ;;  %v2493_v1 = vshll.u32 %v3260_v6, 16 }
  0xf9   : > { %v2506_v41 = vrot.slane %v2504_v34, 4  ;;  %v2527_v46 = vshll.u32 %v3265_v33, 16  ;;  %v2520_v48 = vrot.slane %v2518_v42, 4 }
  0xfa   : > { %3593 = vmatmul.mubr.msk.bf16.gmra.mrb[12].mxu0 %vm378_vm1, %v3877_v29  ;;  %v2383_v29 = vrot.slane %v2382_v21, 4  ;;  %3517 = vmatmul.mubr.msk.bf16.gmra.mrb[8].mxu1 %vm378_vm1, %v3879_v10  ;;  %v2432_v0 = vsel %vm4371_vm4, %v2427_v55, %v2431_v38  ;;  %v3261_v10 = vld [vmem:[%s4314_s7 + $0x154] sm:$0x1]  ;;  %v2469_v20 = vrot.slane %v2468_v13, 4  ;;  %v2481_v21 = vrot.slane %v2479_v14, 5 }
  0xfb   : > { %3598 = vmatprep.mubr.msk.bf16.mxu0 %vm378_vm1, %v3266_v43  ;;  %3520 = vmatprep.mubr.msk.bf16.mxu1 %vm378_vm1, %v3880_v12  ;;  %v3881_v43 = vld [vmem:[%s4314_s7 + $0x1e0] ss:$8 sps:$4 sm:$0xff]   ;;  %v3270_v12 = vcombine.low %v2432_v0, %v2446_v7  ;;  %v2499_v22 = vshll.u32 %v3261_v10, 16  ;;  %v2492_v26 = vrot.slane %v2490_v18, 4  ;;  %v2495_v27 = vrot.slane %v2493_v1, 5 }
  0xfc   : > { %v2388_v37 = vsel %vm4371_vm4, %v2383_v29, %v2387_v16  ;;  %v2455_v16 = vrot.slane %v2454_v8, 4  ;;  %v3883_v29 = vld [vmem:[%s4314_s7 + $0x208] ss:$8 sps:$4 sm:$0xff]   ;;  %v2474_v30 = vsel %vm4371_vm4, %v2469_v20, %v2473_v9  ;;  %v2513_v38 = vshll.u32 %v3263_v23, 16  ;;  %v4673_v9 = vld [vmem:[#allocation7] ss:$0 sm:$0xff] }
  0xfd   : > { %v3269_v50 = vcombine.low %v2388_v37, %v2402_v44  ;;  %v2501_v32 = vrot.slane %v2499_v22, 5  ;;  %v2496_v36 = vor.u32 %v2495_v27, %v2492_v26  ;;  %v2507_v37 = vshll.u32 %v3262_v19, 16 }
  0xfe   : > { %v2460_v24 = vsel %vm4371_vm4, %v2455_v16, %v2459_v61  ;;  %v2515_v52 = vrot.slane %v2513_v38, 5  ;;  %v2529_v55 = vrot.slane %v2527_v46, 5 }
  0xff   : > { %v3271_v35 = vcombine.low %v2460_v24, %v2474_v30  ;;  %v2497_v44 = vrot.slane %v2496_v36, 4  ;;  %v2509_v45 = vrot.slane %v2507_v37, 5 }
 0x101   : > { %v2510_v51 = vor.u32 %v2509_v45, %v2506_v41 }
 0x102   : > { %3599 = vmatmul.mubr.msk.bf16.vlgmr.msra.gmra.mrb[0].mxu0 %vm378_vm1, %v3267_v11  ;;  %v2476_v11 = vshrl.u32 %v3258_v63, 16  ;;  %3521 = vmatmul.mubr.msk.bf16.gmra.mrb[12].mxu1 %vm378_vm1, %v3881_v43  ;;  %v2521_v43 = vshll.u32 %v3264_v28, 16 }
 0x103   : > { %3602 = vmatprep.mubr.msk.bf16.mxu0 %vm378_vm1, %v3268_v25  ;;  %3534 = vmatprep.mubr.msk.bf16.mxu1 %vm378_vm1, %v3882_v54  ;;  %v2487_v25 = vrot.slane %v2485_v15, 5  ;;  %v2511_v56 = vrot.slane %v2510_v51, 4 }
 0x104   : > { %v2478_v17 = vrot.slane %v2476_v11, 4  ;;  %v2523_v49 = vrot.slane %v2521_v43, 5  ;;  %v4675_v11 = vld [vmem:[#allocation8] ss:$0 sm:$0xff] }
 0x105   : > { %v2516_v59 = vsel %vm4371_vm4, %v2511_v56, %v2515_v52 }
 0x106   : > { %v2482_v31 = vor.u32 %v2481_v21, %v2478_v17  ;;  %v2524_v54 = vor.u32 %v2523_v49, %v2520_v48 }
 0x108   : > { %v2483_v40 = vrot.slane %v2482_v31, 4  ;;  %v2525_v58 = vrot.slane %v2524_v54, 4 }
 0x10a   : > { %3603 = vmatmul.mubr.msk.bf16.gmra.mrb[4].mxu0 %vm378_vm1, %v3269_v50  ;;  %3535 = vmatmul.mubr.msk.bf16.vlgmr.msra.gmra.mrb[8].mxu1 %vm378_vm1, %v3883_v29  ;;  %v2488_v47 = vsel %vm4371_vm4, %v2483_v40, %v2487_v25  ;;  %v2502_v50 = vsel %vm4371_vm4, %v2497_v44, %v2501_v32  ;;  %v2530_v60 = vsel %vm4371_vm4, %v2525_v58, %v2529_v55 }
 0x10b   : > { %3606 = vmatprep.mubr.msk.bf16.mxu0 %vm378_vm1, %v3270_v12  ;;  %3538 = vmatprep.mubr.msk.bf16.mxu1 %vm378_vm1, %v3884_v3  ;;  %v3272_v53 = vcombine.low %v2488_v47, %v2502_v50  ;;  %v3273_v61 = vcombine.low %v2516_v59, %v2530_v60 }
 0x112   : > { %3607 = vmatmul.mubr.msk.bf16.gmra.mrb[8].mxu0 %vm378_vm1, %v3271_v35  ;;  %3539 = vmatmul.mubr.msk.bf16.gmra.mrb[12].mxu1 %vm378_vm1, %v3885_v57 }
 0x113   : > { %3610 = vmatprep.mubr.msk.bf16.mxu0 %vm378_vm1, %v3272_v53 }
 0x11a   : > { %3611 = vmatmul.mubr.msk.bf16.gmra.mrb[12].mxu0 %vm378_vm1, %v3273_v61 }
 0x1bd   : > { %v3510_v62 = vpop.f32.mrb[0].mxu1 }
 0x1be   : > { %v1174_v63 = vpop.f32.mrb[1].mxu1 }
 0x1bf   : > { %v3511_v0 = vpop.f32.mrb[2].mxu1 }
 0x1c0   : > { %v1177_v2 = vpop.f32.mrb[3].mxu1 }
 0x1c5   : > { %v3514_v4 = vpop.f32.mrb[4].mxu1 }
 0x1c6   : > { %v1190_v5 = vpop.f32.mrb[5].mxu1 }
 0x1c7   : > { %v3515_v6 = vpop.f32.mrb[6].mxu1 }
 0x1c8   : > { %v1193_v7 = vpop.f32.mrb[7].mxu1 }
 0x1d5   : > { %v3600_v8 = vpop.f32.mrb[0].mxu0 }
 0x1d6   : > { %v3616_v10 = vadd.f32 %v3600_v8, %v3510_v62  ;;  %v2618_v39 = vpop.f32.mrb[1].mxu0 }
 0x1d7   : > { %v3617_v12 = vadd.f32 %v2618_v39, %v1174_v63  ;;  %v3601_v13 = vpop.f32.mrb[2].mxu0 }
 0x1d8   : > { %v2706_v14 = vmul.f32 %v3616_v10, %v4673_v9  ;;  %v3618_v15 = vadd.f32 %v3601_v13, %v3511_v0  ;;  %v2621_v16 = vpop.f32.mrb[3].mxu0 }
 0x1d9   : > { %v2704_v17 = vmul.f32 %v3617_v12, %v4673_v9  ;;  %v3619_v18 = vadd.f32 %v2621_v16, %v1177_v2 }
 0x1da   : > { %v2729_v1 = vadd.f32 %v4675_v11, %v2706_v14  ;;  %v2707_v19 = vmul.f32 %v3618_v15, %v4673_v9 }
 0x1db   : > { %v2727_v20 = vadd.f32 %v4675_v11, %v2704_v17  ;;  %v2705_v21 = vmul.f32 %v3619_v18, %v4673_v9 }
 0x1dc   : > { %v2730_v22 = vadd.f32 %v4675_v11, %v2707_v19  ;;  %v2745_v25 = vmax.f32 %v2729_v1, 0.0 }
 0x1dd   : > { %v2728_v23 = vadd.f32 %v4675_v11, %v2705_v21  ;;  %v3604_v24 = vpop.f32.mrb[4].mxu0  ;;  %v2743_v29 = vmax.f32 %v2727_v20, 0.0  ;;  %v3536_v46 = vpop.f32.mrb[8].mxu1 }
 0x1de   : > { %v2746_v26 = vmax.f32 %v2730_v22, 0.0  ;;  %v3620_v27 = vadd.f32 %v3604_v24, %v3514_v4  ;;  %v2634_v28 = vpop.f32.mrb[5].mxu0  ;;  %v1406_v51 = vpop.f32.mrb[9].mxu1 }
 0x1df   : > { %v2744_v30 = vmax.f32 %v2728_v23, 0.0  ;;  %v3621_v31 = vadd.f32 %v2634_v28, %v1190_v5  ;;  %v3605_v32 = vpop.f32.mrb[6].mxu0  ;;  %v3537_v56 = vpop.f32.mrb[10].mxu1 }
 0x1e0   : > { %v3332_v33 = vpack.c.bf16 %v2746_v26, %v2745_v25  ;;  %v2710_v34 = vmul.f32 %v3620_v27, %v4673_v9  ;;  %v3622_v35 = vadd.f32 %v3605_v32, %v3515_v6  ;;  %v2637_v3 = vpop.f32.mrb[7].mxu0  ;;  %v1409_v61 = vpop.f32.mrb[11].mxu1 }
 0x1e1   : > { %v3327_v36 = vpack.c.bf16 %v2744_v30, %v2743_v29  ;;  %v2708_v37 = vmul.f32 %v3621_v31, %v4673_v9  ;;  %v3623_v38 = vadd.f32 %v2637_v3, %v1193_v7 }
 0x1e2   : > { %3364 = vst [vmem:[%s4688_s23 + $0x8] sm:$0xff] %v3332_v33   ;;  %v2733_v40 = vadd.f32 %v4675_v11, %v2710_v34  ;;  %v2711_v41 = vmul.f32 %v3622_v35, %v4673_v9 }
 0x1e3   : > { %3328 = vst [vmem:[%s4688_s23] sm:$0xff] %v3327_v36   ;;  %v2731_v42 = vadd.f32 %v4675_v11, %v2708_v37  ;;  %v2709_v43 = vmul.f32 %v3623_v38, %v4673_v9 }
 0x1e4   : > { %v2734_v44 = vadd.f32 %v4675_v11, %v2711_v41  ;;  %v2749_v48 = vmax.f32 %v2733_v40, 0.0 }
 0x1e5   : > { %v2732_v45 = vadd.f32 %v4675_v11, %v2709_v43  ;;  %v3608_v47 = vpop.f32.mrb[8].mxu0  ;;  %v2747_v53 = vmax.f32 %v2731_v42, 0.0  ;;  %v3540_v39 = vpop.f32.mrb[12].mxu1 }
 0x1e6   : > { %v2750_v49 = vmax.f32 %v2734_v44, 0.0  ;;  %v3624_v50 = vadd.f32 %v3608_v47, %v3536_v46  ;;  %v2650_v52 = vpop.f32.mrb[9].mxu0  ;;  %v1422_v15 = vpop.f32.mrb[13].mxu1 }
 0x1e7   : > { %v2748_v54 = vmax.f32 %v2732_v45, 0.0  ;;  %v3625_v55 = vadd.f32 %v2650_v52, %v1406_v51  ;;  %v3609_v57 = vpop.f32.mrb[10].mxu0  ;;  %v3541_v19 = vpop.f32.mrb[14].mxu1 }
 0x1e8   : > { %v3342_v58 = vpack.c.bf16 %v2750_v49, %v2749_v48  ;;  %v2714_v59 = vmul.f32 %v3624_v50, %v4673_v9  ;;  %v3626_v60 = vadd.f32 %v3609_v57, %v3537_v56  ;;  %v2653_v62 = vpop.f32.mrb[11].mxu0  ;;  %v1425_v23 = vpop.f32.mrb[15].mxu1 }
 0x1e9   : > { %v3337_v63 = vpack.c.bf16 %v2748_v54, %v2747_v53  ;;  %v2712_v0 = vmul.f32 %v3625_v55, %v4673_v9  ;;  %v3627_v2 = vadd.f32 %v2653_v62, %v1409_v61 }
 0x1ea   : > { %3366 = vst [vmem:[%s4688_s23 + $0x18] sm:$0xff] %v3342_v58   ;;  %v2737_v4 = vadd.f32 %v4675_v11, %v2714_v59  ;;  %v2715_v5 = vmul.f32 %v3626_v60, %v4673_v9 }
 0x1eb   : > { %3365 = vst [vmem:[%s4688_s23 + $0x10] sm:$0xff] %v3337_v63   ;;  %v2735_v6 = vadd.f32 %v4675_v11, %v2712_v0  ;;  %v2713_v7 = vmul.f32 %v3627_v2, %v4673_v9 }
 0x1ec   : > { %v2738_v8 = vadd.f32 %v4675_v11, %v2715_v5  ;;  %v2753_v12 = vmax.f32 %v2737_v4, 0.0 }
 0x1ed   : > { %v2736_v10 = vadd.f32 %v4675_v11, %v2713_v7  ;;  %v3612_v14 = vpop.f32.mrb[12].mxu0  ;;  %v2751_v16 = vmax.f32 %v2735_v6, 0.0 }
 0x1ee   : > { %v2754_v13 = vmax.f32 %v2738_v8, 0.0  ;;  %v3628_v18 = vadd.f32 %v3612_v14, %v3540_v39  ;;  %v2666_v1 = vpop.f32.mrb[13].mxu0 }
 0x1ef   : > { %v2752_v17 = vmax.f32 %v2736_v10, 0.0  ;;  %v3629_v21 = vadd.f32 %v2666_v1, %v1422_v15  ;;  %v3613_v22 = vpop.f32.mrb[14].mxu0 }
 0x1f0   : > { %v3352_v20 = vpack.c.bf16 %v2754_v13, %v2753_v12  ;;  %v2718_v25 = vmul.f32 %v3628_v18, %v4673_v9  ;;  %v3630_v26 = vadd.f32 %v3613_v22, %v3541_v19  ;;  %v2669_v27 = vpop.f32.mrb[15].mxu0 }
 0x1f1   : > { %v3347_v24 = vpack.c.bf16 %v2752_v17, %v2751_v16  ;;  %v2716_v28 = vmul.f32 %v3629_v21, %v4673_v9  ;;  %v3631_v29 = vadd.f32 %v2669_v27, %v1425_v23 }
 0x1f2   : > { %3368 = vst [vmem:[%s4688_s23 + $0x28] sm:$0xff] %v3352_v20   ;;  %v2741_v30 = vadd.f32 %v4675_v11, %v2718_v25  ;;  %v2719_v31 = vmul.f32 %v3630_v26, %v4673_v9 }
 0x1f3   : > { %3367 = vst [vmem:[%s4688_s23 + $0x20] sm:$0xff] %v3347_v24   ;;  %v2739_v32 = vadd.f32 %v4675_v11, %v2716_v28  ;;  %v2717_v33 = vmul.f32 %v3631_v29, %v4673_v9 }
 0x1f4   : > { %v2742_v34 = vadd.f32 %v4675_v11, %v2719_v31  ;;  %v2757_v3 = vmax.f32 %v2741_v30, 0.0 }
 0x1f5   : > { %v2740_v35 = vadd.f32 %v4675_v11, %v2717_v33  ;;  %v2755_v37 = vmax.f32 %v2739_v32, 0.0 }
 0x1f6   : > { %v2758_v36 = vmax.f32 %v2742_v34, 0.0 }
 0x1f7   : > { %v2756_v38 = vmax.f32 %v2740_v35, 0.0 }
 0x1f8   : > { %v3362_v40 = vpack.c.bf16 %v2758_v36, %v2757_v3 }
 0x1f9   : > { %v3357_v9 = vpack.c.bf16 %v2756_v38, %v2755_v37 }
 0x1fa   : > { %3370 = vst [vmem:[%s4688_s23 + $0x38] sm:$0xff] %v3362_v40  }
 0x1fb   : > { %3369 = vst [vmem:[%s4688_s23 + $0x30] sm:$0xff] %v3357_v9  }
 0x1fc   : > { %4013 = shalt.err (!%p4010_p4)
}
 0x1fd   : > { %s4014_s11 = scalar_lea.hbm %s4723_s28, 1024  ;;  %s4018_s5 = scalar_lea.hbm %s4775_s4, 2048 }
 0x1fe   : > { %p4015_p9 = scmp.ne.s32.totalorder %s4723_s28, %s4014_s11  ;;  %p4019_p8 = scmp.lt.u32.totalorder %s4723_s28, %s4775_s4 }
 0x1ff   : > { %p4020_p13 = scmp.lt.u32.totalorder %s4018_s5, %s4014_s11  ;;  %p4022_p10 = scmp.lt.u32.totalorder %s4014_s11, %s4723_s28 }
 0x200   : > { %p4016_p0 = pnand %p4015_p9, %p4259_p5 }
 0x201   : > { %p4021_p6 = por %p4020_p13, %p4019_p8 }
 0x202   : > { %p4017_p11 = pneg %p4016_p0 }
 0x203   : > { %p4023_p3 = por %p4022_p10, %p4021_p6 }
 0x205   : > { %p4024_p7 = pnand %p4023_p3, %p4017_p11 }
 0x207   : > { %4027 = shalt.err (!%p4024_p7)
}
 0x208   : > { %s4083_s23 = smov 64   ;;  %s4084_s14 = smov 4  }
 0x209   : > { %3771 = dma.vmem_to_hbm [thread:$0]  (%p4259_p5), %s4725_s20, 1024, %s4723_s28, %s2840_s19, %s4083_s23, %s4083_s23, %s4084_s14  }
 0x20a PF: > { %s2869_s6 = sand.u32 1, %s4062_s15   ;;  %p4795_p12 = scmp.ne.s32.totalorder %s4780_s22, 0 }
 0x20b   : > { %p4796_p1 = scmp.ge.s32.totalorder %s4074_s18, 2  ;;  %s2870_s9 = scalar_lea.sflag [#allocation4], %s2869_s6 }
 0x20d   : > { %p3788_p2 = pnand %p4796_p1, %p4795_p12 }
 0x20f   : > { %4057 = dma.done.wait (!%p3788_p2), %s2870_s9, 1024  }
 0x210   : > { %4059 = vsyncadd (!%p3788_p2), %s2870_s9, 4294966272  ;;  %p19_p4 = scmp.ge.s32.totalorder %s4245_s10, 4   ;;  %s4797_s15 = smov %s4066_s16 }
 0x211   : > { %s4798_s16 = smov %s4070_s17  ;;  %s4799_s17 = smov %s4255_s24 }
 0x212   : > { %s4800_s18 = smov %s4245_s10  ;;  %21 = sbr.rel (!%p19_p4) target bundleno = 7 (0x7), region = 112 }
 0x219   :  { %2875 = vsyncpa [#allocation3], 1 }
 0x21a   :  { %2877 = vsyncpa [#allocation3 + $0x1], 1 }
 0x21b   :  { %2878 = vsyncpa [#allocation6], 1 }
 0x21c   :  { %2879 = vsyncpa [#allocation9], 1 }
 0x21d   :  { %2880 = vsyncpa [#allocation4], 1 }
 0x21e   :  { %2882 = vsyncpa [#allocation4 + $0x1], 1 }

// kernel: basic_block_forward.5
= control target key start
LH: loop header
LB: loop body
LE: loop exit
PB: predicated region body
PF: predicated region fallthrough
CT: control target
= control target key end

     0   :  { %s6407_s0 = inlined_call_operand.hbm [shape: bf16[4,10,10,128], index: 0, kind: input, shape index: {}]   ;;  %s6408_s1 = inlined_call_operand.hbm [shape: bf16[9,128,128], index: 1, kind: input, shape index: {}]   ;;  %s6409_s2 = inlined_call_operand.hbm [shape: f32[1,128], index: 2, kind: input, shape index: {}]   ;;  %s6410_s3 = inlined_call_operand.hbm [shape: f32[1,128], index: 3, kind: input, shape index: {}]   ;;  %s6411_s4 = inlined_call_operand.hbm [shape: bf16[4,64,128], index: 4, kind: input, shape index: {}]   ;;  %s6412_s5 = inlined_call_operand.hbm [shape: bf16[4,64,128], index: 5, kind: output, shape index: {}]  }
   0x1   :  { %6438 = sst [smem:[#allocation29_spill]] %s6407_s0 }
   0x2   :  { %6439 = sst [smem:[#allocation30_spill]] %s6408_s1 }
   0x3   :  { %10 = vsyncpa [#allocation3], 0 }
   0x4   :  { %12 = vsyncpa [#allocation3 + $0x1], 0 }
   0x5   :  { %13 = vsyncpa [#allocation6], 0 }
   0x6   :  { %14 = vsyncpa [#allocation9], 0 }
   0x7   :  { %15 = vsyncpa [#allocation4], 0 }
   0x8   :  { %17 = vsyncpa [#allocation4 + $0x1], 0  ;;  %s5229_s18 = smov 0   ;;  %s5231_s19 = smov 0  }
   0x9   :  { %s5233_s20 = smov 0   ;;  %s5235_s21 = smov 0  }
   0xa LB: > { %6440 = sst [smem:[#allocation17_spill]] %s5183_s20  ;;  %s5250_s22 = sadd.s32 4294967295, %s5187_s21   ;;  %s5187_s21 = sphi %s5235_s21, %s6494_s21   ;;  %s5183_s20 = sphi %s5233_s20, %s6496_s20   ;;  %s5179_s19 = sphi %s5231_s19, %s6498_s19   ;;  %s5175_s18 = sphi %s5229_s18, %s6497_s18  }
   0xb   : > { %s3705_s23 = sadd.s32 4294967294, %s5187_s21   ;;  %p43_p0 = scmp.ne.s32.totalorder %s5179_s19, %s5175_s18 }
   0xc   : > { %p6413_p1 = scmp.eq.s32.totalorder %s5250_s22, 0  ;;  %p162_p3 = scmp.eq.s32.totalorder %s3705_s23, 1 }
   0xd   : > { %p3706_p5 = scmp.ge.s32.totalorder %s5187_s21, 1  ;;  %p169_p7 = scmp.lt.s32.totalorder %s5187_s21, 3 }
   0xe   : > { %p5259_p4 = por %p6413_p1, %p43_p0  ;;  %p5264_p6 = por %p162_p3, %p43_p0 }
   0xf   : > { %p5269_p8 = pnand %p3706_p5, %p169_p7  ;;  %s5189_s27 = smov [#allocation5]  }
  0x10   : > { %s6441_s24 = scalar_select %p5259_p4, 1, 0 }
  0x11   : > { %s6442_s25 = scalar_select %p5264_p6, 1, 0 }
  0x12   : > { %s6444_s26 = scalar_select %p5269_p8, 1, 0 }
  0x13   : > { %6443 = sst [smem:[#allocation18_spill]] %s6442_s25  ;;  %s181_s28 = sshll.u32 %s5189_s27, 4  ;;  %s5273_s28 = int_to_ptr.vmem [resolvable:$true] %s181_s28 }
  0x14   : > { %p4795_p9 = pneg %p5269_p8  ;;  %s5285_s30 = sadd.s32 1, %s5187_s21  }
  0x15   : > { %6446 = sst [smem:[#allocation19_spill]] %s5285_s30  ;;  %s30_s6 = sadd.s32 1, %s5183_s20 }
  0x16   : > { %p5280_p11 = pnand %p4795_p9, %p6413_p1  ;;  %s27_s7 = ssub.s32 %s5187_s21, %s5285_s30 }
  0x17   : > { %s6447_s1 = sld [smem:[#allocation30_spill]] }
  0x18   : > { %s6445_s29 = scalar_select %p5280_p11, 1, 0 }
  0x19   : > { %p5298_p13 = pneg %p5280_p11 }
  0x1d   : > { %s4965_s10 = scalar_lea.hbm %s6447_s1, 9216 }
  0x1e   : > { %p4966_p12 = scmp.ne.s32.totalorder %s6447_s1, %s4965_s10  ;;  %p4972_p5 = scmp.lt.u32.totalorder %s4965_s10, %s6447_s1 }
  0x20   : > { %p4968_p0 = pnand %p5298_p13, %p4966_p12 }
  0x22   : > { %p4969_p3 = pneg %p4968_p0 }
  0x24   : > { %p4974_p7 = pnand %p4972_p5, %p4969_p3 }
  0x26   : > { %4977 = shalt.err (!%p4974_p7)
}
  0x27   : > { %s4978_s16 = scalar_lea.vmem %s5273_s28, 9216  ;;  %p4986_p2 = scmp.lt.s32.totalorder %s5273_s28, %s5273_s28 }
  0x28   : > { %p4979_p9 = scmp.ne.s32.totalorder %s5273_s28, %s4978_s16  ;;  %p4987_p6 = scmp.lt.s32.totalorder %s4978_s16, %s4978_s16 }
  0x2a   : > { %p4981_p10 = pnand %p4979_p9, %p5298_p13  ;;  %p4988_p12 = por %p4987_p6, %p4986_p2 }
  0x2c   : > { %p4982_p1 = pneg %p4981_p10 }
  0x2e   : > { %p4989_p0 = pnand %p4988_p12, %p4982_p1 }
  0x30   : > { %4992 = shalt.err (!%p4989_p0)
}
  0x31   : > { %s6414_s17 = smov 64   ;;  %s6416_s23 = smov 4  }
  0x32   : > { %4798 = dma.hbm_to_vmem [thread:$0]  (!%p5280_p11), %s6447_s1, 9216, %s5273_s28, [#allocation6], %s6414_s17, %s6414_s17, %s6416_s23  }
  0x33   : > { %p28_p1 = scmp.eq.s32.totalorder %s27_s7, 0  ;;  %p37_p2 = scmp.ne.s32.totalorder %s5183_s20, %s5179_s19 }
  0x34   : > { %p38_p6 = scmp.eq.s32.totalorder %s5187_s21, 0  ;;  %p4819_p10 = scmp.lt.s32.totalorder %s5187_s21, 2 }
  0x35   : > { %s5327_s9 = scalar_select %p28_p1, %s5183_s20, %s30_s6  }
  0x36   : > { %p39_p3 = por %p38_p6, %p37_p2  ;;  %p6450_p5 = scmp.eq.s32.totalorder %s5250_s22, 1 }
  0x37   : > { %6449 = sst [smem:[#allocation20_spill]] %s5327_s9  ;;  %s217_s11 = sand.u32 1, %s5187_s21  }
  0x38   : > { %p5331_p7 = por %p6450_p5, %p37_p2  ;;  %s219_s12 = sand.u32 1, %s5183_s20  }
  0x39   : > { %s4774_s14 = smul.u32 160, %s219_s12  ;;  %p5338_p9 = pnand %p4819_p10, %p39_p3 }
  0x3a   : > { %s6451_s10 = scalar_select %p5331_p7, 1, 0 }
  0x3b   : > { %s4775_s15 = smul.u32 2560, %s5187_s21  ;;  %s5342_s28 = sshll.u32 %s219_s12, 6 }
  0x3c   : > { %s6452_s16 = scalar_select %p5338_p9, 1, 0 }
  0x3d   : > { %s6453_s0 = sld [smem:[#allocation29_spill]]  ;;  %s221_s8 = scalar_lea.vmem [#allocation2], %s4774_s14 }
  0x3e   : > { %s229_s17 = sshll.u32 %s221_s8, 4  ;;  %s5351_s23 = scalar_lea.sflag [#allocation3], %s217_s11  ;;  %s5349_s17 = int_to_ptr.vmem [resolvable:$true] %s229_s17 }
  0x3f   : > { %p6427_p0 = pneg %p5338_p9 }
  0x43   : > { %s5347_s27 = scalar_lea.hbm %s6453_s0, %s4775_s15  ;;  %s4998_s6 = scalar_lea.hbm %s6453_s0, 5120 }
  0x44   : > { %s4993_s1 = scalar_lea.hbm %s5347_s27, 2560  ;;  %p4999_p6 = scmp.lt.u32.totalorder %s5347_s27, %s6453_s0 }
  0x45   : > { %p4994_p12 = scmp.ne.s32.totalorder %s5347_s27, %s4993_s1  ;;  %p5000_p10 = scmp.lt.u32.totalorder %s4998_s6, %s4993_s1 }
  0x46   : > { %p5002_p5 = scmp.lt.u32.totalorder %s4993_s1, %s5347_s27 }
  0x47   : > { %p4996_p1 = pnand %p6427_p0, %p4994_p12  ;;  %p5001_p3 = por %p5000_p10, %p4999_p6 }
  0x49   : > { %p4997_p2 = pneg %p4996_p1  ;;  %p5003_p7 = por %p5002_p5, %p5001_p3 }
  0x4b   : > { %p5004_p4 = pnand %p5003_p7, %p4997_p2 }
  0x4d   : > { %5007 = shalt.err (!%p5004_p4)
}
  0x4e   : > { %s5008_s11 = scalar_lea.vmem %s5349_s17, 2560  ;;  %s5192_s14 = smov [#allocation2]  }
  0x4f   : > { %p5009_p12 = scmp.ne.s32.totalorder %s5349_s17, %s5008_s11  ;;  %s5013_s8 = sshll.u32 %s5192_s14, 4  ;;  %s5014_s8 = int_to_ptr.vmem [resolvable:$false] %s5013_s8 }
  0x50   : > { %s5015_s9 = scalar_lea.vmem %s5014_s8, 5120  ;;  %p5016_p11 = scmp.lt.s32.totalorder %s5349_s17, %s5014_s8 }
  0x51   : > { %p5011_p1 = pnand %p5009_p12, %p6427_p0  ;;  %p5017_p6 = scmp.lt.s32.totalorder %s5015_s9, %s5008_s11 }
  0x53   : > { %p5012_p8 = pneg %p5011_p1  ;;  %p5018_p10 = por %p5017_p6, %p5016_p11 }
  0x55   : > { %p5019_p3 = pnand %p5018_p10, %p5012_p8 }
  0x57   : > { %5022 = shalt.err (!%p5019_p3)
}
  0x58   : > { %s6454_s1 = smov 4   ;;  %s6455_s12 = smov 64  }
  0x59   : > { %4808 = dma.hbm_to_vmem [thread:$0]  (!%p5338_p9), %s5347_s27, 2560, %s5349_s17, %s5351_s23, %s6455_s12, %s6455_s12, %s6454_s1  }
  0x5a   : > { %s5193_s15 = smov [#allocation7]   ;;  %s5194_s7 = smov [#allocation8]  }
  0x5b   : > { %s195_s6 = sshll.u32 %s5193_s15, 4  ;;  %s206_s14 = sshll.u32 %s5194_s7, 4  ;;  %s196_s6 = int_to_ptr.vmem [resolvable:$true] %s195_s6  ;;  %s207_s14 = int_to_ptr.vmem [resolvable:$true] %s206_s14 }
  0x5c   : > { %s5023_s9 = scalar_lea.hbm %s6409_s2, 16 }
  0x5d   : > { %p5024_p4 = scmp.ne.s32.totalorder %s6409_s2, %s5023_s9  ;;  %p5030_p7 = scmp.lt.u32.totalorder %s5023_s9, %s6409_s2 }
  0x5f   : > { %p5026_p8 = pnand %p5024_p4, %p5298_p13 }
  0x61   : > { %p5027_p11 = pneg %p5026_p8 }
  0x63   : > { %p5032_p2 = pnand %p5030_p7, %p5027_p11 }
  0x65   : > { %5035 = shalt.err (!%p5032_p2)
}
  0x66   : > { %s5036_s17 = scalar_lea.vmem %s196_s6, 16  ;;  %s5043_s27 = scalar_lea.vmem %s196_s6, 32 }
  0x67   : > { %p5037_p5 = scmp.ne.s32.totalorder %s196_s6, %s5036_s17  ;;  %p5044_p6 = scmp.lt.s32.totalorder %s196_s6, %s196_s6 }
  0x68   : > { %p5045_p10 = scmp.lt.s32.totalorder %s5043_s27, %s5036_s17 }
  0x69   : > { %p5039_p12 = pnand %p5037_p5, %p5298_p13 }
  0x6a   : > { %p5046_p3 = por %p5045_p10, %p5044_p6 }
  0x6b   : > { %p5040_p1 = pneg %p5039_p12 }
  0x6d   : > { %p5047_p0 = pnand %p5046_p3, %p5040_p1 }
  0x6f   : > { %5050 = shalt.err (!%p5047_p0)
}
  0x70   : > { %p6456_p4 = scmp.ne.s32.totalorder %s6445_s29, 0  ;;  %s4093_s25 = sshll.u32 %s5187_s21, 10 }
  0x71   : > { %s5051_s7 = scalar_lea.hbm %s6410_s3, 16 }
  0x72   : > { %4801 = dma.hbm_to_vmem [thread:$0]  (!%p6456_p4), %s6409_s2, 16, %s196_s6, [#allocation6]  }
  0x73   : > { %p5052_p8 = scmp.ne.s32.totalorder %s6410_s3, %s5051_s7  ;;  %p5058_p7 = scmp.lt.u32.totalorder %s5051_s7, %s6410_s3 }
  0x75   : > { %p5054_p0 = pnand %p5052_p8, %p5298_p13 }
  0x77   : > { %p5055_p11 = pneg %p5054_p0 }
  0x79   : > { %p5060_p2 = pnand %p5058_p7, %p5055_p11 }
  0x7b   : > { %5063 = shalt.err (!%p5060_p2)
}
  0x7c   : > { %s5064_s6 = scalar_lea.vmem %s207_s14, 16  ;;  %s5071_s27 = scalar_lea.vmem %s207_s14, 32 }
  0x7d   : > { %p5065_p5 = scmp.ne.s32.totalorder %s207_s14, %s5064_s6  ;;  %p5072_p6 = scmp.lt.s32.totalorder %s207_s14, %s207_s14 }
  0x7e   : > { %p5073_p10 = scmp.lt.s32.totalorder %s5071_s27, %s5064_s6 }
  0x7f   : > { %p5067_p12 = pnand %p5065_p5, %p5298_p13 }
  0x80   : > { %p5074_p3 = por %p5073_p10, %p5072_p6 }
  0x81   : > { %p5068_p1 = pneg %p5067_p12 }
  0x83   : > { %p5075_p9 = pnand %p5074_p3, %p5068_p1 }
  0x85   : > { %5078 = shalt.err (!%p5075_p9)
}
  0x86   : > { %4804 = dma.hbm_to_vmem [thread:$0]  (!%p6456_p4), %s6410_s3, 16, %s207_s14, [#allocation9]  }
  0x87   : > { %s5422_s13 = scalar_lea.hbm %s6411_s4, %s4093_s25  ;;  %s243_s7 = scalar_lea.vmem [#allocation10], %s5342_s28 }
  0x88   : > { %s251_s8 = sshll.u32 %s243_s7, 4  ;;  %s5079_s29 = scalar_lea.hbm %s5422_s13, 1024  ;;  %s5425_s8 = int_to_ptr.vmem [resolvable:$true] %s251_s8 }
  0x89   : > { %p5080_p13 = scmp.ne.s32.totalorder %s5422_s13, %s5079_s29  ;;  %p6457_p9 = scmp.ne.s32.totalorder %s6452_s16, 0 }
  0x8a   : > { %s5084_s9 = scalar_lea.hbm %s6411_s4, 2048  ;;  %p5085_p4 = scmp.lt.u32.totalorder %s5422_s13, %s6411_s4 }
  0x8b   : > { %p6458_p8 = pneg %p6457_p9  ;;  %p5086_p7 = scmp.lt.u32.totalorder %s5084_s9, %s5079_s29 }
  0x8c   : > { %p5088_p5 = scmp.lt.u32.totalorder %s5079_s29, %s5422_s13 }
  0x8d   : > { %p5082_p0 = pnand %p5080_p13, %p6458_p8  ;;  %p5087_p2 = por %p5086_p7, %p5085_p4 }
  0x8f   : > { %p5083_p11 = pneg %p5082_p0  ;;  %p5089_p12 = por %p5088_p5, %p5087_p2 }
  0x91   : > { %p5090_p1 = pnand %p5089_p12, %p5083_p11 }
  0x93   : > { %5093 = shalt.err (!%p5090_p1)
}
  0x94   : > { %s5094_s28 = scalar_lea.vmem %s5425_s8, 1024  ;;  %p6459_p10 = pmov %p6458_p8 }
  0x95   : > { %p5095_p6 = scmp.ne.s32.totalorder %s5425_s8, %s5094_s28  ;;  %s5195_s6 = smov [#allocation10]  }
  0x96   : > { %s5099_s27 = sshll.u32 %s5195_s6, 4  ;;  %s5100_s27 = int_to_ptr.vmem [resolvable:$false] %s5099_s27 }
  0x97   : > { %p5097_p3 = pnand %p5095_p6, %p6459_p10  ;;  %s5101_s0 = scalar_lea.vmem %s5100_s27, 2048 }
  0x98   : > { %p5102_p8 = scmp.lt.s32.totalorder %s5425_s8, %s5100_s27  ;;  %p5103_p0 = scmp.lt.s32.totalorder %s5101_s0, %s5094_s28 }
  0x99   : > { %p5098_p13 = pneg %p5097_p3 }
  0x9a   : > { %p5104_p4 = por %p5103_p0, %p5102_p8 }
  0x9c   : > { %p5105_p7 = pnand %p5104_p4, %p5098_p13 }
  0x9e   : > { %5108 = shalt.err (!%p5105_p7)
}
  0x9f   : > { %4811 = dma.hbm_to_vmem [thread:$0]  (!%p6457_p9), %s5422_s13, 1024, %s5425_s8, %s5351_s23, %s6455_s12, %s6455_s12, %s6454_s1  }
  0xa0   : > { %p6460_p11 = scmp.ne.s32.totalorder %s6444_s26, 0 }
  0xa2   : > { %263 = sbr.rel (%p6460_p11) target bundleno = 635 (0x27b), region = 40 }
  0xa9   : > { %s265_s20 = sand.u32 1, %s5250_s22   ;;  %s5458_s30 = sand.u32 1, %s5179_s19  }
  0xaa   : > { %s4776_s15 = smul.u32 160, %s5458_s30  ;;  %s266_s7 = scalar_lea.sflag [#allocation3], %s265_s20 }
  0xab   : > { %p6461_p2 = scmp.ne.s32.totalorder %s6441_s24, 0 }
  0xac   : > { %s5461_s16 = scalar_lea.vmem [#allocation2], %s4776_s15 }
  0xad   : > { %5154 = dma.done.wait (%p6461_p2), %s266_s7, 2560  }
  0xae   : > { %5156 = vsyncadd (%p6461_p2), %s266_s7, 4294964736  ;;  %p6462_p9 = scmp.eq.s32.totalorder %s5250_s22, 0 }
  0xb0   : > { %5158 = dma.done.wait (%p6462_p9), [#allocation6], 9232   ;;  %p6463_p5 = pmov %p6462_p9 }
  0xb2   : > { %5160 = vsyncadd (%p6463_p5), [#allocation6], 4294958064  ;;  %p6464_p12 = pmov %p6463_p5 }
  0xb3   : > { %p6465_p1 = pmov %p6463_p5 }
  0xb4   : > { %5162 = dma.done.wait (%p6464_p12), [#allocation9], 16  }
  0xb5   : > { %5164 = vsyncadd (%p6465_p1), [#allocation9], 4294967280  ;;  %s3722_s26 = sshll.u32 %s5458_s30, 6 }
  0xb6   : > { %s5478_s23 = scalar_lea.vmem [#allocation10], %s3722_s26 }
  0xb7   : > { %5166 = dma.done.wait (%p6461_p2), %s266_s7, 1024  }
  0xb8   : > { %5168 = vsyncadd (%p6461_p2), %s266_s7, 4294966272  ;;  %v4863_v0 = vld [vmem:[#allocation5 + $0x40] sm:$0xff]   ;;  %v4865_v2 = vld [vmem:[#allocation5 + $0x48] sm:$0xff]   ;;  %vm415_vm0 = vsmask.f32 3328  ;;  %vm1013_vm3 = vcmask 1042432  }
  0xb9   : > { %v4864_v1 = vld [vmem:[#allocation5 + $0x100] sm:$0xff]   ;;  %4342 = vmatprep.subr.bf16.mxu1 %v4863_v0  ;;  %v4866_v3 = vld [vmem:[#allocation5 + $0x108] sm:$0xff]   ;;  %v4867_v4 = vld [vmem:[#allocation5 + $0x50] sm:$0xff]   ;;  %vm416_vm1 = vsmask.f32 7440  ;;  %vm1014_vm4 = vcmask 1046532  }
  0xba   : > { %4470 = vmatprep.subr.bf16.mxu0 %v4864_v1  ;;  %4343 = vmatpush3.bf16.msra.mxu1 %v4863_v0  ;;  %v4868_v5 = vld [vmem:[#allocation5 + $0x110] sm:$0xff]   ;;  %v4869_v6 = vld [vmem:[#allocation5 + $0x58] sm:$0xff]   ;;  %v4871_v8 = vld [vmem:[#allocation5 + $0x60] sm:$0xff]   ;;  %s6318_s24 = scalar_lea.vmem [#allocation11], %s3722_s26  ;;  %s4111_s1 = sshll.u32 %s5250_s22, 10 }
  0xbb   : > { %4471 = vmatpush3.bf16.msra.mxu0 %v4864_v1  ;;  %4344 = vmatprep.subr.bf16.mxu1 %v4865_v2  ;;  %v4870_v7 = vld [vmem:[#allocation5 + $0x118] sm:$0xff]   ;;  %v4872_v9 = vld [vmem:[#allocation5 + $0x120] sm:$0xff]   ;;  %v4873_v10 = vld [vmem:[#allocation5 + $0x68] sm:$0xff]   ;;  %s3583_s12 = sshll.u32 %s6318_s24, 4  ;;  %s6359_s29 = scalar_lea.hbm %s6412_s5, %s4111_s1  ;;  %s6361_s12 = int_to_ptr.vmem [resolvable:$true] %s3583_s12 }
  0xbc   : > { %4472 = vmatprep.subr.bf16.mxu0 %v4866_v3  ;;  %v4874_v11 = vld [vmem:[#allocation5 + $0x128] sm:$0xff]   ;;  %v5485_v12 = vld [vmem:[%s5461_s16] sm:$0xf]  ;;  %v407_v14 = vld [vmem:[%s5461_s16 + $0x4] sm:$0x1]  ;;  %s3569_s22 = scalar_lea.sflag [#allocation4], %s5458_s30 }
  0xbd   : > { %v5488_v13 = vld [vmem:[%s5461_s16 + $0x8] sm:$0xf]  ;;  %v408_v15 = vld [vmem:[%s5461_s16 + $0xc] sm:$0x1]  ;;  %v419_v16 = vshrl.u32 %v5485_v12, 16  ;;  %v422_v17 = vshll.u32 %v5485_v12, 16  ;;  %vm5509_vm2 = vmor %vm415_vm0, %vm416_vm1 }
  0xbe   : > { %4345 = vmatpush3.bf16.msra.mxu1 %v4865_v2  ;;  %v428_v18 = vshll.u32 %v407_v14, 16  ;;  %v433_v19 = vshrl.u32 %v5488_v13, 16  ;;  %v4875_v20 = vld [vmem:[#allocation5 + $0x70] sm:$0xff]   ;;  %v436_v21 = vshll.u32 %v5488_v13, 16  ;;  %v442_v22 = vshll.u32 %v408_v15, 16  ;;  %v4877_v45 = vld [vmem:[#allocation5 + $0x78] sm:$0xff]   ;;  %vm5775_vm5 = vmor %vm1013_vm3, %vm1014_vm4 }
  0xbf   : > { %4473 = vmatpush3.bf16.msra.mxu0 %v4866_v3  ;;  %4346 = vmatprep.subr.bf16.mxu1 %v4867_v4  ;;  %v3844_v23 = vld [vmem:[%s5461_s16 + $0x8] sm:$0xf]  ;;  %v421_v24 = vrot.slane %v419_v16, 4  ;;  %v424_v25 = vrot.slane %v422_v17, 5  ;;  %v5498_v28 = vld [vmem:[%s5461_s16 + $0xc] sm:$0x1] }
  0xc0   : > { %4474 = vmatprep.subr.bf16.mxu0 %v4868_v5  ;;  %v430_v26 = vrot.slane %v428_v18, 5  ;;  %v435_v27 = vrot.slane %v433_v19, 4  ;;  %v438_v29 = vrot.slane %v436_v21, 5  ;;  %v444_v30 = vrot.slane %v442_v22, 5  ;;  %v3846_v31 = vld [vmem:[%s5461_s16 + $0x10] sm:$0xf] }
  0xc1   : > { %v5502_v32 = vld [vmem:[%s5461_s16 + $0x14] sm:$0x1]  ;;  %v425_v35 = vor.u32 %v424_v25, %v421_v24  ;;  %v1575_v36 = vshrl.u32 %v3844_v23, 16  ;;  %v1578_v37 = vshll.u32 %v3844_v23, 16  ;;  %v1584_v38 = vshll.u32 %v5498_v28, 16  ;;  %v4878_v50 = vld [vmem:[#allocation5 + $0x138] sm:$0xff]  }
  0xc2   : > { %4347 = vmatpush3.bf16.msra.mxu1 %v4867_v4  ;;  %v4876_v34 = vld [vmem:[#allocation5 + $0x130] sm:$0xff]   ;;  %v439_v40 = vor.u32 %v438_v29, %v435_v27  ;;  %v1589_v41 = vshrl.u32 %v3846_v31, 16  ;;  %v1592_v42 = vshll.u32 %v3846_v31, 16  ;;  %v1598_v43 = vshll.u32 %v5502_v32, 16  ;;  %v5518_v49 = vld [vmem:[%s5461_s16 + $0x18] sm:$0xf] }
  0xc3   : > { %4475 = vmatpush3.bf16.msra.mxu0 %v4868_v5  ;;  %4348 = vmatprep.subr.bf16.mxu1 %v4869_v6  ;;  %v5515_v44 = vld [vmem:[%s5461_s16 + $0x10] sm:$0xf]  ;;  %v426_v46 = vrot.slane %v425_v35, 4  ;;  %v1577_v47 = vrot.slane %v1575_v36, 4  ;;  %v1580_v48 = vrot.slane %v1578_v37, 5  ;;  %v1586_v57 = vrot.slane %v1584_v38, 5 }
  0xc4   : > { %4476 = vmatprep.subr.bf16.mxu0 %v4870_v7  ;;  %v440_v51 = vrot.slane %v439_v40, 4  ;;  %v1591_v52 = vrot.slane %v1589_v41, 4  ;;  %v1594_v53 = vrot.slane %v1592_v42, 5  ;;  %v5521_v54 = vld [vmem:[%s5461_s16 + $0x14] sm:$0x1]  ;;  %v1600_v58 = vrot.slane %v1598_v43, 5 }
  0xc5   : > { %v431_v55 = vsel %vm5509_vm2, %v426_v46, %v430_v26  ;;  %v1581_v56 = vor.u32 %v1580_v48, %v1577_v47  ;;  %v5528_v61 = vld [vmem:[%s5461_s16 + $0x1c] sm:$0x1]  ;;  %v447_v62 = vshrl.u32 %v5515_v44, 16  ;;  %v450_v63 = vshll.u32 %v5515_v44, 16  ;;  %v5532_v0 = vld [vmem:[#allocation5] sm:$0xff]   ;;  %s5109_s14 = scalar_lea.vmem %s6361_s12, 1024 }
  0xc6   : > { %4349 = vmatpush3.bf16.msra.mxu1 %v4869_v6  ;;  %v445_v59 = vsel %vm5509_vm2, %v440_v51, %v444_v30  ;;  %v1595_v60 = vor.u32 %v1594_v53, %v1591_v52  ;;  %v3848_v1 = vld [vmem:[%s5461_s16 + $0x18] sm:$0xf]  ;;  %v456_v4 = vshll.u32 %v5521_v54, 16  ;;  %v461_v5 = vshrl.u32 %v5518_v49, 16  ;;  %v5538_v6 = vld [vmem:[%s5461_s16 + $0x1c] sm:$0x1]  ;;  %p5110_p6 = scmp.ne.s32.totalorder %s6361_s12, %s5109_s14 }
  0xc7   : > { %4477 = vmatpush3.bf16.msra.mxu0 %v4870_v7  ;;  %4350 = vmatprep.subr.bf16.mxu1 %v4871_v8  ;;  %v3748_v2 = vcombine.low %v431_v55, %v445_v59  ;;  %v1582_v3 = vrot.slane %v1581_v56, 4  ;;  %v5540_v7 = vld [vmem:[#allocation5 + $0x140] sm:$0xff]   ;;  %v470_v17 = vshll.u32 %v5528_v61, 16  ;;  %v1603_v26 = vshrl.u32 %v3848_v1, 16  ;;  %v412_v56 = vld [vmem:[%s5461_s16 + $0x2c] sm:$0x1] }
  0xc8   : > { %4478 = vmatprep.subr.bf16.mxu0 %v4872_v9  ;;  %v3850_v14 = vld [vmem:[%s5461_s16 + $0x20] sm:$0xf]  ;;  %v463_v16 = vrot.slane %v461_v5, 4  ;;  %v5548_v18 = vld [vmem:[%s5461_s16 + $0x24] sm:$0x1]  ;;  %v458_v21 = vrot.slane %v456_v4, 5 }
  0xc9   : > { %4358 = vmatprep.mubr.bf16.mxu1 %v3748_v2  ;;  %v1587_v15 = vsel %vm5509_vm2, %v1582_v3, %v1586_v57  ;;  %v472_v25 = vrot.slane %v470_v17, 5  ;;  %v1606_v30 = vshll.u32 %v3848_v1, 16  ;;  %v1612_v31 = vshll.u32 %v5538_v6, 16  ;;  %v5561_v43 = vld [vmem:[%s5461_s16 + $0x20] sm:$0xf]  ;;  %p6490_p10 = scmp.ne.s32.totalorder %s6451_s10, 0 }
  0xca   : > { %4351 = vmatpush3.bf16.msra.mxu1 %v4871_v8  ;;  %v1596_v8 = vrot.slane %v1595_v60, 4  ;;  %v1617_v35 = vshrl.u32 %v3850_v14, 16  ;;  %v1620_v36 = vshll.u32 %v3850_v14, 16  ;;  %v1626_v37 = vshll.u32 %v5548_v18, 16  ;;  %v411_v55 = vld [vmem:[%s5461_s16 + $0x24] sm:$0x1] }
  0xcb   : > { %4479 = vmatpush3.bf16.msra.mxu0 %v4872_v9  ;;  %4352 = vmatprep.subr.bf16.mxu1 %v4873_v10  ;;  %v449_v9 = vrot.slane %v447_v62, 4  ;;  %v1608_v42 = vrot.slane %v1606_v30, 5  ;;  %v475_v57 = vshrl.u32 %v5561_v43, 16  ;;  %v4881_v60 = vld [vmem:[#allocation5 + $0x8] sm:$0xff]   ;;  %v478_v62 = vshll.u32 %v5561_v43, 16  ;;  %p5111_p3 = pnand %p5110_p6, %p6490_p10  ;;  %s5196_s11 = smov [#allocation11]  }
  0xcc   : > { %4480 = vmatprep.subr.bf16.mxu0 %v4874_v11  ;;  %v1601_v19 = vsel %vm5509_vm2, %v1596_v8, %v1600_v58  ;;  %v1619_v46 = vrot.slane %v1617_v35, 4  ;;  %v1622_v47 = vrot.slane %v1620_v36, 5  ;;  %v1628_v48 = vrot.slane %v1626_v37, 5  ;;  %v3852_v1 = vld [vmem:[%s5461_s16 + $0x28] sm:$0xf]  ;;  %s5113_s9 = sshll.u32 %s5196_s11, 4  ;;  %s5114_s9 = int_to_ptr.vmem [resolvable:$false] %s5113_s9 }
  0xcd   : > { %v3876_v23 = vcombine.low %v1587_v15, %v1601_v19  ;;  %v477_v3 = vrot.slane %v475_v57, 4  ;;  %v5577_v14 = vld [vmem:[%s5461_s16 + $0x2c] sm:$0x1]  ;;  %v3854_v19 = vld [vmem:[%s5461_s16 + $0x30] sm:$0xf]  ;;  %p5112_p13 = pneg %p5111_p3  ;;  %s5115_s25 = scalar_lea.vmem %s5114_s9, 2048 }
  0xce   : > { %4353 = vmatpush3.bf16.msra.mxu1 %v4873_v10  ;;  %v452_v10 = vrot.slane %v450_v63, 5  ;;  %v1623_v59 = vor.u32 %v1622_v47, %v1619_v46  ;;  %v484_v63 = vshll.u32 %v411_v55, 16  ;;  %v1640_v35 = vshll.u32 %v5577_v14, 16  ;;  %p5116_p8 = scmp.lt.s32.totalorder %s6361_s12, %s5114_s9  ;;  %p5117_p0 = scmp.lt.s32.totalorder %s5115_s25, %s5109_s14 }
  0xcf   : > { %4481 = vmatpush3.bf16.msra.mxu0 %v4874_v11  ;;  %4354 = vmatprep.subr.bf16.mxu1 %v4875_v20  ;;  %v464_v11 = vshll.u32 %v5518_v49, 16 }
  0xd0   : > { %4482 = vmatprep.subr.bf16.mxu0 %v4876_v34  ;;  %4486 = vmatprep.mubr.bf16.mxu0 %v3876_v23  ;;  %v1624_v8 = vrot.slane %v1623_v59, 4  ;;  %v1642_v46 = vrot.slane %v1640_v35, 5  ;;  %v414_v59 = vld [vmem:[%s5461_s16 + $0x3c] sm:$0x1]  ;;  %p5118_p4 = por %p5117_p0, %p5116_p8 }
  0xd1   : > { %v466_v22 = vrot.slane %v464_v11, 5  ;;  %v498_v11 = vshll.u32 %v412_v56, 16 }
  0xd2   : > { %4355 = vmatpush3.bf16.msra.mxu1 %v4875_v20  ;;  %v453_v20 = vor.u32 %v452_v10, %v449_v9  ;;  %v480_v9 = vrot.slane %v478_v62, 5  ;;  %v486_v10 = vrot.slane %v484_v63, 5  ;;  %p5119_p7 = pnand %p5118_p4, %p5112_p13 }
  0xd3   : > { %4483 = vmatpush3.bf16.msra.mxu0 %v4876_v34  ;;  %4356 = vmatprep.subr.bf16.mxu1 %v4877_v45  ;;  %v467_v29 = vor.u32 %v466_v22, %v463_v16  ;;  %v1605_v34 = vrot.slane %v1603_v26, 4  ;;  %v1629_v22 = vsel %vm5509_vm2, %v1624_v8, %v1628_v48  ;;  %v5586_v26 = vld [vmem:[%s5461_s16 + $0x34] sm:$0x1] }
  0xd4   : > { %4484 = vmatprep.subr.bf16.mxu0 %v4878_v50  ;;  %v454_v27 = vrot.slane %v453_v20, 4  ;;  %v1631_v20 = vshrl.u32 %v3852_v1, 16  ;;  %v481_v23 = vor.u32 %v480_v9, %v477_v3  ;;  %v1654_v47 = vshll.u32 %v5586_v26, 16  ;;  %v413_v48 = vld [vmem:[%s5461_s16 + $0x34] sm:$0x1]  ;;  %v4885_v3 = vld [vmem:[#allocation5 + $0x18] sm:$0xff]  }
  0xd5   : > { %v468_v41 = vrot.slane %v467_v29, 4  ;;  %v1609_v52 = vor.u32 %v1608_v42, %v1605_v34  ;;  %v5589_v29 = vld [vmem:[%s5461_s16 + $0x30] sm:$0xf]  ;;  %v5593_v42 = vld [vmem:[%s5461_s16 + $0x38] sm:$0xf]  ;;  %v512_v9 = vshll.u32 %v413_v48, 16 }
  0xd6   : > { %4357 = vmatpush3.bf16.msra.mxu1 %v4877_v45  ;;  %v459_v40 = vsel %vm5509_vm2, %v454_v27, %v458_v21  ;;  %v1614_v45 = vrot.slane %v1612_v31, 5  ;;  %v4883_v21 = vld [vmem:[#allocation5 + $0x10] sm:$0xff]   ;;  %v1634_v27 = vshll.u32 %v3852_v1, 16  ;;  %v1633_v34 = vrot.slane %v1631_v20, 4 }
  0xd7   : > { %4485 = vmatpush3.bf16.msra.mxu0 %v4878_v50  ;;  %4374 = vmatprep.subr.bf16.mxu1 %v5532_v0  ;;  %v5564_v50 = vld [vmem:[%s5461_s16 + $0x28] sm:$0xf]  ;;  %v473_v51 = vsel %vm5509_vm2, %v468_v41, %v472_v25  ;;  %v1610_v2 = vrot.slane %v1609_v52, 4  ;;  %v500_v25 = vrot.slane %v498_v11, 5  ;;  %v482_v36 = vrot.slane %v481_v23, 4  ;;  %v4884_v52 = vld [vmem:[#allocation5 + $0x150] sm:$0xff]  }
  0xd8   : > { %4502 = vmatprep.subr.bf16.mxu0 %v5540_v7  ;;  %v3749_v58 = vcombine.low %v459_v40, %v473_v51  ;;  %v489_v4 = vshrl.u32 %v5564_v50, 16  ;;  %v492_v5 = vshll.u32 %v5564_v50, 16  ;;  %v1636_v37 = vrot.slane %v1634_v27, 5  ;;  %v4887_v27 = vld [vmem:[#allocation5 + $0x20] sm:$0xff]  }
  0xd9   : > { %v1615_v15 = vsel %vm5509_vm2, %v1610_v2, %v1614_v45  ;;  %v1645_v40 = vshrl.u32 %v3854_v19, 16  ;;  %v1648_v41 = vshll.u32 %v3854_v19, 16  ;;  %v503_v51 = vshrl.u32 %v5589_v29, 16  ;;  %v5613_v19 = vld [vmem:[%s5461_s16 + $0x44] sm:$0x1] }
  0xda   : > { %4359 = vmatmul.mubr.bf16.vlgmr.msra.gmra.mrb[0].mxu1 %v3749_v58  ;;  %v491_v16 = vrot.slane %v489_v4, 4  ;;  %v494_v17 = vrot.slane %v492_v5, 5  ;;  %v3877_v30 = vcombine.low %v1615_v15, %v1629_v22  ;;  %v487_v55 = vsel %vm5509_vm2, %v482_v36, %v486_v10  ;;  %v3858_v10 = vld [vmem:[%s5461_s16 + $0x40] sm:$0xf]  ;;  %v4886_v36 = vld [vmem:[#allocation5 + $0x158] sm:$0xff]  }
  0xdb   : > { %4375 = vmatpush3.bf16.msra.mxu1 %v5532_v0  ;;  %v4882_v0 = vld [vmem:[#allocation5 + $0x148] sm:$0xff]   ;;  %v1637_v56 = vor.u32 %v1636_v37, %v1633_v34  ;;  %v1647_v57 = vrot.slane %v1645_v40, 4  ;;  %v1650_v58 = vrot.slane %v1648_v41, 5  ;;  %v1656_v63 = vrot.slane %v1654_v47, 5 }
  0xdc   : > { %4376 = vmatprep.subr.bf16.mxu1 %v4881_v60  ;;  %v495_v31 = vor.u32 %v494_v17, %v491_v16  ;;  %4487 = vmatmul.mubr.bf16.vlgmr.msra.gmra.mrb[0].mxu0 %v3877_v30  ;;  %v505_v1 = vrot.slane %v503_v51, 4  ;;  %v506_v2 = vshll.u32 %v5589_v29, 16  ;;  %v517_v15 = vshrl.u32 %v5593_v42, 16  ;;  %v4889_v41 = vld [vmem:[#allocation5 + $0x28] sm:$0xff]   ;;  %v5621_v51 = vld [vmem:[%s5461_s16 + $0x50] sm:$0xf] }
  0xdd   : > { %4503 = vmatpush3.bf16.msra.mxu0 %v5540_v7  ;;  %v5607_v7 = vld [vmem:[%s5461_s16 + $0x3c] sm:$0x1]  ;;  %v1638_v5 = vrot.slane %v1637_v56, 4  ;;  %v1651_v8 = vor.u32 %v1650_v58, %v1647_v57  ;;  %v520_v16 = vshll.u32 %v5593_v42, 16  ;;  %v526_v17 = vshll.u32 %v414_v59, 16 }
  0xde   : > { %v496_v45 = vrot.slane %v495_v31, 4  ;;  %4504 = vmatprep.subr.bf16.mxu0 %v4882_v0  ;;  %v508_v11 = vrot.slane %v506_v2, 5  ;;  %v514_v23 = vrot.slane %v512_v9, 5  ;;  %v519_v31 = vrot.slane %v517_v15, 4  ;;  %v5634_v9 = vld [vmem:[%s5461_s16 + $0x5c] sm:$0x1] }
  0xdf   : > { %4377 = vmatpush3.bf16.msra.mxu1 %v4881_v60  ;;  %v3856_v60 = vld [vmem:[%s5461_s16 + $0x38] sm:$0xf]  ;;  %v1643_v20 = vsel %vm5509_vm2, %v1638_v5, %v1642_v46  ;;  %v1652_v22 = vrot.slane %v1651_v8, 4  ;;  %v522_v34 = vrot.slane %v520_v16, 5  ;;  %v528_v35 = vrot.slane %v526_v17, 5  ;;  %6469 = vst [vmem:[#allocation22_spill] sm:$0xff] %v5634_v9 }
  0xe0   : > { %4378 = vmatprep.subr.bf16.mxu1 %v4883_v21  ;;  %v501_v62 = vsel %vm5509_vm2, %v496_v45, %v500_v25  ;;  %v1659_v25 = vshrl.u32 %v3856_v60, 16  ;;  %v509_v30 = vor.u32 %v508_v11, %v505_v1  ;;  %v1662_v37 = vshll.u32 %v3856_v60, 16  ;;  %v5628_v60 = vld [vmem:[%s5461_s16 + $0x54] sm:$0x1]  ;;  %v3860_v17 = vld [vmem:[%s5461_s16 + $0x58] sm:$0xf] }
  0xe1   : > { %v3750_v4 = vcombine.low %v487_v55, %v501_v62  ;;  %4505 = vmatpush3.bf16.msra.mxu0 %v4882_v0  ;;  %v1668_v40 = vshll.u32 %v5607_v7, 16  ;;  %v523_v47 = vor.u32 %v522_v34, %v519_v31  ;;  %v1673_v48 = vshrl.u32 %v3858_v10, 16  ;;  %v5624_v55 = vld [vmem:[%s5461_s16 + $0x58] sm:$0xf]  ;;  %6468 = vst [vmem:[#allocation21_spill] sm:$0xff] %v5628_v60  ;;  %v4890_v31 = vld [vmem:[#allocation5 + $0x168] sm:$0xff]  }
  0xe2   : > { %4506 = vmatprep.subr.bf16.mxu0 %v4884_v52  ;;  %v1661_v0 = vrot.slane %v1659_v25, 4  ;;  %v510_v46 = vrot.slane %v509_v30, 4  ;;  %v1664_v56 = vrot.slane %v1662_v37, 5  ;;  %v1676_v58 = vshll.u32 %v3858_v10, 16  ;;  %v5643_v30 = vld [vmem:[%s5461_s16 + $0x5c] sm:$0x1] }
  0xe3   : > { %4379 = vmatpush3.bf16.msra.mxu1 %v4883_v21  ;;  %4362 = vmatprep.mubr.bf16.mxu1 %v3750_v4  ;;  %v1657_v21 = vsel %vm5509_vm2, %v1652_v22, %v1656_v63  ;;  %v1670_v57 = vrot.slane %v1668_v40, 5  ;;  %v1682_v59 = vshll.u32 %v5613_v19, 16  ;;  %v524_v63 = vrot.slane %v523_v47, 4  ;;  %v4891_v34 = vld [vmem:[#allocation5 + $0x30] sm:$0xff]  }
  0xe4   : > { %4380 = vmatprep.subr.bf16.mxu1 %v4885_v3  ;;  %v3878_v45 = vcombine.low %v1643_v20, %v1657_v21  ;;  %v515_v62 = vsel %vm5509_vm2, %v510_v46, %v514_v23  ;;  %v1675_v1 = vrot.slane %v1673_v48, 4  ;;  %v539_v2 = vshrl.u32 %v5621_v51, 16  ;;  %v5651_v46 = vld [vmem:[%s5461_s16 + $0x64] sm:$0x1]  ;;  %v5654_v48 = vld [vmem:[%s5461_s16 + $0x60] sm:$0xf] }
  0xe5   : > { %4507 = vmatpush3.bf16.msra.mxu0 %v4884_v52  ;;  %v1665_v4 = vor.u32 %v1664_v56, %v1661_v0  ;;  %v1678_v5 = vrot.slane %v1676_v58, 5  ;;  %v1684_v8 = vrot.slane %v1682_v59, 5  ;;  %v542_v52 = vshll.u32 %v5621_v51, 16 }
  0xe6   : > { %4490 = vmatprep.mubr.bf16.mxu0 %v3878_v45  ;;  %4508 = vmatprep.subr.bf16.mxu0 %v4886_v36  ;;  %v529_v10 = vsel %vm5509_vm2, %v524_v63, %v528_v35  ;;  %v541_v11 = vrot.slane %v539_v2, 4  ;;  %v548_v15 = vshll.u32 %v5628_v60, 16  ;;  %v553_v16 = vshrl.u32 %v5624_v55, 16  ;;  %v5658_v63 = vld [vmem:[%s5461_s16 + $0x68] sm:$0xf] }
  0xe7   : > { %4381 = vmatpush3.bf16.msra.mxu1 %v4885_v3  ;;  %v4888_v3 = vld [vmem:[#allocation5 + $0x160] sm:$0xff]   ;;  %v3751_v20 = vcombine.low %v515_v62, %v529_v10  ;;  %v1666_v22 = vrot.slane %v1665_v4, 4  ;;  %v1679_v23 = vor.u32 %v1678_v5, %v1675_v1  ;;  %v544_v25 = vrot.slane %v542_v52, 5  ;;  %v4892_v1 = vld [vmem:[#allocation5 + $0x170] sm:$0xff]   ;;  %v4893_v52 = vld [vmem:[#allocation5 + $0x38] sm:$0xff]  }
  0xe8   : > { %4382 = vmatprep.subr.bf16.mxu1 %v4887_v27  ;;  %v550_v35 = vrot.slane %v548_v15, 5  ;;  %v555_v21 = vrot.slane %v553_v16, 4  ;;  %v556_v0 = vshll.u32 %v5624_v55, 16  ;;  %v562_v37 = vshll.u32 %v5634_v9, 16  ;;  %v5766_v60 = vld [vmem:[%s5461_s16 + $0x94] sm:$0x1] }
  0xe9   : > { %4509 = vmatpush3.bf16.msra.mxu0 %v4886_v36  ;;  %4363 = vmatmul.mubr.bf16.gmra.mrb[4].mxu1 %v3751_v20  ;;  %v1671_v36 = vsel %vm5509_vm2, %v1666_v22, %v1670_v57  ;;  %v1680_v40 = vrot.slane %v1679_v23, 4  ;;  %v545_v45 = vor.u32 %v544_v25, %v541_v11  ;;  %v1703_v47 = vshrl.u32 %v3860_v17, 16 }
  0xea   : > { %4510 = vmatprep.subr.bf16.mxu0 %v4888_v3  ;;  %v558_v56 = vrot.slane %v556_v0, 5  ;;  %v564_v58 = vrot.slane %v562_v37, 5  ;;  %v1706_v59 = vshll.u32 %v3860_v17, 16  ;;  %v1712_v62 = vshll.u32 %v5643_v30, 16  ;;  %v5663_v17 = vld [vmem:[%s5461_s16 + $0x64] sm:$0x1] }
  0xeb   : > { %4383 = vmatpush3.bf16.msra.mxu1 %v4887_v27  ;;  %v3862_v27 = vld [vmem:[%s5461_s16 + $0x60] sm:$0xf]  ;;  %v1685_v57 = vsel %vm5509_vm2, %v1680_v40, %v1684_v8  ;;  %v546_v2 = vrot.slane %v545_v45, 4  ;;  %v1705_v4 = vrot.slane %v1703_v47, 4  ;;  %6470 = vst [vmem:[#allocation23_spill] sm:$0xff] %v5663_v17  ;;  %v1726_v22 = vshll.u32 %v5651_v46, 16 }
  0xec   : > { %4384 = vmatprep.subr.bf16.mxu1 %v4889_v41  ;;  %v1717_v5 = vshrl.u32 %v3862_v27, 16  ;;  %v3879_v10 = vcombine.low %v1671_v36, %v1685_v57  ;;  %v559_v11 = vor.u32 %v558_v56, %v555_v21  ;;  %v1708_v15 = vrot.slane %v1706_v59, 5  ;;  %v3864_v37 = vld [vmem:[%s5461_s16 + $0x68] sm:$0xf]  ;;  %v5675_v36 = vld [vmem:[%s5461_s16 + $0x6c] sm:$0x1] }
  0xed   : > { %4511 = vmatpush3.bf16.msra.mxu0 %v4888_v3  ;;  %v1714_v16 = vrot.slane %v1712_v62, 5  ;;  %v1720_v20 = vshll.u32 %v3862_v27, 16  ;;  %v5669_v3 = vld [vmem:[%s5461_s16 + $0x6c] sm:$0x1]  ;;  %v567_v21 = vshrl.u32 %v5654_v48, 16  ;;  %v570_v0 = vshll.u32 %v5654_v48, 16 }
  0xee   : > { %4512 = vmatprep.subr.bf16.mxu0 %v4890_v31  ;;  %v1719_v8 = vrot.slane %v1717_v5, 4  ;;  %6471 = vst [vmem:[#allocation24_spill] sm:$0xff] %v5669_v3  ;;  %4491 = vmatmul.mubr.bf16.gmra.mrb[4].mxu0 %v3879_v10  ;;  %v560_v23 = vrot.slane %v559_v11, 4  ;;  %v1709_v25 = vor.u32 %v1708_v15, %v1705_v4  ;;  %v4894_v40 = vld [vmem:[#allocation5 + $0x178] sm:$0xff]   ;;  %v1728_v45 = vrot.slane %v1726_v22, 5  ;;  %v5682_v4 = vld [vmem:[#allocation5 + $0x80] sm:$0xff]  }
  0xef   : > { %4385 = vmatpush3.bf16.msra.mxu1 %v4889_v41  ;;  %v551_v41 = vsel %vm5509_vm2, %v546_v2, %v550_v35  ;;  %v1722_v35 = vrot.slane %v1720_v20, 5  ;;  %v576_v27 = vshll.u32 %v5663_v17, 16  ;;  %v581_v47 = vshrl.u32 %v5658_v63, 16  ;;  %v3866_v56 = vld [vmem:[%s5461_s16 + $0x70] sm:$0xf] }
  0xf0   : > { %4386 = vmatprep.subr.bf16.mxu1 %v4891_v34  ;;  %v565_v59 = vsel %vm5509_vm2, %v560_v23, %v564_v58  ;;  %v1710_v62 = vrot.slane %v1709_v25, 4  ;;  %v569_v57 = vrot.slane %v567_v21, 4  ;;  %v572_v2 = vrot.slane %v570_v0, 5  ;;  %v5689_v58 = vld [vmem:[%s5461_s16 + $0x74] sm:$0x1]  ;;  %v5691_v23 = vld [vmem:[#allocation5 + $0x180] sm:$0xff]  }
  0xf1   : > { %4513 = vmatpush3.bf16.msra.mxu0 %v4890_v31  ;;  %v1723_v5 = vor.u32 %v1722_v35, %v1719_v8  ;;  %v578_v10 = vrot.slane %v576_v27, 5  ;;  %v583_v11 = vrot.slane %v581_v47, 4  ;;  %v584_v31 = vshll.u32 %v5658_v63, 16  ;;  %v5695_v47 = vld [vmem:[%s5461_s16 + $0x70] sm:$0xf] }
  0xf2   : > { %4514 = vmatprep.subr.bf16.mxu0 %v4892_v1  ;;  %v1715_v15 = vsel %vm5509_vm2, %v1710_v62, %v1714_v16  ;;  %v573_v20 = vor.u32 %v572_v2, %v569_v57  ;;  %v590_v22 = vshll.u32 %v5669_v3, 16  ;;  %v1734_v8 = vshll.u32 %v3864_v37, 16  ;;  %v5701_v57 = vld [vmem:[%s5461_s16 + $0x78] sm:$0xf] }
  0xf3   : > { %4387 = vmatpush3.bf16.msra.mxu1 %v4891_v34  ;;  %v3752_v34 = vcombine.low %v551_v41, %v565_v59  ;;  %v1724_v25 = vrot.slane %v1723_v5, 4  ;;  %v1731_v41 = vshrl.u32 %v3864_v37, 16  ;;  %v1740_v21 = vshll.u32 %v5675_v36, 16 }
  0xf4   : > { %4388 = vmatprep.subr.bf16.mxu1 %v4893_v52  ;;  %v574_v16 = vrot.slane %v573_v20, 4  ;;  %v586_v0 = vrot.slane %v584_v31, 5  ;;  %v592_v35 = vrot.slane %v590_v22, 5  ;;  %v1745_v27 = vshrl.u32 %v3866_v56, 16  ;;  %v5706_v20 = vld [vmem:[%s5461_s16 + $0x74] sm:$0x1] }
  0xf5   : > { %4366 = vmatprep.mubr.bf16.mxu1 %v3752_v34  ;;  %4515 = vmatpush3.bf16.msra.mxu0 %v4892_v1  ;;  %v1733_v59 = vrot.slane %v1731_v41, 4  ;;  %v1736_v62 = vrot.slane %v1734_v8, 5  ;;  %v1742_v37 = vrot.slane %v1740_v21, 5  ;;  %6472 = vst [vmem:[#allocation25_spill] sm:$0xff] %v5706_v20  ;;  %v1748_v22 = vshll.u32 %v3866_v56, 16 }
  0xf6   : > { %4516 = vmatprep.subr.bf16.mxu0 %v4894_v40  ;;  %v579_v2 = vsel %vm5509_vm2, %v574_v16, %v578_v10  ;;  %v587_v34 = vor.u32 %v586_v0, %v583_v11  ;;  %v1747_v5 = vrot.slane %v1745_v27, 4  ;;  %v1754_v33 = vshll.u32 %v5689_v58, 16  ;;  %v3868_v8 = vld [vmem:[%s5461_s16 + $0x78] sm:$0xf]  ;;  %v5719_v27 = vld [vmem:[%s5461_s16 + $0x7c] sm:$0x1] }
  0xf7   : > { %4389 = vmatpush3.bf16.msra.mxu1 %v4893_v52  ;;  %v1729_v52 = vsel %vm5509_vm2, %v1724_v25, %v1728_v45  ;;  %v1737_v31 = vor.u32 %v1736_v62, %v1733_v59  ;;  %v5710_v45 = vld [vmem:[%s5461_s16 + $0x7c] sm:$0x1]  ;;  %v595_v25 = vshrl.u32 %v5695_v47, 16  ;;  %v598_v41 = vshll.u32 %v5695_v47, 16 }
  0xf8   : > { %4406 = vmatprep.subr.bf16.mxu1 %v5682_v4  ;;  %v3880_v1 = vcombine.low %v1715_v15, %v1729_v52  ;;  %6473 = vst [vmem:[#allocation26_spill] sm:$0xff] %v5710_v45  ;;  %v588_v15 = vrot.slane %v587_v34, 4  ;;  %v604_v10 = vshll.u32 %v5706_v20, 16  ;;  %v609_v11 = vshrl.u32 %v5701_v57, 16 }
  0xf9   : > { %4517 = vmatpush3.bf16.msra.mxu0 %v4894_v40  ;;  %v1738_v56 = vrot.slane %v1737_v31, 4  ;;  %v1750_v21 = vrot.slane %v1748_v22, 5  ;;  %v1756_v16 = vrot.slane %v1754_v33, 5  ;;  %v597_v0 = vrot.slane %v595_v25, 4  ;;  %v5729_v25 = vld [vmem:[%s5461_s16 + $0x84] sm:$0x1] }
  0xfa   : > { %4494 = vmatprep.mubr.bf16.mxu0 %v3880_v1  ;;  %4534 = vmatprep.subr.bf16.mxu0 %v5691_v23  ;;  %v593_v40 = vsel %vm5509_vm2, %v588_v15, %v592_v35  ;;  %v600_v52 = vrot.slane %v598_v41, 5  ;;  %v606_v59 = vrot.slane %v604_v10, 5  ;;  %v611_v62 = vrot.slane %v609_v11, 4  ;;  %v3870_v1 = vld [vmem:[%s5461_s16 + $0x80] sm:$0xf] }
  0xfb   : > { %v3753_v34 = vcombine.low %v579_v2, %v593_v40  ;;  %v1743_v53 = vsel %vm5509_vm2, %v1738_v56, %v1742_v37  ;;  %v1751_v38 = vor.u32 %v1750_v21, %v1747_v5  ;;  %v612_v31 = vshll.u32 %v5701_v57, 16  ;;  %v5733_v10 = vld [vmem:[%s5461_s16 + $0x80] sm:$0xf]  ;;  %v5738_v40 = vld [vmem:[%s5461_s16 + $0x88] sm:$0xf] }
  0xfc   : > { %v601_v22 = vor.u32 %v600_v52, %v597_v0  ;;  %v618_v33 = vshll.u32 %v5710_v45, 16  ;;  %v1759_v24 = vshrl.u32 %v3868_v8, 16  ;;  %v1762_v3 = vshll.u32 %v3868_v8, 16 }
  0xfd   : > { %4367 = vmatmul.mubr.bf16.gmra.mrb[8].mxu1 %v3753_v34  ;;  %v1752_v35 = vrot.slane %v1751_v38, 4  ;;  %v614_v15 = vrot.slane %v612_v31, 5  ;;  %v1768_v41 = vshll.u32 %v5719_v27, 16  ;;  %v1773_v2 = vshrl.u32 %v3870_v1, 16 }
  0xfe   : > { %v602_v37 = vrot.slane %v601_v22, 4  ;;  %v620_v5 = vrot.slane %v618_v33, 5  ;;  %v1761_v11 = vrot.slane %v1759_v24, 4  ;;  %v1764_v56 = vrot.slane %v1762_v3, 5  ;;  %v5743_v3 = vld [vmem:[%s5461_s16 + $0x84] sm:$0x1] }
  0xff   : > { %v1757_v8 = vsel %vm5509_vm2, %v1752_v35, %v1756_v16  ;;  %v615_v38 = vor.u32 %v614_v15, %v611_v62  ;;  %v1770_v21 = vrot.slane %v1768_v41, 5  ;;  %v1775_v0 = vrot.slane %v1773_v2, 4  ;;  %6474 = vst [vmem:[#allocation27_spill] sm:$0xff] %v5743_v3  ;;  %v5746_v22 = vld [vmem:[%s5461_s16 + $0x8c] sm:$0x1] }
 0x100   : > { %v3881_v52 = vcombine.low %v1743_v53, %v1757_v8  ;;  %v607_v34 = vsel %vm5509_vm2, %v602_v37, %v606_v59  ;;  %v1765_v31 = vor.u32 %v1764_v56, %v1761_v11  ;;  %v1776_v24 = vshll.u32 %v3870_v1, 16  ;;  %6475 = vst [vmem:[#allocation28_spill] sm:$0xff] %v5746_v22  ;;  %v3872_v15 = vld [vmem:[%s5461_s16 + $0x88] sm:$0xf]  ;;  %v5753_v41 = vld [vmem:[%s5461_s16 + $0x8c] sm:$0x1] }
 0x101   : > { %v616_v33 = vrot.slane %v615_v38, 4  ;;  %v1782_v16 = vshll.u32 %v5729_v25, 16  ;;  %v623_v62 = vshrl.u32 %v5733_v10, 16  ;;  %v626_v35 = vshll.u32 %v5733_v10, 16  ;;  %v3874_v37 = vld [vmem:[%s5461_s16 + $0x90] sm:$0xf] }
 0x102   : > { %v2062_v53 = vrot.slane %v5548_v18, 5  ;;  %4495 = vmatmul.mubr.bf16.gmra.mrb[8].mxu0 %v3881_v52  ;;  %v1766_v59 = vrot.slane %v1765_v31, 4  ;;  %v1778_v1 = vrot.slane %v1776_v24, 5  ;;  %v637_v2 = vshrl.u32 %v5738_v40, 16 }
 0x103   : > { %v621_v11 = vsel %vm5509_vm2, %v616_v33, %v620_v5  ;;  %v625_v56 = vrot.slane %v623_v62, 4  ;;  %v628_v8 = vrot.slane %v626_v35, 5  ;;  %v632_v38 = vshll.u32 %v5743_v3, 16 }
 0x104   : > { %v3754_v17 = vcombine.low %v607_v34, %v621_v11  ;;  %v1771_v45 = vsel %vm5509_vm2, %v1766_v59, %v1770_v21  ;;  %v1779_v20 = vor.u32 %v1778_v1, %v1775_v0  ;;  %v1784_v18 = vrot.slane %v1782_v16, 5  ;;  %v3892_v16 = vld [vmem:[%s5461_s16 + $0x8] sm:$0xe] }
 0x105   : > { %v629_v52 = vor.u32 %v628_v8, %v625_v56  ;;  %v639_v31 = vrot.slane %v637_v2, 4  ;;  %v640_v24 = vshll.u32 %v5738_v40, 16  ;;  %v646_v9 = vshll.u32 %v5746_v22, 16  ;;  %v3893_v8 = vld [vmem:[%s5461_s16 + $0x10] sm:$0xe] }
 0x106   : > { %4370 = vmatprep.mubr.bf16.mxu1 %v3754_v17  ;;  %v1780_v5 = vrot.slane %v1779_v20, 4  ;;  %v1787_v33 = vshrl.u32 %v3872_v15, 16  ;;  %v1790_v62 = vshll.u32 %v3872_v15, 16  ;;  %v1796_v34 = vshll.u32 %v5753_v41, 16 }
 0x107   : > { %v630_v35 = vrot.slane %v629_v52, 4  ;;  %v634_v21 = vrot.slane %v632_v38, 5  ;;  %v642_v0 = vrot.slane %v640_v24, 5  ;;  %v1801_v59 = vshrl.u32 %v3874_v37, 16 }
 0x108   : > { %v1785_v1 = vsel %vm5509_vm2, %v1780_v5, %v1784_v18  ;;  %v648_v2 = vrot.slane %v646_v9, 5  ;;  %v1789_v11 = vrot.slane %v1787_v33, 4  ;;  %v1792_v56 = vrot.slane %v1790_v62, 5  ;;  %v3894_v9 = vld [vmem:[%s5461_s16 + $0x18] sm:$0xe] }
 0x109   : > { %v3882_v17 = vcombine.low %v1771_v45, %v1785_v1  ;;  %v643_v20 = vor.u32 %v642_v0, %v639_v31  ;;  %v1798_v22 = vrot.slane %v1796_v34, 5  ;;  %v1803_v15 = vrot.slane %v1801_v59, 4  ;;  %v3895_v33 = vld [vmem:[%s5461_s16 + $0x20] sm:$0xe] }
 0x10a   : > { %v1793_v52 = vor.u32 %v1792_v56, %v1789_v11  ;;  %v1804_v24 = vshll.u32 %v3874_v37, 16  ;;  %v1810_v3 = vshll.u32 %v5766_v60, 16  ;;  %v3900_v18 = vrot.slane %v3892_v16, 9 }
 0x10b   : > { %4498 = vmatprep.mubr.bf16.mxu0 %v3882_v17  ;;  %v635_v5 = vsel %vm5509_vm2, %v630_v35, %v634_v21  ;;  %v644_v45 = vrot.slane %v643_v20, 4  ;;  %v3901_v31 = vrot.slane %v3893_v8, 9  ;;  %v3902_v62 = vrot.slane %v3894_v9, 9 }
 0x10c   : > { %v1794_v34 = vrot.slane %v1793_v52, 4  ;;  %v1806_v0 = vrot.slane %v1804_v24, 5  ;;  %v1812_v59 = vrot.slane %v1810_v3, 5  ;;  %v6478_v1 = vrot.slane %v5498_v28, 5  ;;  %v3897_v52 = vld [vmem:[%s5461_s16 + $0x30] sm:$0xe] }
 0x10d   : > { %v649_v16 = vsel %vm5509_vm2, %v644_v45, %v648_v2  ;;  %v6479_v11 = vrot.slane %v5502_v32, 5  ;;  %v6480_v21 = vrot.slane %v5538_v6, 5  ;;  %v3903_v8 = vrot.slane %v3895_v33, 9  ;;  %v3896_v32 = vld [vmem:[%s5461_s16 + $0x28] sm:$0xe] }
 0x10e   : > { %v2051_v37 = vsel %vm5775_vm5, %v3900_v18, %v6478_v1  ;;  %v3755_v3 = vcombine.low %v635_v5, %v649_v16  ;;  %v1807_v17 = vor.u32 %v1806_v0, %v1803_v15  ;;  %v3734_v2 = vcombine.low %v5561_v43, %v5564_v50  ;;  %v3908_v16 = vld [vmem:[%s5461_s16 + $0x58] sm:$0xe] }
 0x10f   : > { %v2055_v35 = vsel %vm5775_vm5, %v3901_v31, %v6479_v11  ;;  %v2059_v56 = vsel %vm5775_vm5, %v3902_v62, %v6480_v21  ;;  %v2063_v20 = vsel %vm5775_vm5, %v3903_v8, %v2062_v53  ;;  %v1799_v6 = vsel %vm5509_vm2, %v1794_v34, %v1798_v22  ;;  %v3898_v31 = vld [vmem:[%s5461_s16 + $0x38] sm:$0xe]  ;;  %v3899_v62 = vld [vmem:[%s5461_s16 + $0x40] sm:$0xe]  ;;  %v4899_v34 = vld [vmem:[#allocation5 + $0x88] sm:$0xff]  }
 0x110   : > { %v3924_v28 = vcombine.low %v2051_v37, %v2055_v35  ;;  %4371 = vmatmul.mubr.bf16.gmra.mrb[12].mxu1 %v3755_v3  ;;  %v1808_v24 = vrot.slane %v1807_v17, 4  ;;  %v3925_v18 = vcombine.low %v2059_v56, %v2063_v20  ;;  %v6481_v15 = vcombine.low %v5485_v12, %v5488_v13  ;;  %v5820_v12 = vld [vmem:[%s5461_s16 + $0x4] sm:$0x1]  ;;  %v3909_v11 = vld [vmem:[%s5461_s16 + $0x60] sm:$0xe]  ;;  %v4900_v21 = vld [vmem:[#allocation5 + $0x188] sm:$0xff]  }
 0x111   : > { %v2066_v53 = vrot.slane %v5577_v14, 5  ;;  %v2070_v9 = vrot.slane %v5586_v26, 5  ;;  %v3735_v43 = vcombine.low %v5589_v29, %v5593_v42  ;;  %v3904_v5 = vrot.slane %v3896_v32, 9  ;;  %v5824_v14 = vld [vmem:[%s5461_s16 + $0xc] sm:$0x1]  ;;  %v4903_v56 = vld [vmem:[#allocation5 + $0x90] sm:$0xff]  }
 0x112   : > { %4390 = vmatprep.mubr.bf16.mxu1 %v6481_v15  ;;  %v1813_v50 = vsel %vm5509_vm2, %v1808_v24, %v1812_v59  ;;  %v3905_v45 = vrot.slane %v3897_v52, 9  ;;  %v3733_v33 = vcombine.low %v5515_v44, %v5518_v49  ;;  %v1018_v13 = vrot.slane %v5820_v12, 5  ;;  %v3910_v35 = vld [vmem:[%s5461_s16 + $0x68] sm:$0xe]  ;;  %v4905_v20 = vld [vmem:[#allocation5 + $0x98] sm:$0xff]  }
 0x113   : > { %v3883_v22 = vcombine.low %v1799_v6, %v1813_v50  ;;  %v1022_v26 = vrot.slane %v5824_v14, 5  ;;  %v1026_v29 = vrot.slane %v5521_v54, 5  ;;  %v1030_v42 = vrot.slane %v5528_v61, 5  ;;  %v4904_v6 = vld [vmem:[#allocation5 + $0x190] sm:$0xff]   ;;  %v3912_v15 = vld [vmem:[%s5461_s16 + $0x78] sm:$0xe] }
 0x114   : > { %v3906_v44 = vrot.slane %v3898_v31, 9  ;;  %v2074_v49 = vrot.slane %v5607_v7, 5  ;;  %v2067_v0 = vsel %vm5775_vm5, %v3904_v5, %v2066_v53  ;;  %v2071_v59 = vsel %vm5775_vm5, %v3905_v45, %v2070_v9  ;;  %v4909_v50 = vld [vmem:[#allocation5 + $0xa0] sm:$0xff]  }
 0x115   : > { %4499 = vmatmul.mubr.bf16.gmra.mrb[12].mxu0 %v3883_v22  ;;  %v3907_v1 = vrot.slane %v3899_v62, 9  ;;  %v2078_v37 = vrot.slane %v5613_v19, 5  ;;  %v3926_v7 = vcombine.low %v2067_v0, %v2071_v59  ;;  %v2106_v8 = vrot.slane %v5643_v30, 5  ;;  %v3911_v19 = vld [vmem:[%s5461_s16 + $0x70] sm:$0xe] }
 0x116   : > { %4518 = vmatprep.mubr.bf16.mxu0 %v3924_v28  ;;  %v2110_v3 = vrot.slane %v5651_v46, 5  ;;  %v3916_v17 = vrot.slane %v3908_v16, 9  ;;  %v3917_v28 = vrot.slane %v3909_v11, 9  ;;  %v3918_v32 = vrot.slane %v3910_v35, 9  ;;  %v991_v62 = vld [vmem:[%s5461_s16 + $0x10] sm:$0xe] }
 0x117   : > { %v2114_v52 = vrot.slane %v5675_v36, 5  ;;  %v2075_v30 = vsel %vm5775_vm5, %v3906_v44, %v2074_v49  ;;  %v2079_v46 = vsel %vm5775_vm5, %v3907_v1, %v2078_v37  ;;  %v3736_v24 = vcombine.low %v5621_v51, %v5624_v55  ;;  %v3913_v36 = vld [vmem:[%s5461_s16 + $0x80] sm:$0xe]  ;;  %v990_v51 = vld [vmem:[%s5461_s16 + $0x8] sm:$0xe]  ;;  %v4915_v16 = vld [vmem:[#allocation5 + $0xb0] sm:$0xff]  }
 0x118   : > { %4391 = vmatmul.mubr.bf16.vlgmr.msra.gmra.mrb[0].mxu1 %v3733_v33  ;;  %v3927_v53 = vcombine.low %v2075_v30, %v2079_v46  ;;  %v3919_v9 = vrot.slane %v3911_v19, 9  ;;  %v3920_v5 = vrot.slane %v3912_v15, 9  ;;  %v3921_v45 = vrot.slane %v3913_v36, 9  ;;  %v3914_v1 = vld [vmem:[%s5461_s16 + $0x88] sm:$0xe]  ;;  %v4910_v37 = vld [vmem:[#allocation5 + $0x1a0] sm:$0xff]  }
 0x119   : > { %4407 = vmatpush3.bf16.msra.mxu1 %v5682_v4  ;;  %4394 = vmatprep.mubr.bf16.mxu1 %v3734_v2  ;;  %v2118_v4 = vrot.slane %v5689_v58, 5  ;;  %v2122_v2 = vrot.slane %v5719_v27, 5  ;;  %v2107_v58 = vsel %vm5775_vm5, %v3916_v17, %v2106_v8  ;;  %v2111_v27 = vsel %vm5775_vm5, %v3917_v28, %v2110_v3  ;;  %v993_v8 = vld [vmem:[%s5461_s16 + $0x20] sm:$0xe]  ;;  %v994_v3 = vld [vmem:[%s5461_s16 + $0x28] sm:$0xe] }
 0x11a   : > { %4408 = vmatprep.subr.bf16.mxu1 %v4899_v34  ;;  %v2126_v22 = vrot.slane %v5729_v25, 5  ;;  %v3773_v31 = vrot.slane %v990_v51, 9  ;;  %v3928_v33 = vcombine.low %v2107_v58, %v2111_v27  ;;  %v3774_v25 = vrot.slane %v991_v62, 9  ;;  %v4916_v28 = vld [vmem:[#allocation5 + $0x1b0] sm:$0xff]   ;;  %v4917_v19 = vld [vmem:[#allocation5 + $0xb8] sm:$0xff]   ;;  %v4920_v36 = vld [vmem:[#allocation5 + $0xc0] sm:$0xff]  }
 0x11b   : > { %v3737_v0 = vcombine.low %v5654_v48, %v5658_v63  ;;  %v2115_v12 = vsel %vm5775_vm5, %v3918_v32, %v2114_v52  ;;  %v3738_v59 = vcombine.low %v5695_v47, %v5701_v57  ;;  %v3915_v47 = vld [vmem:[%s5461_s16 + $0x90] sm:$0xe]  ;;  %v2123_v54 = vsel %vm5775_vm5, %v3920_v5, %v2122_v2  ;;  %v4961_v32 = vld [vmem:[%s5461_s16 + $0x24] sm:$0x1]  ;;  %v996_v30 = vld [vmem:[%s5461_s16 + $0x38] sm:$0xe] }
 0x11c   : > { %v5873_v44 = vsel %vm5775_vm5, %v3773_v31, %v1022_v26  ;;  %v2119_v26 = vsel %vm5775_vm5, %v3919_v9, %v2118_v4  ;;  %v5890_v48 = vsel %vm5775_vm5, %v3774_v25, %v1026_v29  ;;  %v2127_v61 = vsel %vm5775_vm5, %v3921_v45, %v2126_v22  ;;  %v995_v2 = vld [vmem:[%s5461_s16 + $0x30] sm:$0xe]  ;;  %v4918_v15 = vld [vmem:[#allocation5 + $0x1b8] sm:$0xff]   ;;  %v4963_v58 = vld [vmem:[%s5461_s16 + $0x34] sm:$0x1] }
 0x11d   : > { %4519 = vmatmul.mubr.bf16.vlgmr.msra.gmra.mrb[0].mxu0 %v3925_v18  ;;  %4409 = vmatpush3.bf16.msra.mxu1 %v4899_v34  ;;  %v989_v18 = vld [vmem:[%s5461_s16] sm:$0xe]  ;;  %v992_v34 = vld [vmem:[%s5461_s16 + $0x18] sm:$0xe]  ;;  %v3929_v29 = vcombine.low %v2115_v12, %v2119_v26  ;;  %v3922_v11 = vrot.slane %v3914_v1, 9  ;;  %v2130_v35 = vrot.slane %v5753_v41, 5  ;;  %v3739_v17 = vcombine.low %v5733_v10, %v5738_v40 }
 0x11e   : > { %4535 = vmatpush3.bf16.msra.mxu0 %v5691_v23  ;;  %4522 = vmatprep.mubr.bf16.mxu0 %v3926_v7  ;;  %v3772_v55 = vrot.slane %v989_v18, 9  ;;  %v4906_v23 = vld [vmem:[#allocation5 + $0x198] sm:$0xff]   ;;  %v3775_v49 = vrot.slane %v992_v34, 9  ;;  %v2134_v7 = vrot.slane %v5766_v60, 5  ;;  %v1034_v52 = vrot.slane %v4961_v32, 5  ;;  %v6482_v45 = vld [vmem:[#allocation21_spill] sm:$0xff] }
 0x11f   : > { %4536 = vmatprep.subr.bf16.mxu0 %v4900_v21  ;;  %4410 = vmatprep.subr.bf16.mxu1 %v4903_v56  ;;  %v2131_v41 = vsel %vm5775_vm5, %v3922_v11, %v2130_v35  ;;  %v3777_v10 = vrot.slane %v994_v3, 9  ;;  %v4962_v40 = vld [vmem:[%s5461_s16 + $0x2c] sm:$0x1]  ;;  %v4919_v46 = vld [vmem:[%s5461_s16 + $0x10] ss:$8 sps:$4 sm:$0xff]   ;;  %v1042_v27 = vrot.slane %v4963_v58, 5 }
 0x120   : > { %4395 = vmatmul.mubr.bf16.gmra.mrb[4].mxu1 %v3735_v43  ;;  %v5865_v43 = vsel %vm5775_vm5, %v3772_v55, %v1018_v13  ;;  %v4911_v13 = vld [vmem:[#allocation5 + $0xa8] sm:$0xff]   ;;  %v5896_v63 = vsel %vm5775_vm5, %v3775_v49, %v1030_v42  ;;  %v1038_v4 = vrot.slane %v4962_v40, 5  ;;  %v4964_v18 = vld [vmem:[%s5461_s16 + $0x3c] sm:$0x1]  ;;  %v3778_v55 = vrot.slane %v995_v2, 9  ;;  %v4926_v35 = vld [vmem:[#allocation5 + $0xd0] sm:$0xff]  }
 0x121   : > { %4411 = vmatpush3.bf16.msra.mxu1 %v4903_v56  ;;  %4398 = vmatprep.mubr.bf16.mxu1 %v3736_v24  ;;  %v3796_v14 = vcombine.low %v5865_v43, %v5873_v44  ;;  %v3797_v57 = vcombine.low %v5890_v48, %v5896_v63  ;;  %v4912_v42 = vld [vmem:[#allocation5 + $0x1a8] sm:$0xff]   ;;  %v3930_v56 = vcombine.low %v2123_v54, %v2127_v61  ;;  %v1074_v22 = vrot.slane %v6482_v45, 5  ;;  %v3785_v12 = vld [vmem:[%s5461_s16 + $0x78] sm:$0xe]  ;;  %v4928_v40 = vld [vmem:[#allocation5 + $0x1d0] sm:$0xff]  }
 0x122   : > { %4537 = vmatpush3.bf16.msra.mxu0 %v4900_v21  ;;  %4412 = vmatprep.subr.bf16.mxu1 %v4905_v20  ;;  %v3923_v21 = vrot.slane %v3915_v47, 9  ;;  %v1039_v51 = vsel %vm5775_vm5, %v3777_v10, %v1038_v4  ;;  %v4923_v31 = vld [vmem:[#allocation5 + $0xc8] sm:$0xff]   ;;  %v3793_v26 = vrot.slane %v3785_v12, 9  ;;  %v4925_v47 = vld [vmem:[%s5461_s16 + $0x30] ss:$8 sps:$4 sm:$0xff]  }
 0x123   : > { %4538 = vmatprep.subr.bf16.mxu0 %v4904_v6  ;;  %v6483_v62 = vld [vmem:[#allocation22_spill] sm:$0xff]  ;;  %v6484_v44 = vld [vmem:[#allocation25_spill] sm:$0xff]  ;;  %v5978_v58 = vld [vmem:[%s5461_s16 + $0x14] sm:$0x1] }
 0x124   : > { %v2135_v60 = vsel %vm5775_vm5, %v3923_v21, %v2134_v7  ;;  %v1078_v34 = vrot.slane %v6483_v62, 5  ;;  %v1090_v25 = vrot.slane %v6484_v44, 5  ;;  %v4921_v1 = vld [vmem:[%s5461_s16 + $0x20] ss:$8 sps:$4 sm:$0xff]   ;;  %v6486_v21 = vld [vmem:[#allocation27_spill] sm:$0xff] }
 0x125   : > { %4523 = vmatmul.mubr.bf16.gmra.mrb[4].mxu0 %v3927_v53  ;;  %4413 = vmatpush3.bf16.msra.mxu1 %v4905_v20  ;;  %v3776_v20 = vrot.slane %v993_v8, 9  ;;  %v3931_v24 = vcombine.low %v2131_v41, %v2135_v60  ;;  %v1046_v53 = vrot.slane %v4964_v18, 5  ;;  %v4924_v11 = vld [vmem:[#allocation5 + $0x1c8] sm:$0xff]   ;;  %v1098_v7 = vrot.slane %v6486_v21, 5  ;;  %v6487_v41 = vld [vmem:[#allocation28_spill] sm:$0xff] }
 0x126   : > { %4539 = vmatpush3.bf16.msra.mxu0 %v4904_v6  ;;  %4526 = vmatprep.mubr.bf16.mxu0 %v3928_v33  ;;  %v3780_v6 = vld [vmem:[%s5461_s16 + $0x50] sm:$0xe]  ;;  %v4922_v33 = vld [vmem:[#allocation5 + $0x1c0] sm:$0xff]   ;;  %v3783_v8 = vld [vmem:[%s5461_s16 + $0x68] sm:$0xe]  ;;  %v1102_v60 = vrot.slane %v6487_v41, 5 }
 0x127   : > { %4540 = vmatprep.subr.bf16.mxu0 %v4906_v23  ;;  %4414 = vmatprep.subr.bf16.mxu1 %v4909_v50  ;;  %v1035_v9 = vsel %vm5775_vm5, %v3776_v20, %v1034_v52  ;;  %v3788_v5 = vrot.slane %v3780_v6, 9  ;;  %v3791_v2 = vrot.slane %v3783_v8, 9 }
 0x128   : > { %4399 = vmatmul.mubr.bf16.gmra.mrb[8].mxu1 %v3737_v0  ;;  %v3798_v43 = vcombine.low %v1035_v9, %v1039_v51  ;;  %v3784_v0 = vld [vmem:[%s5461_s16 + $0x70] sm:$0xe]  ;;  %v5985_v9 = vld [vmem:[%s5461_s16 + $0x1c] sm:$0x1] }
 0x129   : > { %4415 = vmatpush3.bf16.msra.mxu1 %v4909_v50  ;;  %4402 = vmatprep.mubr.bf16.mxu1 %v3738_v59  ;;  %v3781_v50 = vld [vmem:[%s5461_s16 + $0x58] sm:$0xe]  ;;  %v1075_v61 = vsel %vm5775_vm5, %v3788_v5, %v1074_v22 }
 0x12a   : > { %4541 = vmatpush3.bf16.msra.mxu0 %v4906_v23  ;;  %4416 = vmatprep.subr.bf16.mxu1 %v4911_v13  ;;  %v3779_v23 = vrot.slane %v996_v30, 9  ;;  %v3789_v49 = vrot.slane %v3781_v50, 9  ;;  %v6489_v30 = vld [vmem:[#allocation24_spill] sm:$0xff]  ;;  %v2616_v50 = vshll.u32 %v5978_v58, 16 }
 0x12b   : > { %4542 = vmatprep.subr.bf16.mxu0 %v4910_v37  ;;  %v4930_v22 = vld [vmem:[#allocation5 + $0x1d8] sm:$0xff]  }
 0x12c   : > { %v1047_v54 = vsel %vm5775_vm5, %v3779_v23, %v1046_v53  ;;  %v3974_v53 = vld [vmem:[%s5461_s16 + $0x18] sm:$0xf]  ;;  %v5990_v62 = vrot.slane %v2616_v50, 5 }
 0x12d   : > { %4527 = vmatmul.mubr.bf16.gmra.mrb[8].mxu0 %v3929_v29  ;;  %4417 = vmatpush3.bf16.msra.mxu1 %v4911_v13  ;;  %v6485_v13 = vld [vmem:[#allocation26_spill] sm:$0xff]  ;;  %v3782_v29 = vld [vmem:[%s5461_s16 + $0x60] sm:$0xe]  ;;  %v2621_v5 = vshrl.u32 %v3974_v53, 16  ;;  %v2624_v45 = vshll.u32 %v3974_v53, 16 }
 0x12e   : > { %4543 = vmatpush3.bf16.msra.mxu0 %v4910_v37  ;;  %4530 = vmatprep.mubr.bf16.mxu0 %v3930_v56  ;;  %v1094_v59 = vrot.slane %v6485_v13, 5  ;;  %v1043_v37 = vsel %vm5775_vm5, %v3778_v55, %v1042_v27  ;;  %v1079_v56 = vsel %vm5775_vm5, %v3789_v49, %v1078_v34  ;;  %v4931_v27 = vld [vmem:[%s5461_s16 + $0x60] ss:$8 sps:$4 sm:$0xff]   ;;  %v5995_v13 = vld [vmem:[%s5461_s16 + $0x24] sm:$0x1] }
 0x12f   : > { %4544 = vmatprep.subr.bf16.mxu0 %v4912_v42  ;;  %4418 = vmatprep.subr.bf16.mxu1 %v4915_v16  ;;  %v3799_v52 = vcombine.low %v1043_v37, %v1047_v54  ;;  %v3800_v4 = vcombine.low %v1075_v61, %v1079_v56  ;;  %v2623_v34 = vrot.slane %v2621_v5, 4  ;;  %v2626_v44 = vrot.slane %v2624_v45, 5  ;;  %v3976_v49 = vld [vmem:[%s5461_s16 + $0x20] sm:$0xf]  ;;  %v4940_v5 = vld [vmem:[#allocation5 + $0x1f0] sm:$0xff]   ;;  %v4941_v45 = vld [vmem:[#allocation5 + $0xf8] sm:$0xff]  }
 0x130   : > { %4403 = vmatmul.mubr.bf16.gmra.mrb[12].mxu1 %v3739_v17  ;;  %v5954_v63 = vsel %vm5775_vm5, %v3793_v26, %v1094_v59  ;;  %v3978_v59 = vld [vmem:[%s5461_s16 + $0x28] sm:$0xf]  ;;  %v2635_v37 = vshrl.u32 %v3976_v49, 16  ;;  %v2638_v54 = vshll.u32 %v3976_v49, 16  ;;  %v2644_v61 = vshll.u32 %v5995_v13, 16 }
 0x131   : > { %4419 = vmatpush3.bf16.msra.mxu1 %v4915_v16  ;;  %4422 = vmatprep.mubr.bf16.mxu1 %v3796_v14  ;;  %v3792_v14 = vrot.slane %v3784_v0, 9  ;;  %v3787_v16 = vld [vmem:[%s5461_s16 + $0x88] sm:$0xe] }
 0x132   : > { %4545 = vmatpush3.bf16.msra.mxu0 %v4912_v42  ;;  %4420 = vmatprep.subr.bf16.mxu1 %v4917_v19  ;;  %v3786_v42 = vld [vmem:[%s5461_s16 + $0x80] sm:$0xe]  ;;  %v3795_v17 = vrot.slane %v3787_v16, 9  ;;  %v4935_v26 = vld [vmem:[#allocation5 + $0xe8] sm:$0xff]   ;;  %v2652_v16 = vshll.u32 %v3978_v59, 16  ;;  %v2640_v21 = vrot.slane %v2638_v54, 5 }
 0x133   : > { %4546 = vmatprep.subr.bf16.mxu0 %v4916_v28  ;;  %v5950_v48 = vsel %vm5775_vm5, %v3792_v14, %v1090_v25  ;;  %v2630_v25 = vshll.u32 %v5985_v9, 16  ;;  %v4934_v14 = vld [vmem:[#allocation5 + $0x1e0] sm:$0xff]   ;;  %v3986_v49 = vld [vmem:[%s5461_s16 + $0x48] sm:$0xf] }
 0x134   : > { %v3802_v3 = vcombine.low %v5950_v48, %v5954_v63  ;;  %v5970_v10 = vsel %vm5775_vm5, %v3795_v17, %v1102_v60  ;;  %v2654_v41 = vrot.slane %v2652_v16, 5  ;;  %v4936_v60 = vld [vmem:[#allocation5 + $0x1e8] sm:$0xff]  }
 0x135   : > { %4531 = vmatmul.mubr.bf16.gmra.mrb[12].mxu0 %v3931_v24  ;;  %4421 = vmatpush3.bf16.msra.mxu1 %v4917_v19  ;;  %v6488_v19 = vld [vmem:[#allocation23_spill] sm:$0xff]  ;;  %v2632_v8 = vrot.slane %v2630_v25, 5  ;;  %v4943_v48 = vld [vmem:[%s5461_s16 + $0x8] ss:$8 sps:$4 sm:$0xff]   ;;  %v6035_v25 = vld [vmem:[%s5461_s16 + $0x44] sm:$0x1] }
 0x136   : > { %4547 = vmatpush3.bf16.msra.mxu0 %v4916_v28  ;;  %4550 = vmatprep.mubr.bf16.mxu0 %v4919_v46  ;;  %v3790_v28 = vrot.slane %v3782_v29, 9  ;;  %v1082_v20 = vrot.slane %v6488_v19, 5  ;;  %v1086_v46 = vrot.slane %v6489_v30, 5  ;;  %v4929_v24 = vld [vmem:[#allocation5 + $0xd8] sm:$0xff]   ;;  %v6017_v30 = vld [vmem:[%s5461_s16 + $0x34] sm:$0x1] }
 0x137   : > { %4548 = vmatprep.subr.bf16.mxu0 %v4918_v15  ;;  %4438 = vmatprep.subr.bf16.mxu1 %v4920_v36 }
 0x138   : > { %4423 = vmatmul.mubr.bf16.vlgmr.msra.gmra.mrb[0].mxu1 %v3797_v57  ;;  %v3794_v57 = vrot.slane %v3786_v42, 9  ;;  %v1083_v18 = vsel %vm5775_vm5, %v3790_v28, %v1082_v20  ;;  %v1087_v23 = vsel %vm5775_vm5, %v3791_v2, %v1086_v46  ;;  %v2649_v42 = vshrl.u32 %v3978_v59, 16  ;;  %v4938_v28 = vld [vmem:[#allocation5 + $0xf0] sm:$0xff]   ;;  %v3982_v46 = vld [vmem:[%s5461_s16 + $0x38] sm:$0xf] }
 0x139   : > { %4439 = vmatpush3.bf16.msra.mxu1 %v4920_v36  ;;  %4426 = vmatprep.mubr.bf16.mxu1 %v3798_v43  ;;  %v3972_v36 = vld [vmem:[%s5461_s16 + $0x10] sm:$0xf]  ;;  %v3801_v0 = vcombine.low %v1083_v18, %v1087_v23  ;;  %v6008_v20 = vrot.slane %v2644_v61, 5  ;;  %v2677_v53 = vshrl.u32 %v3982_v46, 16  ;;  %v2700_v61 = vshll.u32 %v6035_v25, 16 }
 0x13a   : > { %4549 = vmatpush3.bf16.msra.mxu0 %v4918_v15  ;;  %4440 = vmatprep.subr.bf16.mxu1 %v4923_v31  ;;  %v5966_v32 = vsel %vm5775_vm5, %v3794_v57, %v1098_v7  ;;  %v4927_v15 = vld [vmem:[%s5461_s16 + $0x40] ss:$8 sps:$4 sm:$0xff]   ;;  %v2607_v51 = vshrl.u32 %v3972_v36, 16  ;;  %v2610_v55 = vshll.u32 %v3972_v36, 16  ;;  %v2637_v57 = vrot.slane %v2635_v37, 4  ;;  %v4942_v37 = vld [vmem:[#allocation5 + $0x1f8] sm:$0xff]  }
 0x13b   : > { %4566 = vmatprep.subr.bf16.mxu0 %v4922_v33  ;;  %v3803_v6 = vcombine.low %v5966_v32, %v5970_v10  ;;  %v4937_v7 = vld [vmem:[%s5461_s16 + $0x80] ss:$8 sps:$4 sm:$0xff]   ;;  %v2651_v17 = vrot.slane %v2649_v42, 4  ;;  %v3980_v2 = vld [vmem:[%s5461_s16 + $0x30] sm:$0xf]  ;;  %v2672_v36 = vshll.u32 %v6017_v30, 16 }
 0x13c   : > { %v2612_v43 = vrot.slane %v2610_v55, 5  ;;  %v2641_v19 = vor.u32 %v2640_v21, %v2637_v57  ;;  %v2708_v32 = vshll.u32 %v3986_v49, 16  ;;  %v4944_v10 = vld [vmem:[%s5461_s16 + $0x18] ss:$8 sps:$4 sm:$0xff]  }
 0x13d   : > { %4551 = vmatmul.mubr.bf16.vlgmr.msra.gmra.mrb[0].mxu0 %v4921_v1  ;;  %4441 = vmatpush3.bf16.msra.mxu1 %v4923_v31  ;;  %v4932_v31 = vld [vmem:[#allocation5 + $0xe0] sm:$0xff]   ;;  %v5999_v1 = vld [vmem:[%s5461_s16 + $0x2c] sm:$0x1] }
 0x13e   : > { %4567 = vmatpush3.bf16.msra.mxu0 %v4922_v33  ;;  %4554 = vmatprep.mubr.bf16.mxu0 %v4925_v47  ;;  %v2609_v33 = vrot.slane %v2607_v51, 4  ;;  %v2627_v47 = vor.u32 %v2626_v44, %v2623_v34  ;;  %v2642_v63 = vrot.slane %v2641_v19, 4  ;;  %v2680_v51 = vshll.u32 %v3982_v46, 16  ;;  %v3984_v44 = vld [vmem:[%s5461_s16 + $0x40] sm:$0xf] }
 0x13f   : > { %4568 = vmatprep.subr.bf16.mxu0 %v4924_v11  ;;  %4442 = vmatprep.subr.bf16.mxu1 %v4926_v35  ;;  %v2710_v21 = vrot.slane %v2708_v32, 5  ;;  %v6058_v19 = vld [vmem:[%s5461_s16 + $0x64] sm:$0x1] }
 0x140   : > { %4427 = vmatmul.mubr.bf16.gmra.mrb[4].mxu1 %v3799_v52  ;;  %v2613_v12 = vor.u32 %v2612_v43, %v2609_v33  ;;  %v2628_v56 = vrot.slane %v2627_v47, 4  ;;  %v2682_v33 = vrot.slane %v2680_v51, 5  ;;  %v2694_v47 = vshll.u32 %v3984_v44, 16 }
 0x141   : > { %4443 = vmatpush3.bf16.msra.mxu1 %v4926_v35  ;;  %4430 = vmatprep.mubr.bf16.mxu1 %v3800_v4  ;;  %v4933_v35 = vld [vmem:[%s5461_s16 + $0x70] ss:$8 sps:$4 sm:$0xff]   ;;  %v2655_v4 = vor.u32 %v2654_v41, %v2651_v17 }
 0x142   : > { %4569 = vmatpush3.bf16.msra.mxu0 %v4924_v11  ;;  %4444 = vmatprep.subr.bf16.mxu1 %v4929_v24  ;;  %v2614_v29 = vrot.slane %v2613_v12, 4  ;;  %v2658_v11 = vshll.u32 %v5999_v1, 16  ;;  %v4947_v41 = vld [vmem:[%s5461_s16 + $0x28] ss:$8 sps:$4 sm:$0xff]  }
 0x143   : > { %4570 = vmatprep.subr.bf16.mxu0 %v4928_v40  ;;  %v2656_v18 = vrot.slane %v2655_v4, 4  ;;  %v3990_v4 = vld [vmem:[%s5461_s16 + $0x68] sm:$0xf] }
 0x144   : > { %v6010_v52 = vrot.slane %v2658_v11, 5  ;;  %v2696_v11 = vrot.slane %v2694_v47, 5 }
 0x145   : > { %4555 = vmatmul.mubr.bf16.gmra.mrb[4].mxu0 %v4927_v15  ;;  %4445 = vmatpush3.bf16.msra.mxu1 %v4929_v24  ;;  %v2663_v24 = vshrl.u32 %v3980_v2, 16  ;;  %v2666_v15 = vshll.u32 %v3980_v2, 16  ;;  %v6069_v2 = vld [vmem:[%s5461_s16 + $0x6c] sm:$0x1] }
 0x146   : > { %4571 = vmatpush3.bf16.msra.mxu0 %v4928_v40  ;;  %4558 = vmatprep.mubr.bf16.mxu0 %v4931_v27  ;;  %v2619_v40 = vsel %vm5509_vm2, %v2614_v29, %v5990_v62  ;;  %v2633_v27 = vsel %vm5509_vm2, %v2628_v56, %v2632_v8  ;;  %v2647_v62 = vsel %vm5509_vm2, %v2642_v63, %v6008_v20  ;;  %v2705_v29 = vshrl.u32 %v3986_v49, 16  ;;  %v6053_v56 = vld [vmem:[#allocation5 + $0x208] sm:$0xff]  }
 0x147   : > { %4572 = vmatprep.subr.bf16.mxu0 %v4930_v22  ;;  %4446 = vmatprep.subr.bf16.mxu1 %v4932_v31  ;;  %v2665_v55 = vrot.slane %v2663_v24, 4  ;;  %v2668_v23 = vrot.slane %v2666_v15, 5  ;;  %v4004_v43 = vcombine.low %v2619_v40, %v2633_v27  ;;  %v2661_v12 = vsel %vm5509_vm2, %v2656_v18, %v6010_v52 }
 0x148   : > { %4431 = vmatmul.mubr.bf16.gmra.mrb[8].mxu1 %v3801_v0  ;;  %v4939_v0 = vld [vmem:[%s5461_s16 + $0x90] ss:$8 sps:$4 sm:$0xff]   ;;  %v2707_v57 = vrot.slane %v2705_v29, 4  ;;  %v4005_v17 = vcombine.low %v2647_v62, %v2661_v12  ;;  %v6065_v40 = vrot.slane %v2700_v61, 5  ;;  %v2744_v24 = vshll.u32 %v6058_v19, 16 }
 0x149   : > { %4447 = vmatpush3.bf16.msra.mxu1 %v4932_v31  ;;  %4434 = vmatprep.mubr.bf16.mxu1 %v3802_v3  ;;  %v6022_v3 = vld [vmem:[%s5461_s16 + $0x3c] sm:$0x1]  ;;  %v2679_v31 = vrot.slane %v2677_v53, 4  ;;  %v2669_v34 = vor.u32 %v2668_v23, %v2665_v55  ;;  %v2749_v15 = vshrl.u32 %v3990_v4, 16  ;;  %v2752_v18 = vshll.u32 %v3990_v4, 16  ;;  %v6075_v55 = vld [vmem:[#allocation5 + $0x210] sm:$0xff]  }
 0x14a   : > { %4573 = vmatpush3.bf16.msra.mxu0 %v4930_v22  ;;  %4448 = vmatprep.subr.bf16.mxu1 %v4935_v26  ;;  %v2686_v50 = vshll.u32 %v6022_v3, 16  ;;  %v6028_v22 = vrot.slane %v2672_v36, 5  ;;  %v2758_v53 = vshll.u32 %v6069_v2, 16  ;;  %v6081_v62 = vld [vmem:[%s5461_s16 + $0x74] sm:$0x1] }
 0x14b   : > { %4574 = vmatprep.subr.bf16.mxu0 %v4934_v14  ;;  %v2683_v59 = vor.u32 %v2682_v33, %v2679_v31  ;;  %v2754_v31 = vrot.slane %v2752_v18, 5  ;;  %v6090_v12 = vld [vmem:[%s5461_s16 + $0x7c] sm:$0x1]  ;;  %v6110_v4 = vld [vmem:[%s5461_s16 + $0x84] sm:$0x1] }
 0x14c   : > { %v2688_v54 = vrot.slane %v2686_v50, 5  ;;  %v2746_v50 = vrot.slane %v2744_v24, 5  ;;  %v2760_v33 = vrot.slane %v2758_v53, 5  ;;  %v6123_v53 = vld [vmem:[#allocation5 + $0x220] sm:$0xff]  }
 0x14d   : > { %4559 = vmatmul.mubr.bf16.gmra.mrb[8].mxu0 %v4933_v35  ;;  %4449 = vmatpush3.bf16.msra.mxu1 %v4935_v26  ;;  %v2691_v26 = vshrl.u32 %v3984_v44, 16  ;;  %v2684_v42 = vrot.slane %v2683_v59, 4  ;;  %v6050_v35 = vld [vmem:[#allocation5 + $0x200] sm:$0xff]  }
 0x14e   : > { %4575 = vmatpush3.bf16.msra.mxu0 %v4934_v14  ;;  %4562 = vmatprep.mubr.bf16.mxu0 %v4937_v7  ;;  %v6046_v14 = vld [vmem:[%s5461_s16 + $0x4c] sm:$0x1]  ;;  %v4951_v44 = vld [vmem:[%s5461_s16 + $0x58] ss:$8 sps:$4 sm:$0xff]  }
 0x14f   : > { %4576 = vmatprep.subr.bf16.mxu0 %v4936_v60  ;;  %4450 = vmatprep.subr.bf16.mxu1 %v4938_v28  ;;  %v2693_v16 = vrot.slane %v2691_v26, 4  ;;  %v2714_v7 = vshll.u32 %v6046_v14, 16  ;;  %v2689_v52 = vsel %vm5509_vm2, %v2684_v42, %v2688_v54 }
 0x150   : > { %4435 = vmatmul.mubr.bf16.gmra.mrb[12].mxu1 %v3803_v6  ;;  %v2670_v6 = vrot.slane %v2669_v34, 4 }
 0x151   : > { %4451 = vmatpush3.bf16.msra.mxu1 %v4938_v28  ;;  %4454 = vmatprep.mubr.bf16.mxu1 %v4943_v48  ;;  %v2697_v8 = vor.u32 %v2696_v11, %v2693_v16  ;;  %v3988_v28 = vld [vmem:[%s5461_s16 + $0x60] sm:$0xf]  ;;  %v2716_v36 = vrot.slane %v2714_v7, 5  ;;  %v6098_v16 = vld [vmem:[#allocation5 + $0x218] sm:$0xff]  }
 0x152   : > { %4577 = vmatpush3.bf16.msra.mxu0 %v4936_v60  ;;  %4452 = vmatprep.subr.bf16.mxu1 %v4941_v45  ;;  %v2711_v60 = vor.u32 %v2710_v21, %v2707_v57  ;;  %v2675_v20 = vsel %vm5509_vm2, %v2670_v6, %v6028_v22  ;;  %v2735_v46 = vshrl.u32 %v3988_v28, 16  ;;  %v2738_v63 = vshll.u32 %v3988_v28, 16  ;;  %v4948_v22 = vld [vmem:[%s5461_s16 + $0x38] ss:$8 sps:$4 sm:$0xff]  }
 0x153   : > { %4578 = vmatprep.subr.bf16.mxu0 %v4940_v5  ;;  %v2698_v48 = vrot.slane %v2697_v8, 4  ;;  %v2786_v6 = vshll.u32 %v6090_v12, 16  ;;  %v3146_v28 = vrot.slane %v6081_v62, 5 }
 0x154   : > { %v2737_v27 = vrot.slane %v2735_v46, 4  ;;  %v2712_v51 = vrot.slane %v2711_v60, 4  ;;  %v2740_v23 = vrot.slane %v2738_v63, 5  ;;  %v3082_v46 = vrot.slane %v5978_v58, 5  ;;  %v4952_v63 = vld [vmem:[%s5461_s16 + $0x68] ss:$8 sps:$4 sm:$0xff]  }
 0x155   : > { %4563 = vmatmul.mubr.bf16.gmra.mrb[12].mxu0 %v4939_v0  ;;  %4453 = vmatpush3.bf16.msra.mxu1 %v4941_v45  ;;  %v4006_v45 = vcombine.low %v2675_v20, %v2689_v52  ;;  %v2703_v34 = vsel %vm5509_vm2, %v2698_v48, %v6065_v40  ;;  %v3994_v0 = vld [vmem:[%s5461_s16 + $0x78] sm:$0xf]  ;;  %v2788_v60 = vrot.slane %v2786_v6, 5  ;;  %v3996_v40 = vld [vmem:[%s5461_s16 + $0x80] sm:$0xf] }
 0x156   : > { %4579 = vmatpush3.bf16.msra.mxu0 %v4940_v5  ;;  %4582 = vmatprep.mubr.bf16.mxu0 %v4004_v43  ;;  %v2751_v5 = vrot.slane %v2749_v15, 4  ;;  %v3992_v43 = vld [vmem:[%s5461_s16 + $0x70] sm:$0xf]  ;;  %v2741_v49 = vor.u32 %v2740_v23, %v2737_v27  ;;  %v2777_v54 = vshrl.u32 %v3994_v0, 16  ;;  %v2780_v61 = vshll.u32 %v3994_v0, 16 }
 0x157   : > { %4580 = vmatprep.subr.bf16.mxu0 %v4942_v37  ;;  %4630 = vmatprep.subr.bf16.mxu1 %v6050_v35  ;;  %v2763_v59 = vshrl.u32 %v3992_v43, 16  ;;  %v2766_v26 = vshll.u32 %v3992_v43, 16  ;;  %v2717_v42 = vsel %vm5509_vm2, %v2712_v51, %v2716_v36  ;;  %v3998_v15 = vld [vmem:[%s5461_s16 + $0x88] sm:$0xf]  ;;  %v6118_v36 = vld [vmem:[%s5461_s16 + $0x8c] sm:$0x1] }
 0x158   : > { %4455 = vmatmul.mubr.bf16.vlgmr.msra.gmra.mrb[0].mxu1 %v4944_v10  ;;  %v2755_v47 = vor.u32 %v2754_v31, %v2751_v5  ;;  %v2742_v29 = vrot.slane %v2741_v49, 4  ;;  %v2779_v57 = vrot.slane %v2777_v54, 4  ;;  %v2782_v21 = vrot.slane %v2780_v61, 5  ;;  %v6128_v5 = vld [vmem:[#allocation5 + $0x228] sm:$0xff]   ;;  %v4002_v61 = vld [vmem:[%s5461_s16 + $0x98] sm:$0xf] }
 0x159   : > { %4638 = vmatpush3.bf16.msra.mxu1 %v6050_v35  ;;  %4458 = vmatprep.mubr.bf16.mxu1 %v4947_v41  ;;  %v2765_v32 = vrot.slane %v2763_v59, 4  ;;  %v2768_v10 = vrot.slane %v2766_v26, 5  ;;  %v4007_v20 = vcombine.low %v2703_v34, %v2717_v42  ;;  %v2791_v27 = vshrl.u32 %v3996_v40, 16  ;;  %v4000_v26 = vld [vmem:[%s5461_s16 + $0x90] sm:$0xf] }
 0x15a   : > { %4581 = vmatpush3.bf16.msra.mxu0 %v4942_v37  ;;  %4631 = vmatprep.subr.bf16.mxu1 %v6053_v56  ;;  %v2772_v37 = vshll.u32 %v6081_v62, 16  ;;  %v2756_v11 = vrot.slane %v2755_v47, 4  ;;  %v2747_v7 = vsel %vm5509_vm2, %v2742_v29, %v2746_v50  ;;  %v2783_v41 = vor.u32 %v2782_v21, %v2779_v57  ;;  %v6137_v47 = vld [vmem:[%s5461_s16 + $0x94] sm:$0x1]  ;;  %v6143_v29 = vld [vmem:[%s5461_s16 + $0x9c] sm:$0x1] }
 0x15b   : > { %4598 = vmatprep.subr.bf16.mxu0 %v6050_v35  ;;  %v2769_v8 = vor.u32 %v2768_v10, %v2765_v32  ;;  %v2794_v51 = vshll.u32 %v3996_v40, 16  ;;  %v2805_v23 = vshrl.u32 %v3998_v15, 16  ;;  %v2814_v31 = vshll.u32 %v6118_v36, 16  ;;  %v6146_v57 = vld [vmem:[#allocation5 + $0x230] sm:$0xff]  }
 0x15c   : > { %v2784_v24 = vrot.slane %v2783_v41, 4  ;;  %v3086_v49 = vrot.slane %v5985_v9, 5  ;;  %v2819_v32 = vshrl.u32 %v4000_v26, 16  ;;  %v2822_v10 = vshll.u32 %v4000_v26, 16  ;;  %v4956_v41 = vld [vmem:[%s5461_s16 + $0x88] ss:$8 sps:$4 sm:$0xff]  }
 0x15d   : > { %4583 = vmatmul.mubr.bf16.vlgmr.msra.gmra.mrb[0].mxu0 %v4005_v17  ;;  %4639 = vmatpush3.bf16.msra.mxu1 %v6053_v56  ;;  %v2761_v17 = vsel %vm5509_vm2, %v2756_v11, %v2760_v33  ;;  %v2770_v52 = vrot.slane %v2769_v8, 4  ;;  %v4955_v33 = vld [vmem:[%s5461_s16 + $0x78] ss:$8 sps:$4 sm:$0xff]   ;;  %v2796_v43 = vrot.slane %v2794_v51, 5  ;;  %v2816_v59 = vrot.slane %v2814_v31, 5 }
 0x15e   : > { %4599 = vmatpush3.bf16.msra.mxu0 %v6050_v35  ;;  %4586 = vmatprep.mubr.bf16.mxu0 %v4006_v45  ;;  %v2774_v35 = vrot.slane %v2772_v37, 5  ;;  %v4008_v48 = vcombine.low %v2747_v7, %v2761_v17  ;;  %v2789_v50 = vsel %vm5509_vm2, %v2784_v24, %v2788_v60  ;;  %v2793_v45 = vrot.slane %v2791_v27, 4  ;;  %v4020_v24 = vld [vmem:[%s5461_s16 + $0x10] sm:$0xe] }
 0x15f   : > { %4600 = vmatprep.subr.bf16.mxu0 %v6053_v56  ;;  %4632 = vmatprep.subr.bf16.mxu1 %v6075_v55  ;;  %v2828_v6 = vshll.u32 %v6137_v47, 16  ;;  %v2833_v42 = vshrl.u32 %v4002_v61, 16  ;;  %v2836_v11 = vshll.u32 %v4002_v61, 16  ;;  %v2821_v7 = vrot.slane %v2819_v32, 4  ;;  %v4038_v26 = vld [vmem:[%s5461_s16 + $0x70] sm:$0xe] }
 0x160   : > { %4459 = vmatmul.mubr.bf16.gmra.mrb[4].mxu1 %v4948_v22  ;;  %v2775_v18 = vsel %vm5509_vm2, %v2770_v52, %v2774_v35  ;;  %v2808_v22 = vshll.u32 %v3998_v15, 16  ;;  %v2797_v54 = vor.u32 %v2796_v43, %v2793_v45  ;;  %v2824_v8 = vrot.slane %v2822_v10, 5  ;;  %v4024_v10 = vld [vmem:[%s5461_s16 + $0x30] sm:$0xe] }
 0x161   : > { %4640 = vmatpush3.bf16.msra.mxu1 %v6075_v55  ;;  %4462 = vmatprep.mubr.bf16.mxu1 %v4951_v44  ;;  %v2807_v44 = vrot.slane %v2805_v23, 4  ;;  %v4009_v37 = vcombine.low %v2775_v18, %v2789_v50  ;;  %v2842_v35 = vshll.u32 %v6143_v29, 16  ;;  %v2830_v60 = vrot.slane %v2828_v6, 5  ;;  %v4021_v18 = vld [vmem:[%s5461_s16 + $0x18] sm:$0xe] }
 0x162   : > { %4601 = vmatpush3.bf16.msra.mxu0 %v6053_v56  ;;  %4633 = vmatprep.subr.bf16.mxu1 %v6098_v16  ;;  %v2800_v56 = vshll.u32 %v6110_v4, 16  ;;  %v2810_v0 = vrot.slane %v2808_v22, 5  ;;  %v2798_v21 = vrot.slane %v2797_v54, 4  ;;  %v2838_v52 = vrot.slane %v2836_v11, 5  ;;  %v6164_v22 = vld [vmem:[#allocation5 + $0x238] sm:$0xff]  }
 0x163   : > { %4602 = vmatprep.subr.bf16.mxu0 %v6075_v55  ;;  %v3138_v15 = vrot.slane %v6058_v19, 5  ;;  %v4028_v51 = vrot.slane %v4020_v24, 9  ;;  %v3142_v23 = vrot.slane %v6069_v2, 5  ;;  %v4029_v31 = vrot.slane %v4021_v18, 9  ;;  %v4037_v19 = vld [vmem:[%s5461_s16 + $0x68] sm:$0xe] }
 0x164   : > { %v2802_v34 = vrot.slane %v2800_v56, 5  ;;  %v4036_v56 = vld [vmem:[%s5461_s16 + $0x60] sm:$0xe]  ;;  %v3150_v54 = vrot.slane %v6090_v12, 5  ;;  %v3090_v9 = vrot.slane %v5995_v13, 5  ;;  %v3094_v11 = vrot.slane %v5999_v1, 5 }
 0x165   : > { %4587 = vmatmul.mubr.bf16.gmra.mrb[4].mxu0 %v4007_v20  ;;  %4641 = vmatpush3.bf16.msra.mxu1 %v6098_v16  ;;  %v2835_v20 = vrot.slane %v2833_v42, 4  ;;  %v3083_v2 = vsel %vm5775_vm5, %v4028_v51, %v3082_v46  ;;  %v4040_v12 = vld [vmem:[%s5461_s16 + $0x80] sm:$0xe]  ;;  %v3158_v24 = vrot.slane %v6118_v36, 5  ;;  %v3162_v51 = vrot.slane %v6137_v47, 5 }
 0x166   : > { %4603 = vmatpush3.bf16.msra.mxu0 %v6075_v55  ;;  %4590 = vmatprep.mubr.bf16.mxu0 %v4008_v48  ;;  %v2811_v55 = vor.u32 %v2810_v0, %v2807_v44  ;;  %v2803_v40 = vsel %vm5509_vm2, %v2798_v21, %v2802_v34  ;;  %v2825_v48 = vor.u32 %v2824_v8, %v2821_v7  ;;  %v4045_v34 = vrot.slane %v4037_v19, 9  ;;  %v4022_v44 = vld [vmem:[%s5461_s16 + $0x20] sm:$0xe]  ;;  %v4023_v0 = vld [vmem:[%s5461_s16 + $0x28] sm:$0xe] }
 0x167   : > { %4604 = vmatprep.subr.bf16.mxu0 %v6098_v16  ;;  %4634 = vmatprep.subr.bf16.mxu1 %v6123_v53  ;;  %v2839_v27 = vor.u32 %v2838_v52, %v2835_v20  ;;  %v4030_v46 = vrot.slane %v4022_v44, 9  ;;  %v4031_v42 = vrot.slane %v4023_v0, 9  ;;  %v4046_v21 = vrot.slane %v4038_v26, 9 }
 0x168   : > { %4463 = vmatmul.mubr.bf16.gmra.mrb[8].mxu1 %v4952_v63  ;;  %v2812_v17 = vrot.slane %v2811_v55, 4  ;;  %v2844_v63 = vrot.slane %v2842_v35, 5  ;;  %v2826_v45 = vrot.slane %v2825_v48, 4  ;;  %v3143_v32 = vsel %vm5775_vm5, %v4045_v34, %v3142_v23  ;;  %v4043_v48 = vld [vmem:[%s5461_s16 + $0x98] sm:$0xe] }
 0x169   : > { %4642 = vmatpush3.bf16.msra.mxu1 %v6123_v53  ;;  %4466 = vmatprep.mubr.bf16.mxu1 %v4955_v33  ;;  %v4044_v33 = vrot.slane %v4036_v56, 9  ;;  %v2840_v43 = vrot.slane %v2839_v27, 4  ;;  %v4032_v8 = vrot.slane %v4024_v10, 9  ;;  %v3091_v13 = vsel %vm5775_vm5, %v4030_v46, %v3090_v9  ;;  %v4027_v27 = vld [vmem:[%s5461_s16 + $0x48] sm:$0xe] }
 0x16a   : > { %4605 = vmatpush3.bf16.msra.mxu0 %v6098_v16  ;;  %4635 = vmatprep.subr.bf16.mxu1 %v6128_v5  ;;  %v2817_v16 = vsel %vm5509_vm2, %v2812_v17, %v2816_v59  ;;  %v2831_v59 = vsel %vm5509_vm2, %v2826_v45, %v2830_v60  ;;  %v3098_v35 = vrot.slane %v6017_v30, 5  ;;  %v3102_v17 = vrot.slane %v6022_v3, 5 }
 0x16b   : > { %4606 = vmatprep.subr.bf16.mxu0 %v6123_v53  ;;  %v4010_v50 = vcombine.low %v2803_v40, %v2817_v16  ;;  %v3139_v58 = vsel %vm5775_vm5, %v4044_v33, %v3138_v15  ;;  %v2845_v61 = vsel %vm5509_vm2, %v2840_v43, %v2844_v63  ;;  %v3147_v60 = vsel %vm5775_vm5, %v4046_v21, %v3146_v28  ;;  %v4042_v40 = vld [vmem:[%s5461_s16 + $0x90] sm:$0xe]  ;;  %v4026_v15 = vld [vmem:[%s5461_s16 + $0x40] sm:$0xe] }
 0x16c   : > { %v4011_v55 = vcombine.low %v2831_v59, %v2845_v61  ;;  %v4056_v6 = vcombine.low %v3139_v58, %v3143_v32  ;;  %v4048_v52 = vrot.slane %v4040_v12, 9  ;;  %v3154_v3 = vrot.slane %v6110_v4, 5 }
 0x16d   : > { %4591 = vmatmul.mubr.bf16.gmra.mrb[8].mxu0 %v4009_v37  ;;  %4643 = vmatpush3.bf16.msra.mxu1 %v6128_v5  ;;  %v4039_v37 = vld [vmem:[%s5461_s16 + $0x78] sm:$0xe]  ;;  %v3099_v62 = vsel %vm5775_vm5, %v4032_v8, %v3098_v35  ;;  %v4050_v18 = vrot.slane %v4042_v40, 9  ;;  %v4051_v56 = vrot.slane %v4043_v48, 9  ;;  %v4034_v45 = vrot.slane %v4026_v15, 9 }
 0x16e   : > { %4607 = vmatpush3.bf16.msra.mxu0 %v6123_v53  ;;  %4636 = vmatprep.subr.bf16.mxu1 %v6146_v57  ;;  %v3087_v53 = vsel %vm5775_vm5, %v4029_v31, %v3086_v49  ;;  %v4025_v49 = vld [vmem:[%s5461_s16 + $0x38] sm:$0xe]  ;;  %v4047_v7 = vrot.slane %v4039_v37, 9  ;;  %v3155_v4 = vsel %vm5775_vm5, %v4048_v52, %v3154_v3  ;;  %v3166_v36 = vrot.slane %v6143_v29, 5  ;;  %v4187_v3 = vld [vmem:[%s5478_s23 + $0x20] sm:$0xff]  }
 0x16f   : > { %4608 = vmatprep.subr.bf16.mxu0 %v6128_v5  ;;  %4594 = vmatprep.mubr.bf16.mxu0 %v4010_v50  ;;  %v4052_v39 = vcombine.low %v3083_v2, %v3087_v53  ;;  %v4033_v1 = vrot.slane %v4025_v49, 9  ;;  %v3106_v31 = vrot.slane %v6035_v25, 5  ;;  %v4035_v19 = vrot.slane %v4027_v27, 9 }
 0x170   : > { %4467 = vmatmul.mubr.bf16.gmra.mrb[12].mxu1 %v4956_v41  ;;  %v3095_v41 = vsel %vm5775_vm5, %v4031_v42, %v3094_v11  ;;  %v3151_v20 = vsel %vm5775_vm5, %v4047_v7, %v3150_v54  ;;  %v3110_v33 = vrot.slane %v6046_v14, 5  ;;  %v3163_v43 = vsel %vm5775_vm5, %v4050_v18, %v3162_v51 }
 0x171   : > { %4644 = vmatpush3.bf16.msra.mxu1 %v6146_v57  ;;  %4622 = vmatprep.mubr.bf16.mxu1 %v4056_v6  ;;  %v4057_v30 = vcombine.low %v3147_v60, %v3151_v20  ;;  %v3103_v28 = vsel %vm5775_vm5, %v4033_v1, %v3102_v17  ;;  %v4053_v16 = vcombine.low %v3091_v13, %v3095_v41  ;;  %v6262_v17 = vld [vmem:[%s5478_s23 + $0x8] sm:$0xff]   ;;  %v6267_v20 = vld [vmem:[#allocation7] ss:$0 sm:$0xff] }
 0x172   : > { %4609 = vmatpush3.bf16.msra.mxu0 %v6128_v5  ;;  %4637 = vmatprep.subr.bf16.mxu1 %v6164_v22  ;;  %v4041_v5 = vld [vmem:[%s5461_s16 + $0x88] sm:$0xe]  ;;  %v4054_v23 = vcombine.low %v3099_v62, %v3103_v28  ;;  %v3167_v47 = vsel %vm5775_vm5, %v4051_v56, %v3166_v36  ;;  %v3107_v29 = vsel %vm5775_vm5, %v4034_v45, %v3106_v31  ;;  %v6275_v28 = vld [vmem:[#allocation8] ss:$0 sm:$0xff] }
 0x173   : > { %4610 = vmatprep.subr.bf16.mxu0 %v6146_v57  ;;  %v4049_v63 = vrot.slane %v4041_v5, 9  ;;  %v4059_v2 = vcombine.low %v3163_v43, %v3167_v47  ;;  %v4188_v5 = vld [vmem:[%s5478_s23 + $0x28] sm:$0xff]   ;;  %v6281_v56 = vld [vmem:[%s5478_s23 + $0x18] sm:$0xff]  }
 0x174   : > { %v4135_v45 = vunpack.c.h.bf16 %v4188_v5  ;;  %v6286_v31 = vld [vmem:[%s5478_s23 + $0x38] sm:$0xff]  }
 0x175   : > { %4595 = vmatmul.mubr.bf16.gmra.mrb[12].mxu0 %v4011_v55  ;;  %4645 = vmatpush3.bf16.msra.mxu1 %v6164_v22 }
 0x176   : > { %4611 = vmatpush3.bf16.msra.mxu0 %v6146_v57  ;;  %4614 = vmatprep.mubr.bf16.mxu0 %v4052_v39  ;;  %v3159_v57 = vsel %vm5775_vm5, %v4049_v63, %v3158_v24  ;;  %v4118_v63 = vunpack.c.l.bf16 %v6262_v17  ;;  %v4134_v24 = vunpack.c.l.bf16 %v4188_v5 }
 0x177   : > { %4612 = vmatprep.subr.bf16.mxu0 %v6164_v22  ;;  %v4058_v50 = vcombine.low %v3155_v4, %v3159_v57  ;;  %v4130_v57 = vunpack.c.l.bf16 %v4187_v3 }
 0x178   : > { %4623 = vmatmul.mubr.bf16.vlgmr.msra.gmra.mrb[16].mxu1 %v4057_v30  ;;  %v6270_v30 = vld [vmem:[%s5478_s23] sm:$0xff]  }
 0x179   : > { %4626 = vmatprep.mubr.bf16.mxu1 %v4058_v50  ;;  %v4114_v27 = vunpack.c.l.bf16 %v6270_v30  ;;  %v4119_v50 = vunpack.c.h.bf16 %v6262_v17  ;;  %v4115_v47 = vunpack.c.h.bf16 %v6270_v30 }
 0x17a   : > { %4613 = vmatpush3.bf16.msra.mxu0 %v6164_v22  ;;  %v3111_v22 = vsel %vm5775_vm5, %v4035_v19, %v3110_v33 }
 0x17b   : > { %v4055_v25 = vcombine.low %v3107_v29, %v3111_v22 }
 0x17d   : > { %4615 = vmatmul.mubr.bf16.vlgmr.msra.gmra.mrb[0].mxu0 %v4053_v16 }
 0x17e   : > { %4618 = vmatprep.mubr.bf16.mxu0 %v4054_v23 }
 0x180   : > { %4627 = vmatmul.mubr.bf16.gmra.mrb[20].mxu1 %v4059_v2  ;;  %v4131_v2 = vunpack.c.h.bf16 %v4187_v3  ;;  %v6308_v3 = vld [vmem:[%s5478_s23 + $0x10] sm:$0xff]  }
 0x185   : > { %4619 = vmatmul.mubr.bf16.gmra.mrb[4].mxu0 %v4055_v25 }
 0x22b   : > { %v4456_v14 = vpop.f32.mrb[0].mxu1 }
 0x22c   : > { %v6243_v34 = vpop.f32.mrb[1].mxu1 }
 0x22d   : > { %v6245_v44 = vpop.f32.mrb[2].mxu1 }
 0x22e   : > { %v6247_v0 = vpop.f32.mrb[3].mxu1 }
 0x233   : > { %v6249_v59 = vpop.f32.mrb[4].mxu1 }
 0x234   : > { %v6251_v53 = vpop.f32.mrb[5].mxu1 }
 0x235   : > { %v6253_v58 = vpop.f32.mrb[6].mxu1 }
 0x236   : > { %v6255_v46 = vpop.f32.mrb[7].mxu1 }
 0x23b   : > { %v4464_v38 = vpop.f32.mrb[8].mxu1 }
 0x23c   : > { %v1511_v26 = vpop.f32.mrb[9].mxu1 }
 0x23d   : > { %v4465_v37 = vpop.f32.mrb[10].mxu1 }
 0x23e   : > { %v1514_v54 = vpop.f32.mrb[11].mxu1 }
 0x240   : > { %v4592_v61 = vpop.f32.mrb[8].mxu0 }
 0x241   : > { %v4654_v32 = vadd.f32 %v4592_v61, %v4464_v38  ;;  %v3009_v9 = vpop.f32.mrb[9].mxu0 }
 0x242   : > { %v4656_v10 = vadd.f32 %v3009_v9, %v1511_v26  ;;  %v4593_v49 = vpop.f32.mrb[10].mxu0  ;;  %v4126_v26 = vunpack.c.l.bf16 %v6281_v56  ;;  %v4142_v9 = vunpack.c.l.bf16 %v6286_v31 }
 0x243   : > { %v4658_v55 = vadd.f32 %v4593_v49, %v4465_v37  ;;  %v3012_v6 = vpop.f32.mrb[11].mxu0  ;;  %v4468_v42 = vpop.f32.mrb[12].mxu1 }
 0x244   : > { %v4660_v11 = vadd.f32 %v3012_v6, %v1514_v54  ;;  %v1527_v12 = vpop.f32.mrb[13].mxu1 }
 0x245   : > { %v4469_v39 = vpop.f32.mrb[14].mxu1 }
 0x246   : > { %v1530_v21 = vpop.f32.mrb[15].mxu1 }
 0x248   : > { %v4596_v7 = vpop.f32.mrb[12].mxu0 }
 0x249   : > { %v6257_v8 = vadd.f32 %v4596_v7, %v4468_v42  ;;  %v3025_v13 = vpop.f32.mrb[13].mxu0 }
 0x24a   : > { %v6259_v35 = vadd.f32 %v3025_v13, %v1527_v12  ;;  %v4597_v1 = vpop.f32.mrb[14].mxu0 }
 0x24b   : > { %v6265_v41 = vadd.f32 %v4597_v1, %v4469_v39  ;;  %v3028_v60 = vpop.f32.mrb[15].mxu0  ;;  %v4624_v52 = vpop.f32.mrb[16].mxu1 }
 0x24c   : > { %v6273_v40 = vadd.f32 %v3028_v60, %v1530_v21  ;;  %v4655_v48 = vadd.f32 %v4654_v32, %v4624_v52  ;;  %v3331_v62 = vpop.f32.mrb[17].mxu1 }
 0x24d   : > { %v4657_v15 = vadd.f32 %v4656_v10, %v3331_v62  ;;  %v4625_v16 = vpop.f32.mrb[18].mxu1 }
 0x24e   : > { %v3395_v4 = vmul.f32 %v4655_v48, %v6267_v20  ;;  %v4659_v18 = vadd.f32 %v4658_v55, %v4625_v16  ;;  %v3334_v51 = vpop.f32.mrb[19].mxu1 }
 0x24f   : > { %v3393_v23 = vmul.f32 %v4657_v15, %v6267_v20  ;;  %v4661_v36 = vadd.f32 %v4660_v11, %v3334_v51 }
 0x250   : > { %v4616_v19 = vpop.f32.mrb[0].mxu0  ;;  %v3418_v33 = vadd.f32 %v6275_v28, %v3395_v4  ;;  %v3396_v43 = vmul.f32 %v4659_v18, %v6267_v20 }
 0x251   : > { %v4646_v29 = vadd.f32 %v4616_v19, %v4456_v14  ;;  %v3299_v22 = vpop.f32.mrb[1].mxu0  ;;  %v3416_v25 = vadd.f32 %v6275_v28, %v3393_v23  ;;  %v3394_v38 = vmul.f32 %v4661_v36, %v6267_v20 }
 0x252   : > { %v3466_v37 = vadd.f32 %v4134_v24, %v3418_v33  ;;  %v4647_v54 = vadd.f32 %v3299_v22, %v6243_v34  ;;  %v4617_v61 = vpop.f32.mrb[2].mxu0  ;;  %v3419_v32 = vadd.f32 %v6275_v28, %v3396_v43 }
 0x253   : > { %v3387_v10 = vmul.f32 %v4646_v29, %v6267_v20  ;;  %v3464_v49 = vadd.f32 %v4130_v57, %v3416_v25  ;;  %v4648_v14 = vadd.f32 %v4617_v61, %v6245_v44  ;;  %v3302_v55 = vpop.f32.mrb[3].mxu0  ;;  %v3417_v6 = vadd.f32 %v6275_v28, %v3394_v38  ;;  %v4628_v42 = vpop.f32.mrb[20].mxu1  ;;  %v4189_v29 = vld [vmem:[%s5478_s23 + $0x30] sm:$0xff]  }
 0x254   : > { %v3482_v11 = vmax.f32 %v3466_v37, 0.0  ;;  %v3385_v12 = vmul.f32 %v4647_v54, %v6267_v20  ;;  %v3467_v39 = vadd.f32 %v4135_v45, %v3419_v32  ;;  %v4649_v34 = vadd.f32 %v3302_v55, %v6247_v0  ;;  %v3347_v21 = vpop.f32.mrb[21].mxu1 }
 0x255   : > { %v3410_v7 = vadd.f32 %v6275_v28, %v3387_v10  ;;  %v3480_v13 = vmax.f32 %v3464_v49, 0.0  ;;  %v3388_v1 = vmul.f32 %v4648_v14, %v6267_v20  ;;  %v3465_v17 = vadd.f32 %v4131_v2, %v3417_v6  ;;  %v4629_v5 = vpop.f32.mrb[22].mxu1 }
 0x256   : > { %v3408_v44 = vadd.f32 %v6275_v28, %v3385_v12  ;;  %v3483_v60 = vmax.f32 %v3467_v39, 0.0  ;;  %v3386_v52 = vmul.f32 %v4649_v34, %v6267_v20  ;;  %v4663_v30 = vadd.f32 %v6257_v8, %v4628_v42  ;;  %v3350_v48 = vpop.f32.mrb[23].mxu1 }
 0x257   : > { %v3458_v62 = vadd.f32 %v4118_v63, %v3410_v7  ;;  %v3411_v0 = vadd.f32 %v6275_v28, %v3388_v1  ;;  %v3481_v24 = vmax.f32 %v3465_v17, 0.0  ;;  %v4665_v15 = vadd.f32 %v6259_v35, %v3347_v21 }
 0x258   : > { %v3456_v16 = vadd.f32 %v4114_v27, %v3408_v44  ;;  %v4172_v4 = vpack.c.bf16 %v3483_v60, %v3482_v11  ;;  %v3409_v57 = vadd.f32 %v6275_v28, %v3386_v52  ;;  %v4620_v18 = vpop.f32.mrb[4].mxu0  ;;  %v3399_v51 = vmul.f32 %v4663_v30, %v6267_v20 }
 0x259   : > { %v3459_v23 = vadd.f32 %v4119_v50, %v3411_v0  ;;  %v4167_v8 = vpack.c.bf16 %v3481_v24, %v3480_v13  ;;  %v4650_v45 = vadd.f32 %v4620_v18, %v6249_v59  ;;  %v3315_v36 = vpop.f32.mrb[5].mxu0  ;;  %v4122_v63 = vunpack.c.l.bf16 %v6308_v3 }
 0x25a   : > { %v3474_v19 = vmax.f32 %v3458_v62, 0.0  ;;  %v3472_v33 = vmax.f32 %v3456_v16, 0.0  ;;  %4195 = vst [vmem:[%s6318_s24 + $0x28] sm:$0xff] %v4172_v4   ;;  %v3457_v35 = vadd.f32 %v4115_v47, %v3409_v57  ;;  %v4651_v27 = vadd.f32 %v3315_v36, %v6251_v53  ;;  %v4621_v43 = vpop.f32.mrb[6].mxu0 }
 0x25b   : > { %v3475_v50 = vmax.f32 %v3459_v23, 0.0  ;;  %4194 = vst [vmem:[%s6318_s24 + $0x20] sm:$0xff] %v4167_v8   ;;  %v3391_v2 = vmul.f32 %v4650_v45, %v6267_v20  ;;  %v3422_v59 = vadd.f32 %v6275_v28, %v3399_v51  ;;  %v4652_v22 = vadd.f32 %v4621_v43, %v6253_v58  ;;  %v3318_v25 = vpop.f32.mrb[7].mxu0 }
 0x25c   : > { %v3473_v38 = vmax.f32 %v3457_v35, 0.0  ;;  %v3389_v37 = vmul.f32 %v4651_v27, %v6267_v20  ;;  %v3397_v47 = vmul.f32 %v4665_v15, %v6267_v20  ;;  %v4667_v53 = vadd.f32 %v6265_v41, %v4629_v5 }
 0x25d   : > { %v4152_v54 = vpack.c.bf16 %v3475_v50, %v3474_v19  ;;  %v3414_v61 = vadd.f32 %v6275_v28, %v3391_v2  ;;  %v3392_v32 = vmul.f32 %v4652_v22, %v6267_v20  ;;  %v4127_v10 = vunpack.c.h.bf16 %v6281_v56 }
 0x25e   : > { %v4147_v49 = vpack.c.bf16 %v3473_v38, %v3472_v33  ;;  %v4138_v14 = vunpack.c.l.bf16 %v4189_v29  ;;  %v3400_v58 = vmul.f32 %v4667_v53, %v6267_v20  ;;  %v4143_v55 = vunpack.c.h.bf16 %v6286_v31 }
 0x25f   : > { %4191 = vst [vmem:[%s6318_s24 + $0x8] sm:$0xff] %v4152_v54   ;;  %v3462_v6 = vadd.f32 %v4126_v26, %v3414_v61  ;;  %v3412_v42 = vadd.f32 %v6275_v28, %v3389_v37  ;;  %v3415_v41 = vadd.f32 %v6275_v28, %v3392_v32  ;;  %v4653_v11 = vadd.f32 %v3318_v25, %v6255_v46 }
 0x260   : > { %4148 = vst [vmem:[%s6318_s24] sm:$0xff] %v4147_v49   ;;  %v3470_v12 = vadd.f32 %v4142_v9, %v3422_v59  ;;  %v3420_v39 = vadd.f32 %v6275_v28, %v3397_v47  ;;  %v3423_v34 = vadd.f32 %v6275_v28, %v3400_v58  ;;  %v4669_v21 = vadd.f32 %v6273_v40, %v3350_v48 }
 0x261   : > { %v3463_v7 = vadd.f32 %v4127_v10, %v3415_v41  ;;  %v3390_v56 = vmul.f32 %v4653_v11, %v6267_v20  ;;  %v4123_v26 = vunpack.c.h.bf16 %v6308_v3  ;;  %v4139_v1 = vunpack.c.h.bf16 %v4189_v29 }
 0x262   : > { %v3471_v13 = vadd.f32 %v4143_v55, %v3423_v34  ;;  %v3398_v46 = vmul.f32 %v4669_v21, %v6267_v20  ;;  %v3478_v31 = vmax.f32 %v3462_v6, 0.0  ;;  %v3460_v9 = vadd.f32 %v4122_v63, %v3412_v42 }
 0x263   : > { %v3479_v17 = vmax.f32 %v3463_v7, 0.0  ;;  %v3413_v5 = vadd.f32 %v6275_v28, %v3390_v56  ;;  %v3486_v44 = vmax.f32 %v3470_v12, 0.0  ;;  %v3468_v40 = vadd.f32 %v4138_v14, %v3420_v39 }
 0x264   : > { %v3487_v60 = vmax.f32 %v3471_v13, 0.0  ;;  %v3421_v52 = vadd.f32 %v6275_v28, %v3398_v46  ;;  %v3476_v62 = vmax.f32 %v3460_v9, 0.0 }
 0x265   : > { %v4162_v30 = vpack.c.bf16 %v3479_v17, %v3478_v31  ;;  %v3461_v3 = vadd.f32 %v4123_v26, %v3413_v5  ;;  %v3484_v24 = vmax.f32 %v3468_v40, 0.0 }
 0x266   : > { %v4182_v48 = vpack.c.bf16 %v3487_v60, %v3486_v44  ;;  %v3469_v20 = vadd.f32 %v4139_v1, %v3421_v52 }
 0x267   : > { %4193 = vst [vmem:[%s6318_s24 + $0x18] sm:$0xff] %v4162_v30   ;;  %v3477_v0 = vmax.f32 %v3461_v3, 0.0 }
 0x268   : > { %4197 = vst [vmem:[%s6318_s24 + $0x38] sm:$0xff] %v4182_v48   ;;  %v3485_v15 = vmax.f32 %v3469_v20, 0.0 }
 0x269   : > { %v4157_v16 = vpack.c.bf16 %v3477_v0, %v3476_v62 }
 0x26a   : > { %v4177_v28 = vpack.c.bf16 %v3485_v15, %v3484_v24 }
 0x26b   : > { %4192 = vst [vmem:[%s6318_s24 + $0x10] sm:$0xff] %v4157_v16  }
 0x26c   : > { %4196 = vst [vmem:[%s6318_s24 + $0x30] sm:$0xff] %v4177_v28  }
 0x26d   : > { %5122 = shalt.err (!%p5119_p7)
}
 0x26e   : > { %s5123_s17 = scalar_lea.hbm %s6359_s29, 1024  ;;  %s5127_s27 = scalar_lea.hbm %s6412_s5, 2048 }
 0x26f   : > { %p5124_p11 = scmp.ne.s32.totalorder %s6359_s29, %s5123_s17  ;;  %p5128_p5 = scmp.lt.u32.totalorder %s6359_s29, %s6412_s5 }
 0x270   : > { %p5129_p12 = scmp.lt.u32.totalorder %s5127_s27, %s5123_s17  ;;  %p5131_p6 = scmp.lt.u32.totalorder %s5123_s17, %s6359_s29 }
 0x271   : > { %p5125_p2 = pnand %p5124_p11, %p6490_p10 }
 0x272   : > { %p5130_p1 = por %p5129_p12, %p5128_p5 }
 0x273   : > { %p5126_p9 = pneg %p5125_p2 }
 0x274   : > { %p5132_p3 = por %p5131_p6, %p5130_p1 }
 0x276   : > { %p5133_p13 = pnand %p5132_p3, %p5126_p9 }
 0x278   : > { %5136 = shalt.err (!%p5133_p13)
}
 0x279   : > { %s5197_s15 = smov 64   ;;  %s5198_s7 = smov 4  }
 0x27a   : > { %4793 = dma.vmem_to_hbm [thread:$0]  (%p6490_p10), %s6361_s12, 1024, %s6359_s29, %s3569_s22, %s5197_s15, %s5197_s15, %s5198_s7  }
 0x27b PF: > { %s6491_s16 = sld [smem:[#allocation18_spill]]  ;;  %s3598_s26 = sand.u32 1, %s5175_s18  }
 0x27c   : > { %p6493_p0 = scmp.ge.s32.totalorder %s5187_s21, 2  ;;  %s3599_s23 = scalar_lea.sflag [#allocation4], %s3598_s26 }
 0x281   : > { %p6492_p8 = scmp.ne.s32.totalorder %s6491_s16, 0 }
 0x283   : > { %p4813_p4 = pnand %p6493_p0, %p6492_p8 }
 0x285   : > { %5170 = dma.done.wait (!%p4813_p4), %s3599_s23, 1024  }
 0x286   : > { %5172 = vsyncadd (!%p4813_p4), %s3599_s23, 4294966272  ;;  %s6494_s21 = sld [smem:[#allocation19_spill]]  ;;  %s6495_s24 = sld [smem:[#allocation17_spill]] }
 0x287   : > { %s6496_s20 = sld [smem:[#allocation20_spill]]  ;;  %s6497_s18 = smov %s5179_s19 }
 0x28c   : > { %p20_p7 = scmp.ge.s32.totalorder %s6494_s21, 4   ;;  %s6498_s19 = smov %s6495_s24 }
 0x28e   :  { %22 = sbr.rel (!%p20_p7) target bundleno = 10 (0xa), region = 121 }
 0x295   :  { %3604 = vsyncpa [#allocation3], 1 }
 0x296   :  { %3606 = vsyncpa [#allocation3 + $0x1], 1 }
 0x297   :  { %3607 = vsyncpa [#allocation6], 1 }
 0x298   :  { %3608 = vsyncpa [#allocation9], 1 }
 0x299   :  { %3609 = vsyncpa [#allocation4], 1 }
 0x29a   :  { %3611 = vsyncpa [#allocation4 + $0x1], 1 }

</bundles_post_ra>
